<compile_context>
chip_gen: v5e
topology: v5e:2x2
jax: 0.10.0
libtpu: 0.0.40
codegen_flags: <defaults>
</compile_context>

<pallas_src>
import functools

import jax
import jax.numpy as jnp
import numpy as np
from jax.experimental import pallas as pl
from jax.experimental.pallas import tpu as pltpu

# ---- model config (shapes implied by lwLSTM.__init__, kept small) ----
VOCAB_SIZE = 50
EMBEDDING_DIM = 32
HIDDEN_DIM = 32
OUTPUT_DIM = 4
N_LAYERS = 2
BIDIRECTIONAL = True
PAD_IDX = 0

T = 8            # sequence length
B = 2            # batch
BP = 8           # batch padded to one sublane tile (8 rows)
VOCAB_PAD = 64   # vocab rows padded for the one-hot matmul K dim

H = HIDDEN_DIM
E = EMBEDDING_DIM
G = 4 * H        # per-direction gate width   (128 lanes)
DG = 2 * G       # both-direction gate width  (256 lanes)

# Static, 8-row-aligned offsets into the single packed parameter buffer [NP, DG].
OFF_WIH0 = 0                    # [E, DG]   layer-0 input weights  (fwd|bwd)
OFF_WHH0 = OFF_WIH0 + E         # [2H, DG]  layer-0 recurrent, block-diagonal
OFF_WIH1 = OFF_WHH0 + 2 * H     # [2H, DG]  layer-1 input weights  (fwd|bwd)
OFF_WHH1 = OFF_WIH1 + 2 * H     # [2H, DG]  layer-1 recurrent, block-diagonal
OFF_B0 = OFF_WHH1 + 2 * H       # [1, DG]   layer-0 bias (b_ih + b_hh, fwd|bwd)
OFF_B1 = OFF_B0 + 8             # [1, DG]   layer-1 bias
OFF_FCW = OFF_B1 + 8            # [2H, DG]  fc weight in lanes 0:OUTPUT_DIM
OFF_FCB = OFF_FCW + 2 * H       # [1, DG]   fc bias   in lanes 0:OUTPUT_DIM
NP = OFF_FCB + 8                # 312 rows total (multiple of 8)


def _prefer_combined_dirs():
    # v6e/v7x (2x256^2 MXU): one 256-wide block-diagonal recurrent matmul/step.
    # v5e (4x128^2 MXU): keep two 128-wide per-direction matmuls.
    try:
        return "v5" not in jax.devices()[0].device_kind.lower()
    except Exception:
        return True


COMBINE_DIRS = _prefer_combined_dirs()


# ---------------------------------------------------------------------------
# Fused Pallas kernel: embedding + 2-layer bi-LSTM + fc, all in VMEM
# ---------------------------------------------------------------------------
def _fused_lstm_fc_kernel(tok_ref, len_ref, emb_ref, p_ref, out_ref,
                          gx_ref, seq_ref, *, combine_dirs):
    # ---- in-kernel embedding gather: one-hot @ table on the MXU ----
    tok = tok_ref[...]                                            # [T*BP, 1] i32
    vocab_iota = jax.lax.broadcasted_iota(jnp.int32, (T * BP, VOCAB_PAD), 1)
    one_hot = (tok == vocab_iota).astype(jnp.float32)             # [T*BP, VP]
    x0 = jnp.dot(one_hot, emb_ref[...],
                 preferred_element_type=jnp.float32)              # [T*BP, E]
    # dropout(embedded): identity in eval mode.

    len_v = len_ref[...]                                          # [BP, 1] i32

    def cell(gates, h, c, m):
        # gates: [BP, G] pre-activations laid out i|f|g|o; m: [BP, 1] bool.
        sg = jax.nn.sigmoid(gates)
        i = sg[:, 0 * H:1 * H]
        f = sg[:, 1 * H:2 * H]
        o = sg[:, 3 * H:4 * H]
        g = jnp.tanh(gates[:, 2 * H:3 * H])
        c_new = f * c + i * g
        h_new = o * jnp.tanh(c_new)
        # pack_padded_sequence semantics: freeze state once t >= length[b].
        c = jnp.where(m, c_new, c)
        h = jnp.where(m, h_new, h)
        return h, c

    def run_layer(x_in, wih_off, wih_rows, whh_off, b_off, write_seq):
        # Hoisted input projection for BOTH directions -> gx scratch [T*BP, DG]
        wih = p_ref[wih_off:wih_off + wih_rows, :]
        bias = p_ref[b_off:b_off + 1, :]
        gx_ref[...] = (jnp.dot(x_in, wih, preferred_element_type=jnp.float32)
                       + bias)

        if combine_dirs:
            whh_c = p_ref[whh_off:whh_off + 2 * H, :]       # [2H, DG] block-diag
        else:
            whh_f = p_ref[whh_off:whh_off + H, 0:G]         # [H, G]
            whh_b = p_ref[whh_off + H:whh_off + 2 * H, G:DG]

        zeros = jnp.zeros((BP, H), jnp.float32)
        h_f, c_f, h_b, c_b = zeros, zeros, zeros, zeros

        # Statically-unrolled time loop; fwd (t=s) and bwd (t=T-1-s) chains are
        # independent and interleave inside each iteration.
        for s in range(T):
            tf, tb = s, T - 1 - s
            gx_f = gx_ref[pl.ds(tf * BP, BP), 0:G]          # aligned row blocks
            gx_b = gx_ref[pl.ds(tb * BP, BP), G:DG]
            if combine_dirs:
                rec = jnp.dot(jnp.concatenate([h_f, h_b], axis=-1), whh_c,
                              preferred_element_type=jnp.float32)   # [BP, DG]
                pre_f = gx_f + rec[:, 0:G]
                pre_b = gx_b + rec[:, G:DG]
            else:
                pre_f = gx_f + jnp.dot(h_f, whh_f,
                                       preferred_element_type=jnp.float32)
                pre_b = gx_b + jnp.dot(h_b, whh_b,
                                       preferred_element_type=jnp.float32)
            h_f, c_f = cell(pre_f, h_f, c_f, len_v > tf)
            h_b, c_b = cell(pre_b, h_b, c_b, len_v > tb)
            if write_seq:
                seq_ref[pl.ds(tf * BP, BP), 0:H] = h_f
                seq_ref[pl.ds(tb * BP, BP), H:2 * H] = h_b
        return h_f, h_b

    # ---- layer 0 (input = embedded tokens) ----
    run_layer(x0, OFF_WIH0, E, OFF_WHH0, OFF_B0, write_seq=True)
    # inter-layer dropout: identity in eval mode.
    # ---- layer 1 (input = layer-0 sequence output streamed to scratch) ----
    h_f1, h_b1 = run_layer(seq_ref[...], OFF_WIH1, 2 * H, OFF_WHH1, OFF_B1,
                           write_seq=False)

    # ---- final hidden -> fc (dropout(hidden) identity in eval mode) ----
    hidden_cat = jnp.concatenate([h_f1, h_b1], axis=-1)           # [BP, 2H]
    fcw = p_ref[OFF_FCW:OFF_FCW + 2 * H, :]                       # [2H, DG]
    fcb = p_ref[OFF_FCB:OFF_FCB + 1, :]
    logits = jnp.dot(hidden_cat, fcw,
                     preferred_element_type=jnp.float32) + fcb    # [BP, DG]
    out_ref[...] = logits[0:B, 0:OUTPUT_DIM]


# ---------------------------------------------------------------------------
# Forward pass wrapper (only tiny token/length padding remains outside)
# ---------------------------------------------------------------------------
def lw_lstm_forward(params, text, text_lengths):
    tok = jnp.pad(text.astype(jnp.int32), ((0, 0), (0, BP - B)),
                  constant_values=PAD_IDX).reshape(T * BP, 1)
    lens = jnp.pad(text_lengths.astype(jnp.int32), (0, BP - B)).reshape(BP, 1)

    kernel = functools.partial(_fused_lstm_fc_kernel, combine_dirs=COMBINE_DIRS)
    return pl.pallas_call(
        kernel,
        out_shape=jax.ShapeDtypeStruct((B, OUTPUT_DIM), jnp.float32),
        scratch_shapes=[pltpu.VMEM((T * BP, DG), jnp.float32),      # gx staging
                        pltpu.VMEM((T * BP, 2 * H), jnp.float32)],  # layer-0 seq
    )(tok, lens, params["emb_pad"], params["packed"])


# ---------------------------------------------------------------------------
# One-time parameter packing (done at init, NOT per call)
# ---------------------------------------------------------------------------
def pack_params(embedding, lstm, fc_w, fc_b):
    emb_pad = jnp.zeros((VOCAB_PAD, E), jnp.float32).at[:VOCAB_SIZE].set(embedding)

    def layer_block(layer):
        (w_ih_f, w_hh_f, b_f), (w_ih_b, w_hh_b, b_b) = lstm[layer]
        wih = jnp.concatenate([w_ih_f, w_ih_b], axis=1)            # [Din, DG]
        whh = jnp.zeros((2 * H, DG), jnp.float32)
        whh = whh.at[0:H, 0:G].set(w_hh_f).at[H:2 * H, G:DG].set(w_hh_b)
        b = jnp.concatenate([b_f, b_b], axis=1)                    # [1, DG]
        return wih, whh, b

    wih0, whh0, b0 = layer_block(0)
    wih1, whh1, b1 = layer_block(1)

    buf = jnp.zeros((NP, DG), jnp.float32)
    buf = buf.at[OFF_WIH0:OFF_WIH0 + E, :].set(wih0)
    buf = buf.at[OFF_WHH0:OFF_WHH0 + 2 * H, :].set(whh0)
    buf = buf.at[OFF_WIH1:OFF_WIH1 + 2 * H, :].set(wih1)
    buf = buf.at[OFF_WHH1:OFF_WHH1 + 2 * H, :].set(whh1)
    buf = buf.at[OFF_B0, :].set(b0[0])
    buf = buf.at[OFF_B1, :].set(b1[0])
    buf = buf.at[OFF_FCW:OFF_FCW + 2 * H, 0:OUTPUT_DIM].set(fc_w)
    buf = buf.at[OFF_FCB, 0:OUTPUT_DIM].set(fc_b)
    return emb_pad, buf


# ---------------------------------------------------------------------------
# Pure-JAX reference (for correctness check)
# ---------------------------------------------------------------------------
def reference_forward(params, text, text_lengths):
    emb = jnp.take(params["embedding"], text, axis=0)
    mask = (jnp.arange(T)[:, None] < text_lengths[None, :]).astype(jnp.float32)[:, :, None]

    def run_dir(x_seq, w_ih, w_hh, b, reverse):
        def step(carry, inp):
            h, c = carry
            x_t, m_t = inp
            gates = x_t @ w_ih + h @ w_hh + b
            i = jax.nn.sigmoid(gates[:, :H])
            f = jax.nn.sigmoid(gates[:, H:2 * H])
            g = jnp.tanh(gates[:, 2 * H:3 * H])
            o = jax.nn.sigmoid(gates[:, 3 * H:])
            c_new = f * c + i * g
            h_new = o * jnp.tanh(c_new)
            c2 = m_t * c_new + (1.0 - m_t) * c
            h2 = m_t * h_new + (1.0 - m_t) * h
            return (h2, c2), h2

        xs, ms = (x_seq[::-1], mask[::-1]) if reverse else (x_seq, mask)
        init = (jnp.zeros((B, H), jnp.float32), jnp.zeros((B, H), jnp.float32))
        (h_f, _), outs = jax.lax.scan(step, init, (xs, ms))
        if reverse:
            outs = outs[::-1]
        return outs, h_f

    num_dirs = 2 if BIDIRECTIONAL else 1
    layer_in = emb
    h_finals = None
    for l in range(N_LAYERS):
        dir_outs, dir_finals = [], []
        for d in range(num_dirs):
            w_ih, w_hh, b = params["lstm"][l][d]
            outs, h_f = run_dir(layer_in, w_ih, w_hh, b, reverse=(d == 1))
            dir_outs.append(outs)
            dir_finals.append(h_f)
        layer_in = (jnp.concatenate(dir_outs, axis=-1)
                    if num_dirs == 2 else dir_outs[0])
        h_finals = dir_finals

    hidden = (jnp.concatenate([h_finals[0], h_finals[1]], axis=-1)
              if BIDIRECTIONAL else h_finals[0])
    return hidden @ params["fc_w"] + params["fc_b"]


# ---------------------------------------------------------------------------
# Deterministic parameter init
# ---------------------------------------------------------------------------
def init_params(key):
    keys = jax.random.split(key, 32)
    ki = iter(keys)
    scale = 0.1

    emb = scale * jax.random.normal(next(ki), (VOCAB_SIZE, EMBEDDING_DIM), jnp.float32)
    emb = emb.at[PAD_IDX].set(0.0)  # nn.Embedding padding_idx row is zero

    num_dirs = 2 if BIDIRECTIONAL else 1
    lstm = []
    for l in range(N_LAYERS):
        din = EMBEDDING_DIM if l == 0 else HIDDEN_DIM * num_dirs
        dirs = []
        for _ in range(num_dirs):
            w_ih = scale * jax.random.normal(next(ki), (din, 4 * HIDDEN_DIM), jnp.float32)
            w_hh = scale * jax.random.normal(next(ki), (HIDDEN_DIM, 4 * HIDDEN_DIM), jnp.float32)
            b_ih = scale * jax.random.normal(next(ki), (4 * HIDDEN_DIM,), jnp.float32)
            b_hh = scale * jax.random.normal(next(ki), (4 * HIDDEN_DIM,), jnp.float32)
            b = (b_ih + b_hh).reshape(1, 4 * HIDDEN_DIM)  # PyTorch adds b_ih + b_hh
            dirs.append((w_ih, w_hh, b))
        lstm.append(dirs)

    fc_in = HIDDEN_DIM * num_dirs
    fc_w = scale * jax.random.normal(next(ki), (fc_in, OUTPUT_DIM), jnp.float32)
    fc_b = scale * jax.random.normal(next(ki), (OUTPUT_DIM,), jnp.float32)

    params = {"embedding": emb, "lstm": lstm, "fc_w": fc_w, "fc_b": fc_b}
    params["emb_pad"], params["packed"] = pack_params(emb, lstm, fc_w, fc_b)
    return params


if __name__ == "__main__":
    root = jax.random.PRNGKey(0)
    k_params, k_tokens = jax.random.split(root)

    params = init_params(k_params)

    # deterministic example input: [T, B] token ids, padded past each length
    text_lengths = jnp.array([T, 5], dtype=jnp.int32)
    text = jax.random.randint(k_tokens, (T, B), 1, VOCAB_SIZE, dtype=jnp.int32)
    valid = jnp.arange(T)[:, None] < text_lengths[None, :]
    text = jnp.where(valid, text, PAD_IDX)

    forward = jax.jit(lw_lstm_forward)
    out = jax.block_until_ready(forward(params, text, text_lengths))
    ref = jax.block_until_ready(reference_forward(params, text, text_lengths))

    assert out.shape == (B, OUTPUT_DIM)
    np.testing.assert_allclose(np.asarray(out), np.asarray(ref), rtol=1e-4, atol=1e-4)
    print("KERNEL_OK")
</pallas_src>

<mosaic_0001>
module attributes {stable_mosaic.version = 11 : i64} {
  func.func @_fused_lstm_fc_kernel(%arg0: memref<64x1xi32, #tpu.memory_space<vmem>>, %arg1: memref<8x1xi32, #tpu.memory_space<vmem>>, %arg2: memref<64x32xf32, #tpu.memory_space<vmem>>, %arg3: memref<312x256xf32, #tpu.memory_space<vmem>>, %arg4: memref<2x4xf32, #tpu.memory_space<vmem>>, %arg5: memref<64x256xf32, #tpu.memory_space<vmem>>, %arg6: memref<64x64xf32, #tpu.memory_space<vmem>>) attributes {dimension_semantics = [], scalar_prefetch = 0 : i64, scratch_operands = 2 : i64, tpu.core_type = #tpu.core_type<tc>} {
    %c0 = arith.constant 0 : index
    %c0_0 = arith.constant 0 : index
    %0 = vector.load %arg0[%c0, %c0_0] : memref<64x1xi32, #tpu.memory_space<vmem>>, vector<64x1xi32>
    %1 = tpu.iota {dimensions = array<i32: 1>} : vector<64x64xi32>
    %2 = vector.broadcast %0 : vector<64x1xi32> to vector<64x64xi32>
    %3 = arith.cmpi eq, %2, %1 : vector<64x64xi32>
    %4 = arith.extui %3 : vector<64x64xi1> to vector<64x64xi32>
    %5 = arith.sitofp %4 : vector<64x64xi32> to vector<64x64xf32>
    %c0_1 = arith.constant 0 : index
    %c0_2 = arith.constant 0 : index
    %6 = vector.load %arg2[%c0_1, %c0_2] : memref<64x32xf32, #tpu.memory_space<vmem>>, vector<64x32xf32>
    %cst = arith.constant dense<0.000000e+00> : vector<64x32xf32>
    %7 = tpu.matmul %5, %6, %cst {dimension_numbers = #tpu.dot_dimension_numbers<[1], [0], [0], [1], [0, 0, 1, 1], [], []>} : vector<64x64xf32>, vector<64x32xf32>, vector<64x32xf32> -> vector<64x32xf32>
    %c0_3 = arith.constant 0 : index
    %c0_4 = arith.constant 0 : index
    %8 = vector.load %arg1[%c0_3, %c0_4] : memref<8x1xi32, #tpu.memory_space<vmem>>, vector<8x1xi32>
    %c0_5 = arith.constant 0 : index
    %c0_6 = arith.constant 0 : index
    %9 = vector.load %arg3[%c0_5, %c0_6] : memref<312x256xf32, #tpu.memory_space<vmem>>, vector<32x256xf32>
    %c224 = arith.constant 224 : index
    %c0_7 = arith.constant 0 : index
    %10 = vector.load %arg3[%c224, %c0_7] : memref<312x256xf32, #tpu.memory_space<vmem>>, vector<1x256xf32>
    %cst_8 = arith.constant dense<0.000000e+00> : vector<64x256xf32>
    %11 = tpu.matmul %7, %9, %cst_8 {dimension_numbers = #tpu.dot_dimension_numbers<[1], [0], [0], [1], [0, 0, 1, 1], [], []>} : vector<64x32xf32>, vector<32x256xf32>, vector<64x256xf32> -> vector<64x256xf32>
    %12 = vector.broadcast %10 : vector<1x256xf32> to vector<64x256xf32>
    %13 = arith.addf %11, %12 : vector<64x256xf32>
    %c0_9 = arith.constant 0 : index
    %c0_10 = arith.constant 0 : index
    %14 = vector.load %arg5[%c0_9, %c0_10] : memref<64x256xf32, #tpu.memory_space<vmem>>, vector<64x256xf32>
    tpu.vector_store %arg5[%c0_9, %c0_10], %13 {strides = array<i32>} : memref<64x256xf32, #tpu.memory_space<vmem>>, vector<64x256xf32>,
    %c32 = arith.constant 32 : index
    %c0_11 = arith.constant 0 : index
    %15 = vector.load %arg3[%c32, %c0_11] : memref<312x256xf32, #tpu.memory_space<vmem>>, vector<64x256xf32>
    %cst_12 = arith.constant 0.000000e+00 : f32
    %16 = vector.broadcast %cst_12 : f32 to vector<8x32xf32>
    %c0_13 = arith.constant 0 : index
    %c0_14 = arith.constant 0 : index
    %17 = vector.load %arg5[%c0_13, %c0_14] : memref<64x256xf32, #tpu.memory_space<vmem>>, vector<8x128xf32>
    %c56 = arith.constant 56 : index
    %c128 = arith.constant 128 : index
    %18 = vector.load %arg5[%c56, %c128] : memref<64x256xf32, #tpu.memory_space<vmem>>, vector<8x128xf32>
    %19 = tpu.concatenate %16, %16 in 1 : vector<8x32xf32>, vector<8x32xf32> -> vector<8x64xf32>
    %cst_15 = arith.constant dense<0.000000e+00> : vector<8x256xf32>
    %20 = tpu.matmul %19, %15, %cst_15 {dimension_numbers = #tpu.dot_dimension_numbers<[1], [0], [0], [1], [0, 0, 1, 1], [], []>} : vector<8x64xf32>, vector<64x256xf32>, vector<8x256xf32> -> vector<8x256xf32>
    %21 = vector.extract_strided_slice %20 {offsets = [0, 0], sizes = [8, 128], strides = [1, 1]} : vector<8x256xf32> to vector<8x128xf32>
    %22 = arith.addf %17, %21 : vector<8x128xf32>
    %23 = vector.extract_strided_slice %20 {offsets = [0, 128], sizes = [8, 128], strides = [1, 1]} : vector<8x256xf32> to vector<8x128xf32>
    %24 = arith.addf %18, %23 : vector<8x128xf32>
    %c0_i32 = arith.constant 0 : i32
    %25 = vector.broadcast %c0_i32 : i32 to vector<8x1xi32>
    %26 = arith.cmpi sgt, %8, %25 : vector<8x1xi32>
    %27 = arith.negf %22 : vector<8x128xf32>
    %28 = math.exp %27 : vector<8x128xf32>
    %cst_16 = arith.constant 1.000000e+00 : f32
    %29 = vector.broadcast %cst_16 : f32 to vector<8x128xf32>
    %30 = arith.addf %29, %28 : vector<8x128xf32>
    %31 = arith.divf %29, %30 : vector<8x128xf32>
    %32 = vector.extract_strided_slice %31 {offsets = [0, 0], sizes = [8, 32], strides = [1, 1]} : vector<8x128xf32> to vector<8x32xf32>
    %33 = vector.extract_strided_slice %31 {offsets = [0, 32], sizes = [8, 32], strides = [1, 1]} : vector<8x128xf32> to vector<8x32xf32>
    %34 = vector.extract_strided_slice %31 {offsets = [0, 96], sizes = [8, 32], strides = [1, 1]} : vector<8x128xf32> to vector<8x32xf32>
    %35 = vector.extract_strided_slice %22 {offsets = [0, 64], sizes = [8, 32], strides = [1, 1]} : vector<8x128xf32> to vector<8x32xf32>
    %36 = math.tanh %35 : vector<8x32xf32>
    %37 = arith.mulf %33, %16 : vector<8x32xf32>
    %38 = arith.mulf %32, %36 : vector<8x32xf32>
    %39 = arith.addf %37, %38 : vector<8x32xf32>
    %40 = math.tanh %39 : vector<8x32xf32>
    %41 = arith.mulf %34, %40 : vector<8x32xf32>
    %42 = vector.shape_cast %26 : vector<8x1xi1> to vector<8x1xi1>
    %43 = vector.broadcast %42 : vector<8x1xi1> to vector<8x32xi1>
    %44 = arith.select %43, %39, %16 : vector<8x32xi1>, vector<8x32xf32>
    %45 = vector.shape_cast %26 : vector<8x1xi1> to vector<8x1xi1>
    %46 = vector.broadcast %45 : vector<8x1xi1> to vector<8x32xi1>
    %47 = arith.select %46, %41, %16 : vector<8x32xi1>, vector<8x32xf32>
    %c7_i32 = arith.constant 7 : i32
    %48 = vector.broadcast %c7_i32 : i32 to vector<8x1xi32>
    %49 = arith.cmpi sgt, %8, %48 : vector<8x1xi32>
    %50 = arith.negf %24 : vector<8x128xf32>
    %51 = math.exp %50 : vector<8x128xf32>
    %cst_17 = arith.constant 1.000000e+00 : f32
    %52 = vector.broadcast %cst_17 : f32 to vector<8x128xf32>
    %53 = arith.addf %52, %51 : vector<8x128xf32>
    %54 = arith.divf %52, %53 : vector<8x128xf32>
    %55 = vector.extract_strided_slice %54 {offsets = [0, 0], sizes = [8, 32], strides = [1, 1]} : vector<8x128xf32> to vector<8x32xf32>
    %56 = vector.extract_strided_slice %54 {offsets = [0, 32], sizes = [8, 32], strides = [1, 1]} : vector<8x128xf32> to vector<8x32xf32>
    %57 = vector.extract_strided_slice %54 {offsets = [0, 96], sizes = [8, 32], strides = [1, 1]} : vector<8x128xf32> to vector<8x32xf32>
    %58 = vector.extract_strided_slice %24 {offsets = [0, 64], sizes = [8, 32], strides = [1, 1]} : vector<8x128xf32> to vector<8x32xf32>
    %59 = math.tanh %58 : vector<8x32xf32>
    %60 = arith.mulf %56, %16 : vector<8x32xf32>
    %61 = arith.mulf %55, %59 : vector<8x32xf32>
    %62 = arith.addf %60, %61 : vector<8x32xf32>
    %63 = math.tanh %62 : vector<8x32xf32>
    %64 = arith.mulf %57, %63 : vector<8x32xf32>
    %65 = vector.shape_cast %49 : vector<8x1xi1> to vector<8x1xi1>
    %66 = vector.broadcast %65 : vector<8x1xi1> to vector<8x32xi1>
    %67 = arith.select %66, %62, %16 : vector<8x32xi1>, vector<8x32xf32>
    %68 = vector.shape_cast %49 : vector<8x1xi1> to vector<8x1xi1>
    %69 = vector.broadcast %68 : vector<8x1xi1> to vector<8x32xi1>
    %70 = arith.select %69, %64, %16 : vector<8x32xi1>, vector<8x32xf32>
    %c0_18 = arith.constant 0 : index
    %c0_19 = arith.constant 0 : index
    %71 = vector.load %arg6[%c0_18, %c0_19] : memref<64x64xf32, #tpu.memory_space<vmem>>, vector<8x32xf32>
    tpu.vector_store %arg6[%c0_18, %c0_19], %47 {strides = array<i32>} : memref<64x64xf32, #tpu.memory_space<vmem>>, vector<8x32xf32>,
    %c56_20 = arith.constant 56 : index
    %c32_21 = arith.constant 32 : index
    %72 = vector.load %arg6[%c56_20, %c32_21] : memref<64x64xf32, #tpu.memory_space<vmem>>, vector<8x32xf32>
    tpu.vector_store %arg6[%c56_20, %c32_21], %70 {strides = array<i32>} : memref<64x64xf32, #tpu.memory_space<vmem>>, vector<8x32xf32>,
    %c8 = arith.constant 8 : index
    %c0_22 = arith.constant 0 : index
    %73 = vector.load %arg5[%c8, %c0_22] : memref<64x256xf32, #tpu.memory_space<vmem>>, vector<8x128xf32>
    %c48 = arith.constant 48 : index
    %c128_23 = arith.constant 128 : index
    %74 = vector.load %arg5[%c48, %c128_23] : memref<64x256xf32, #tpu.memory_space<vmem>>, vector<8x128xf32>
    %75 = tpu.concatenate %47, %70 in 1 : vector<8x32xf32>, vector<8x32xf32> -> vector<8x64xf32>
    %cst_24 = arith.constant dense<0.000000e+00> : vector<8x256xf32>
    %76 = tpu.matmul %75, %15, %cst_24 {dimension_numbers = #tpu.dot_dimension_numbers<[1], [0], [0], [1], [0, 0, 1, 1], [], []>} : vector<8x64xf32>, vector<64x256xf32>, vector<8x256xf32> -> vector<8x256xf32>
    %77 = vector.extract_strided_slice %76 {offsets = [0, 0], sizes = [8, 128], strides = [1, 1]} : vector<8x256xf32> to vector<8x128xf32>
    %78 = arith.addf %73, %77 : vector<8x128xf32>
    %79 = vector.extract_strided_slice %76 {offsets = [0, 128], sizes = [8, 128], strides = [1, 1]} : vector<8x256xf32> to vector<8x128xf32>
    %80 = arith.addf %74, %79 : vector<8x128xf32>
    %c1_i32 = arith.constant 1 : i32
    %81 = vector.broadcast %c1_i32 : i32 to vector<8x1xi32>
    %82 = arith.cmpi sgt, %8, %81 : vector<8x1xi32>
    %83 = arith.negf %78 : vector<8x128xf32>
    %84 = math.exp %83 : vector<8x128xf32>
    %cst_25 = arith.constant 1.000000e+00 : f32
    %85 = vector.broadcast %cst_25 : f32 to vector<8x128xf32>
    %86 = arith.addf %85, %84 : vector<8x128xf32>
    %87 = arith.divf %85, %86 : vector<8x128xf32>
    %88 = vector.extract_strided_slice %87 {offsets = [0, 0], sizes = [8, 32], strides = [1, 1]} : vector<8x128xf32> to vector<8x32xf32>
    %89 = vector.extract_strided_slice %87 {offsets = [0, 32], sizes = [8, 32], strides = [1, 1]} : vector<8x128xf32> to vector<8x32xf32>
    %90 = vector.extract_strided_slice %87 {offsets = [0, 96], sizes = [8, 32], strides = [1, 1]} : vector<8x128xf32> to vector<8x32xf32>
    %91 = vector.extract_strided_slice %78 {offsets = [0, 64], sizes = [8, 32], strides = [1, 1]} : vector<8x128xf32> to vector<8x32xf32>
    %92 = math.tanh %91 : vector<8x32xf32>
    %93 = arith.mulf %89, %44 : vector<8x32xf32>
    %94 = arith.mulf %88, %92 : vector<8x32xf32>
    %95 = arith.addf %93, %94 : vector<8x32xf32>
    %96 = math.tanh %95 : vector<8x32xf32>
    %97 = arith.mulf %90, %96 : vector<8x32xf32>
    %98 = vector.shape_cast %82 : vector<8x1xi1> to vector<8x1xi1>
    %99 = vector.broadcast %98 : vector<8x1xi1> to vector<8x32xi1>
    %100 = arith.select %99, %95, %44 : vector<8x32xi1>, vector<8x32xf32>
    %101 = vector.shape_cast %82 : vector<8x1xi1> to vector<8x1xi1>
    %102 = vector.broadcast %101 : vector<8x1xi1> to vector<8x32xi1>
    %103 = arith.select %102, %97, %47 : vector<8x32xi1>, vector<8x32xf32>
    %c6_i32 = arith.constant 6 : i32
    %104 = vector.broadcast %c6_i32 : i32 to vector<8x1xi32>
    %105 = arith.cmpi sgt, %8, %104 : vector<8x1xi32>
    %106 = arith.negf %80 : vector<8x128xf32>
    %107 = math.exp %106 : vector<8x128xf32>
    %cst_26 = arith.constant 1.000000e+00 : f32
    %108 = vector.broadcast %cst_26 : f32 to vector<8x128xf32>
    %109 = arith.addf %108, %107 : vector<8x128xf32>
    %110 = arith.divf %108, %109 : vector<8x128xf32>
    %111 = vector.extract_strided_slice %110 {offsets = [0, 0], sizes = [8, 32], strides = [1, 1]} : vector<8x128xf32> to vector<8x32xf32>
    %112 = vector.extract_strided_slice %110 {offsets = [0, 32], sizes = [8, 32], strides = [1, 1]} : vector<8x128xf32> to vector<8x32xf32>
    %113 = vector.extract_strided_slice %110 {offsets = [0, 96], sizes = [8, 32], strides = [1, 1]} : vector<8x128xf32> to vector<8x32xf32>
    %114 = vector.extract_strided_slice %80 {offsets = [0, 64], sizes = [8, 32], strides = [1, 1]} : vector<8x128xf32> to vector<8x32xf32>
    %115 = math.tanh %114 : vector<8x32xf32>
    %116 = arith.mulf %112, %67 : vector<8x32xf32>
    %117 = arith.mulf %111, %115 : vector<8x32xf32>
    %118 = arith.addf %116, %117 : vector<8x32xf32>
    %119 = math.tanh %118 : vector<8x32xf32>
    %120 = arith.mulf %113, %119 : vector<8x32xf32>
    %121 = vector.shape_cast %105 : vector<8x1xi1> to vector<8x1xi1>
    %122 = vector.broadcast %121 : vector<8x1xi1> to vector<8x32xi1>
    %123 = arith.select %122, %118, %67 : vector<8x32xi1>, vector<8x32xf32>
    %124 = vector.shape_cast %105 : vector<8x1xi1> to vector<8x1xi1>
    %125 = vector.broadcast %124 : vector<8x1xi1> to vector<8x32xi1>
    %126 = arith.select %125, %120, %70 : vector<8x32xi1>, vector<8x32xf32>
    %c8_27 = arith.constant 8 : index
    %c0_28 = arith.constant 0 : index
    %127 = vector.load %arg6[%c8_27, %c0_28] : memref<64x64xf32, #tpu.memory_space<vmem>>, vector<8x32xf32>
    tpu.vector_store %arg6[%c8_27, %c0_28], %103 {strides = array<i32>} : memref<64x64xf32, #tpu.memory_space<vmem>>, vector<8x32xf32>,
    %c48_29 = arith.constant 48 : index
    %c32_30 = arith.constant 32 : index
    %128 = vector.load %arg6[%c48_29, %c32_30] : memref<64x64xf32, #tpu.memory_space<vmem>>, vector<8x32xf32>
    tpu.vector_store %arg6[%c48_29, %c32_30], %126 {strides = array<i32>} : memref<64x64xf32, #tpu.memory_space<vmem>>, vector<8x32xf32>,
    %c16 = arith.constant 16 : index
    %c0_31 = arith.constant 0 : index
    %129 = vector.load %arg5[%c16, %c0_31] : memref<64x256xf32, #tpu.memory_space<vmem>>, vector<8x128xf32>
    %c40 = arith.constant 40 : index
    %c128_32 = arith.constant 128 : index
    %130 = vector.load %arg5[%c40, %c128_32] : memref<64x256xf32, #tpu.memory_space<vmem>>, vector<8x128xf32>
    %131 = tpu.concatenate %103, %126 in 1 : vector<8x32xf32>, vector<8x32xf32> -> vector<8x64xf32>
    %cst_33 = arith.constant dense<0.000000e+00> : vector<8x256xf32>
    %132 = tpu.matmul %131, %15, %cst_33 {dimension_numbers = #tpu.dot_dimension_numbers<[1], [0], [0], [1], [0, 0, 1, 1], [], []>} : vector<8x64xf32>, vector<64x256xf32>, vector<8x256xf32> -> vector<8x256xf32>
    %133 = vector.extract_strided_slice %132 {offsets = [0, 0], sizes = [8, 128], strides = [1, 1]} : vector<8x256xf32> to vector<8x128xf32>
    %134 = arith.addf %129, %133 : vector<8x128xf32>
    %135 = vector.extract_strided_slice %132 {offsets = [0, 128], sizes = [8, 128], strides = [1, 1]} : vector<8x256xf32> to vector<8x128xf32>
    %136 = arith.addf %130, %135 : vector<8x128xf32>
    %c2_i32 = arith.constant 2 : i32
    %137 = vector.broadcast %c2_i32 : i32 to vector<8x1xi32>
    %138 = arith.cmpi sgt, %8, %137 : vector<8x1xi32>
    %139 = arith.negf %134 : vector<8x128xf32>
    %140 = math.exp %139 : vector<8x128xf32>
    %cst_34 = arith.constant 1.000000e+00 : f32
    %141 = vector.broadcast %cst_34 : f32 to vector<8x128xf32>
    %142 = arith.addf %141, %140 : vector<8x128xf32>
    %143 = arith.divf %141, %142 : vector<8x128xf32>
    %144 = vector.extract_strided_slice %143 {offsets = [0, 0], sizes = [8, 32], strides = [1, 1]} : vector<8x128xf32> to vector<8x32xf32>
    %145 = vector.extract_strided_slice %143 {offsets = [0, 32], sizes = [8, 32], strides = [1, 1]} : vector<8x128xf32> to vector<8x32xf32>
    %146 = vector.extract_strided_slice %143 {offsets = [0, 96], sizes = [8, 32], strides = [1, 1]} : vector<8x128xf32> to vector<8x32xf32>
    %147 = vector.extract_strided_slice %134 {offsets = [0, 64], sizes = [8, 32], strides = [1, 1]} : vector<8x128xf32> to vector<8x32xf32>
    %148 = math.tanh %147 : vector<8x32xf32>
    %149 = arith.mulf %145, %100 : vector<8x32xf32>
    %150 = arith.mulf %144, %148 : vector<8x32xf32>
    %151 = arith.addf %149, %150 : vector<8x32xf32>
    %152 = math.tanh %151 : vector<8x32xf32>
    %153 = arith.mulf %146, %152 : vector<8x32xf32>
    %154 = vector.shape_cast %138 : vector<8x1xi1> to vector<8x1xi1>
    %155 = vector.broadcast %154 : vector<8x1xi1> to vector<8x32xi1>
    %156 = arith.select %155, %151, %100 : vector<8x32xi1>, vector<8x32xf32>
    %157 = vector.shape_cast %138 : vector<8x1xi1> to vector<8x1xi1>
    %158 = vector.broadcast %157 : vector<8x1xi1> to vector<8x32xi1>
    %159 = arith.select %158, %153, %103 : vector<8x32xi1>, vector<8x32xf32>
    %c5_i32 = arith.constant 5 : i32
    %160 = vector.broadcast %c5_i32 : i32 to vector<8x1xi32>
    %161 = arith.cmpi sgt, %8, %160 : vector<8x1xi32>
    %162 = arith.negf %136 : vector<8x128xf32>
    %163 = math.exp %162 : vector<8x128xf32>
    %cst_35 = arith.constant 1.000000e+00 : f32
    %164 = vector.broadcast %cst_35 : f32 to vector<8x128xf32>
    %165 = arith.addf %164, %163 : vector<8x128xf32>
    %166 = arith.divf %164, %165 : vector<8x128xf32>
    %167 = vector.extract_strided_slice %166 {offsets = [0, 0], sizes = [8, 32], strides = [1, 1]} : vector<8x128xf32> to vector<8x32xf32>
    %168 = vector.extract_strided_slice %166 {offsets = [0, 32], sizes = [8, 32], strides = [1, 1]} : vector<8x128xf32> to vector<8x32xf32>
    %169 = vector.extract_strided_slice %166 {offsets = [0, 96], sizes = [8, 32], strides = [1, 1]} : vector<8x128xf32> to vector<8x32xf32>
    %170 = vector.extract_strided_slice %136 {offsets = [0, 64], sizes = [8, 32], strides = [1, 1]} : vector<8x128xf32> to vector<8x32xf32>
    %171 = math.tanh %170 : vector<8x32xf32>
    %172 = arith.mulf %168, %123 : vector<8x32xf32>
    %173 = arith.mulf %167, %171 : vector<8x32xf32>
    %174 = arith.addf %172, %173 : vector<8x32xf32>
    %175 = math.tanh %174 : vector<8x32xf32>
    %176 = arith.mulf %169, %175 : vector<8x32xf32>
    %177 = vector.shape_cast %161 : vector<8x1xi1> to vector<8x1xi1>
    %178 = vector.broadcast %177 : vector<8x1xi1> to vector<8x32xi1>
    %179 = arith.select %178, %174, %123 : vector<8x32xi1>, vector<8x32xf32>
    %180 = vector.shape_cast %161 : vector<8x1xi1> to vector<8x1xi1>
    %181 = vector.broadcast %180 : vector<8x1xi1> to vector<8x32xi1>
    %182 = arith.select %181, %176, %126 : vector<8x32xi1>, vector<8x32xf32>
    %c16_36 = arith.constant 16 : index
    %c0_37 = arith.constant 0 : index
    %183 = vector.load %arg6[%c16_36, %c0_37] : memref<64x64xf32, #tpu.memory_space<vmem>>, vector<8x32xf32>
    tpu.vector_store %arg6[%c16_36, %c0_37], %159 {strides = array<i32>} : memref<64x64xf32, #tpu.memory_space<vmem>>, vector<8x32xf32>,
    %c40_38 = arith.constant 40 : index
    %c32_39 = arith.constant 32 : index
    %184 = vector.load %arg6[%c40_38, %c32_39] : memref<64x64xf32, #tpu.memory_space<vmem>>, vector<8x32xf32>
    tpu.vector_store %arg6[%c40_38, %c32_39], %182 {strides = array<i32>} : memref<64x64xf32, #tpu.memory_space<vmem>>, vector<8x32xf32>,
    %c24 = arith.constant 24 : index
    %c0_40 = arith.constant 0 : index
    %185 = vector.load %arg5[%c24, %c0_40] : memref<64x256xf32, #tpu.memory_space<vmem>>, vector<8x128xf32>
    %c32_41 = arith.constant 32 : index
    %c128_42 = arith.constant 128 : index
    %186 = vector.load %arg5[%c32_41, %c128_42] : memref<64x256xf32, #tpu.memory_space<vmem>>, vector<8x128xf32>
    %187 = tpu.concatenate %159, %182 in 1 : vector<8x32xf32>, vector<8x32xf32> -> vector<8x64xf32>
    %cst_43 = arith.constant dense<0.000000e+00> : vector<8x256xf32>
    %188 = tpu.matmul %187, %15, %cst_43 {dimension_numbers = #tpu.dot_dimension_numbers<[1], [0], [0], [1], [0, 0, 1, 1], [], []>} : vector<8x64xf32>, vector<64x256xf32>, vector<8x256xf32> -> vector<8x256xf32>
    %189 = vector.extract_strided_slice %188 {offsets = [0, 0], sizes = [8, 128], strides = [1, 1]} : vector<8x256xf32> to vector<8x128xf32>
    %190 = arith.addf %185, %189 : vector<8x128xf32>
    %191 = vector.extract_strided_slice %188 {offsets = [0, 128], sizes = [8, 128], strides = [1, 1]} : vector<8x256xf32> to vector<8x128xf32>
    %192 = arith.addf %186, %191 : vector<8x128xf32>
    %c3_i32 = arith.constant 3 : i32
    %193 = vector.broadcast %c3_i32 : i32 to vector<8x1xi32>
    %194 = arith.cmpi sgt, %8, %193 : vector<8x1xi32>
    %195 = arith.negf %190 : vector<8x128xf32>
    %196 = math.exp %195 : vector<8x128xf32>
    %cst_44 = arith.constant 1.000000e+00 : f32
    %197 = vector.broadcast %cst_44 : f32 to vector<8x128xf32>
    %198 = arith.addf %197, %196 : vector<8x128xf32>
    %199 = arith.divf %197, %198 : vector<8x128xf32>
    %200 = vector.extract_strided_slice %199 {offsets = [0, 0], sizes = [8, 32], strides = [1, 1]} : vector<8x128xf32> to vector<8x32xf32>
    %201 = vector.extract_strided_slice %199 {offsets = [0, 32], sizes = [8, 32], strides = [1, 1]} : vector<8x128xf32> to vector<8x32xf32>
    %202 = vector.extract_strided_slice %199 {offsets = [0, 96], sizes = [8, 32], strides = [1, 1]} : vector<8x128xf32> to vector<8x32xf32>
    %203 = vector.extract_strided_slice %190 {offsets = [0, 64], sizes = [8, 32], strides = [1, 1]} : vector<8x128xf32> to vector<8x32xf32>
    %204 = math.tanh %203 : vector<8x32xf32>
    %205 = arith.mulf %201, %156 : vector<8x32xf32>
    %206 = arith.mulf %200, %204 : vector<8x32xf32>
    %207 = arith.addf %205, %206 : vector<8x32xf32>
    %208 = math.tanh %207 : vector<8x32xf32>
    %209 = arith.mulf %202, %208 : vector<8x32xf32>
    %210 = vector.shape_cast %194 : vector<8x1xi1> to vector<8x1xi1>
    %211 = vector.broadcast %210 : vector<8x1xi1> to vector<8x32xi1>
    %212 = arith.select %211, %207, %156 : vector<8x32xi1>, vector<8x32xf32>
    %213 = vector.shape_cast %194 : vector<8x1xi1> to vector<8x1xi1>
    %214 = vector.broadcast %213 : vector<8x1xi1> to vector<8x32xi1>
    %215 = arith.select %214, %209, %159 : vector<8x32xi1>, vector<8x32xf32>
    %c4_i32 = arith.constant 4 : i32
    %216 = vector.broadcast %c4_i32 : i32 to vector<8x1xi32>
    %217 = arith.cmpi sgt, %8, %216 : vector<8x1xi32>
    %218 = arith.negf %192 : vector<8x128xf32>
    %219 = math.exp %218 : vector<8x128xf32>
    %cst_45 = arith.constant 1.000000e+00 : f32
    %220 = vector.broadcast %cst_45 : f32 to vector<8x128xf32>
    %221 = arith.addf %220, %219 : vector<8x128xf32>
    %222 = arith.divf %220, %221 : vector<8x128xf32>
    %223 = vector.extract_strided_slice %222 {offsets = [0, 0], sizes = [8, 32], strides = [1, 1]} : vector<8x128xf32> to vector<8x32xf32>
    %224 = vector.extract_strided_slice %222 {offsets = [0, 32], sizes = [8, 32], strides = [1, 1]} : vector<8x128xf32> to vector<8x32xf32>
    %225 = vector.extract_strided_slice %222 {offsets = [0, 96], sizes = [8, 32], strides = [1, 1]} : vector<8x128xf32> to vector<8x32xf32>
    %226 = vector.extract_strided_slice %192 {offsets = [0, 64], sizes = [8, 32], strides = [1, 1]} : vector<8x128xf32> to vector<8x32xf32>
    %227 = math.tanh %226 : vector<8x32xf32>
    %228 = arith.mulf %224, %179 : vector<8x32xf32>
    %229 = arith.mulf %223, %227 : vector<8x32xf32>
    %230 = arith.addf %228, %229 : vector<8x32xf32>
    %231 = math.tanh %230 : vector<8x32xf32>
    %232 = arith.mulf %225, %231 : vector<8x32xf32>
    %233 = vector.shape_cast %217 : vector<8x1xi1> to vector<8x1xi1>
    %234 = vector.broadcast %233 : vector<8x1xi1> to vector<8x32xi1>
    %235 = arith.select %234, %230, %179 : vector<8x32xi1>, vector<8x32xf32>
    %236 = vector.shape_cast %217 : vector<8x1xi1> to vector<8x1xi1>
    %237 = vector.broadcast %236 : vector<8x1xi1> to vector<8x32xi1>
    %238 = arith.select %237, %232, %182 : vector<8x32xi1>, vector<8x32xf32>
    %c24_46 = arith.constant 24 : index
    %c0_47 = arith.constant 0 : index
    %239 = vector.load %arg6[%c24_46, %c0_47] : memref<64x64xf32, #tpu.memory_space<vmem>>, vector<8x32xf32>
    tpu.vector_store %arg6[%c24_46, %c0_47], %215 {strides = array<i32>} : memref<64x64xf32, #tpu.memory_space<vmem>>, vector<8x32xf32>,
    %c32_48 = arith.constant 32 : index
    %c32_49 = arith.constant 32 : index
    %240 = vector.load %arg6[%c32_48, %c32_49] : memref<64x64xf32, #tpu.memory_space<vmem>>, vector<8x32xf32>
    tpu.vector_store %arg6[%c32_48, %c32_49], %238 {strides = array<i32>} : memref<64x64xf32, #tpu.memory_space<vmem>>, vector<8x32xf32>,
    %c32_50 = arith.constant 32 : index
    %c0_51 = arith.constant 0 : index
    %241 = vector.load %arg5[%c32_50, %c0_51] : memref<64x256xf32, #tpu.memory_space<vmem>>, vector<8x128xf32>
    %c24_52 = arith.constant 24 : index
    %c128_53 = arith.constant 128 : index
    %242 = vector.load %arg5[%c24_52, %c128_53] : memref<64x256xf32, #tpu.memory_space<vmem>>, vector<8x128xf32>
    %243 = tpu.concatenate %215, %238 in 1 : vector<8x32xf32>, vector<8x32xf32> -> vector<8x64xf32>
    %cst_54 = arith.constant dense<0.000000e+00> : vector<8x256xf32>
    %244 = tpu.matmul %243, %15, %cst_54 {dimension_numbers = #tpu.dot_dimension_numbers<[1], [0], [0], [1], [0, 0, 1, 1], [], []>} : vector<8x64xf32>, vector<64x256xf32>, vector<8x256xf32> -> vector<8x256xf32>
    %245 = vector.extract_strided_slice %244 {offsets = [0, 0], sizes = [8, 128], strides = [1, 1]} : vector<8x256xf32> to vector<8x128xf32>
    %246 = arith.addf %241, %245 : vector<8x128xf32>
    %247 = vector.extract_strided_slice %244 {offsets = [0, 128], sizes = [8, 128], strides = [1, 1]} : vector<8x256xf32> to vector<8x128xf32>
    %248 = arith.addf %242, %247 : vector<8x128xf32>
    %c4_i32_55 = arith.constant 4 : i32
    %249 = vector.broadcast %c4_i32_55 : i32 to vector<8x1xi32>
    %250 = arith.cmpi sgt, %8, %249 : vector<8x1xi32>
    %251 = arith.negf %246 : vector<8x128xf32>
    %252 = math.exp %251 : vector<8x128xf32>
    %cst_56 = arith.constant 1.000000e+00 : f32
    %253 = vector.broadcast %cst_56 : f32 to vector<8x128xf32>
    %254 = arith.addf %253, %252 : vector<8x128xf32>
    %255 = arith.divf %253, %254 : vector<8x128xf32>
    %256 = vector.extract_strided_slice %255 {offsets = [0, 0], sizes = [8, 32], strides = [1, 1]} : vector<8x128xf32> to vector<8x32xf32>
    %257 = vector.extract_strided_slice %255 {offsets = [0, 32], sizes = [8, 32], strides = [1, 1]} : vector<8x128xf32> to vector<8x32xf32>
    %258 = vector.extract_strided_slice %255 {offsets = [0, 96], sizes = [8, 32], strides = [1, 1]} : vector<8x128xf32> to vector<8x32xf32>
    %259 = vector.extract_strided_slice %246 {offsets = [0, 64], sizes = [8, 32], strides = [1, 1]} : vector<8x128xf32> to vector<8x32xf32>
    %260 = math.tanh %259 : vector<8x32xf32>
    %261 = arith.mulf %257, %212 : vector<8x32xf32>
    %262 = arith.mulf %256, %260 : vector<8x32xf32>
    %263 = arith.addf %261, %262 : vector<8x32xf32>
    %264 = math.tanh %263 : vector<8x32xf32>
    %265 = arith.mulf %258, %264 : vector<8x32xf32>
    %266 = vector.shape_cast %250 : vector<8x1xi1> to vector<8x1xi1>
    %267 = vector.broadcast %266 : vector<8x1xi1> to vector<8x32xi1>
    %268 = arith.select %267, %263, %212 : vector<8x32xi1>, vector<8x32xf32>
    %269 = vector.shape_cast %250 : vector<8x1xi1> to vector<8x1xi1>
    %270 = vector.broadcast %269 : vector<8x1xi1> to vector<8x32xi1>
    %271 = arith.select %270, %265, %215 : vector<8x32xi1>, vector<8x32xf32>
    %c3_i32_57 = arith.constant 3 : i32
    %272 = vector.broadcast %c3_i32_57 : i32 to vector<8x1xi32>
    %273 = arith.cmpi sgt, %8, %272 : vector<8x1xi32>
    %274 = arith.negf %248 : vector<8x128xf32>
    %275 = math.exp %274 : vector<8x128xf32>
    %cst_58 = arith.constant 1.000000e+00 : f32
    %276 = vector.broadcast %cst_58 : f32 to vector<8x128xf32>
    %277 = arith.addf %276, %275 : vector<8x128xf32>
    %278 = arith.divf %276, %277 : vector<8x128xf32>
    %279 = vector.extract_strided_slice %278 {offsets = [0, 0], sizes = [8, 32], strides = [1, 1]} : vector<8x128xf32> to vector<8x32xf32>
    %280 = vector.extract_strided_slice %278 {offsets = [0, 32], sizes = [8, 32], strides = [1, 1]} : vector<8x128xf32> to vector<8x32xf32>
    %281 = vector.extract_strided_slice %278 {offsets = [0, 96], sizes = [8, 32], strides = [1, 1]} : vector<8x128xf32> to vector<8x32xf32>
    %282 = vector.extract_strided_slice %248 {offsets = [0, 64], sizes = [8, 32], strides = [1, 1]} : vector<8x128xf32> to vector<8x32xf32>
    %283 = math.tanh %282 : vector<8x32xf32>
    %284 = arith.mulf %280, %235 : vector<8x32xf32>
    %285 = arith.mulf %279, %283 : vector<8x32xf32>
    %286 = arith.addf %284, %285 : vector<8x32xf32>
    %287 = math.tanh %286 : vector<8x32xf32>
    %288 = arith.mulf %281, %287 : vector<8x32xf32>
    %289 = vector.shape_cast %273 : vector<8x1xi1> to vector<8x1xi1>
    %290 = vector.broadcast %289 : vector<8x1xi1> to vector<8x32xi1>
    %291 = arith.select %290, %286, %235 : vector<8x32xi1>, vector<8x32xf32>
    %292 = vector.shape_cast %273 : vector<8x1xi1> to vector<8x1xi1>
    %293 = vector.broadcast %292 : vector<8x1xi1> to vector<8x32xi1>
    %294 = arith.select %293, %288, %238 : vector<8x32xi1>, vector<8x32xf32>
    %c32_59 = arith.constant 32 : index
    %c0_60 = arith.constant 0 : index
    %295 = vector.load %arg6[%c32_59, %c0_60] : memref<64x64xf32, #tpu.memory_space<vmem>>, vector<8x32xf32>
    tpu.vector_store %arg6[%c32_59, %c0_60], %271 {strides = array<i32>} : memref<64x64xf32, #tpu.memory_space<vmem>>, vector<8x32xf32>,
    %c24_61 = arith.constant 24 : index
    %c32_62 = arith.constant 32 : index
    %296 = vector.load %arg6[%c24_61, %c32_62] : memref<64x64xf32, #tpu.memory_space<vmem>>, vector<8x32xf32>
    tpu.vector_store %arg6[%c24_61, %c32_62], %294 {strides = array<i32>} : memref<64x64xf32, #tpu.memory_space<vmem>>, vector<8x32xf32>,
    %c40_63 = arith.constant 40 : index
    %c0_64 = arith.constant 0 : index
    %297 = vector.load %arg5[%c40_63, %c0_64] : memref<64x256xf32, #tpu.memory_space<vmem>>, vector<8x128xf32>
    %c16_65 = arith.constant 16 : index
    %c128_66 = arith.constant 128 : index
    %298 = vector.load %arg5[%c16_65, %c128_66] : memref<64x256xf32, #tpu.memory_space<vmem>>, vector<8x128xf32>
    %299 = tpu.concatenate %271, %294 in 1 : vector<8x32xf32>, vector<8x32xf32> -> vector<8x64xf32>
    %cst_67 = arith.constant dense<0.000000e+00> : vector<8x256xf32>
    %300 = tpu.matmul %299, %15, %cst_67 {dimension_numbers = #tpu.dot_dimension_numbers<[1], [0], [0], [1], [0, 0, 1, 1], [], []>} : vector<8x64xf32>, vector<64x256xf32>, vector<8x256xf32> -> vector<8x256xf32>
    %301 = vector.extract_strided_slice %300 {offsets = [0, 0], sizes = [8, 128], strides = [1, 1]} : vector<8x256xf32> to vector<8x128xf32>
    %302 = arith.addf %297, %301 : vector<8x128xf32>
    %303 = vector.extract_strided_slice %300 {offsets = [0, 128], sizes = [8, 128], strides = [1, 1]} : vector<8x256xf32> to vector<8x128xf32>
    %304 = arith.addf %298, %303 : vector<8x128xf32>
    %c5_i32_68 = arith.constant 5 : i32
    %305 = vector.broadcast %c5_i32_68 : i32 to vector<8x1xi32>
    %306 = arith.cmpi sgt, %8, %305 : vector<8x1xi32>
    %307 = arith.negf %302 : vector<8x128xf32>
    %308 = math.exp %307 : vector<8x128xf32>
    %cst_69 = arith.constant 1.000000e+00 : f32
    %309 = vector.broadcast %cst_69 : f32 to vector<8x128xf32>
    %310 = arith.addf %309, %308 : vector<8x128xf32>
    %311 = arith.divf %309, %310 : vector<8x128xf32>
    %312 = vector.extract_strided_slice %311 {offsets = [0, 0], sizes = [8, 32], strides = [1, 1]} : vector<8x128xf32> to vector<8x32xf32>
    %313 = vector.extract_strided_slice %311 {offsets = [0, 32], sizes = [8, 32], strides = [1, 1]} : vector<8x128xf32> to vector<8x32xf32>
    %314 = vector.extract_strided_slice %311 {offsets = [0, 96], sizes = [8, 32], strides = [1, 1]} : vector<8x128xf32> to vector<8x32xf32>
    %315 = vector.extract_strided_slice %302 {offsets = [0, 64], sizes = [8, 32], strides = [1, 1]} : vector<8x128xf32> to vector<8x32xf32>
    %316 = math.tanh %315 : vector<8x32xf32>
    %317 = arith.mulf %313, %268 : vector<8x32xf32>
    %318 = arith.mulf %312, %316 : vector<8x32xf32>
    %319 = arith.addf %317, %318 : vector<8x32xf32>
    %320 = math.tanh %319 : vector<8x32xf32>
    %321 = arith.mulf %314, %320 : vector<8x32xf32>
    %322 = vector.shape_cast %306 : vector<8x1xi1> to vector<8x1xi1>
    %323 = vector.broadcast %322 : vector<8x1xi1> to vector<8x32xi1>
    %324 = arith.select %323, %319, %268 : vector<8x32xi1>, vector<8x32xf32>
    %325 = vector.shape_cast %306 : vector<8x1xi1> to vector<8x1xi1>
    %326 = vector.broadcast %325 : vector<8x1xi1> to vector<8x32xi1>
    %327 = arith.select %326, %321, %271 : vector<8x32xi1>, vector<8x32xf32>
    %c2_i32_70 = arith.constant 2 : i32
    %328 = vector.broadcast %c2_i32_70 : i32 to vector<8x1xi32>
    %329 = arith.cmpi sgt, %8, %328 : vector<8x1xi32>
    %330 = arith.negf %304 : vector<8x128xf32>
    %331 = math.exp %330 : vector<8x128xf32>
    %cst_71 = arith.constant 1.000000e+00 : f32
    %332 = vector.broadcast %cst_71 : f32 to vector<8x128xf32>
    %333 = arith.addf %332, %331 : vector<8x128xf32>
    %334 = arith.divf %332, %333 : vector<8x128xf32>
    %335 = vector.extract_strided_slice %334 {offsets = [0, 0], sizes = [8, 32], strides = [1, 1]} : vector<8x128xf32> to vector<8x32xf32>
    %336 = vector.extract_strided_slice %334 {offsets = [0, 32], sizes = [8, 32], strides = [1, 1]} : vector<8x128xf32> to vector<8x32xf32>
    %337 = vector.extract_strided_slice %334 {offsets = [0, 96], sizes = [8, 32], strides = [1, 1]} : vector<8x128xf32> to vector<8x32xf32>
    %338 = vector.extract_strided_slice %304 {offsets = [0, 64], sizes = [8, 32], strides = [1, 1]} : vector<8x128xf32> to vector<8x32xf32>
    %339 = math.tanh %338 : vector<8x32xf32>
    %340 = arith.mulf %336, %291 : vector<8x32xf32>
    %341 = arith.mulf %335, %339 : vector<8x32xf32>
    %342 = arith.addf %340, %341 : vector<8x32xf32>
    %343 = math.tanh %342 : vector<8x32xf32>
    %344 = arith.mulf %337, %343 : vector<8x32xf32>
    %345 = vector.shape_cast %329 : vector<8x1xi1> to vector<8x1xi1>
    %346 = vector.broadcast %345 : vector<8x1xi1> to vector<8x32xi1>
    %347 = arith.select %346, %342, %291 : vector<8x32xi1>, vector<8x32xf32>
    %348 = vector.shape_cast %329 : vector<8x1xi1> to vector<8x1xi1>
    %349 = vector.broadcast %348 : vector<8x1xi1> to vector<8x32xi1>
    %350 = arith.select %349, %344, %294 : vector<8x32xi1>, vector<8x32xf32>
    %c40_72 = arith.constant 40 : index
    %c0_73 = arith.constant 0 : index
    %351 = vector.load %arg6[%c40_72, %c0_73] : memref<64x64xf32, #tpu.memory_space<vmem>>, vector<8x32xf32>
    tpu.vector_store %arg6[%c40_72, %c0_73], %327 {strides = array<i32>} : memref<64x64xf32, #tpu.memory_space<vmem>>, vector<8x32xf32>,
    %c16_74 = arith.constant 16 : index
    %c32_75 = arith.constant 32 : index
    %352 = vector.load %arg6[%c16_74, %c32_75] : memref<64x64xf32, #tpu.memory_space<vmem>>, vector<8x32xf32>
    tpu.vector_store %arg6[%c16_74, %c32_75], %350 {strides = array<i32>} : memref<64x64xf32, #tpu.memory_space<vmem>>, vector<8x32xf32>,
    %c48_76 = arith.constant 48 : index
    %c0_77 = arith.constant 0 : index
    %353 = vector.load %arg5[%c48_76, %c0_77] : memref<64x256xf32, #tpu.memory_space<vmem>>, vector<8x128xf32>
    %c8_78 = arith.constant 8 : index
    %c128_79 = arith.constant 128 : index
    %354 = vector.load %arg5[%c8_78, %c128_79] : memref<64x256xf32, #tpu.memory_space<vmem>>, vector<8x128xf32>
    %355 = tpu.concatenate %327, %350 in 1 : vector<8x32xf32>, vector<8x32xf32> -> vector<8x64xf32>
    %cst_80 = arith.constant dense<0.000000e+00> : vector<8x256xf32>
    %356 = tpu.matmul %355, %15, %cst_80 {dimension_numbers = #tpu.dot_dimension_numbers<[1], [0], [0], [1], [0, 0, 1, 1], [], []>} : vector<8x64xf32>, vector<64x256xf32>, vector<8x256xf32> -> vector<8x256xf32>
    %357 = vector.extract_strided_slice %356 {offsets = [0, 0], sizes = [8, 128], strides = [1, 1]} : vector<8x256xf32> to vector<8x128xf32>
    %358 = arith.addf %353, %357 : vector<8x128xf32>
    %359 = vector.extract_strided_slice %356 {offsets = [0, 128], sizes = [8, 128], strides = [1, 1]} : vector<8x256xf32> to vector<8x128xf32>
    %360 = arith.addf %354, %359 : vector<8x128xf32>
    %c6_i32_81 = arith.constant 6 : i32
    %361 = vector.broadcast %c6_i32_81 : i32 to vector<8x1xi32>
    %362 = arith.cmpi sgt, %8, %361 : vector<8x1xi32>
    %363 = arith.negf %358 : vector<8x128xf32>
    %364 = math.exp %363 : vector<8x128xf32>
    %cst_82 = arith.constant 1.000000e+00 : f32
    %365 = vector.broadcast %cst_82 : f32 to vector<8x128xf32>
    %366 = arith.addf %365, %364 : vector<8x128xf32>
    %367 = arith.divf %365, %366 : vector<8x128xf32>
    %368 = vector.extract_strided_slice %367 {offsets = [0, 0], sizes = [8, 32], strides = [1, 1]} : vector<8x128xf32> to vector<8x32xf32>
    %369 = vector.extract_strided_slice %367 {offsets = [0, 32], sizes = [8, 32], strides = [1, 1]} : vector<8x128xf32> to vector<8x32xf32>
    %370 = vector.extract_strided_slice %367 {offsets = [0, 96], sizes = [8, 32], strides = [1, 1]} : vector<8x128xf32> to vector<8x32xf32>
    %371 = vector.extract_strided_slice %358 {offsets = [0, 64], sizes = [8, 32], strides = [1, 1]} : vector<8x128xf32> to vector<8x32xf32>
    %372 = math.tanh %371 : vector<8x32xf32>
    %373 = arith.mulf %369, %324 : vector<8x32xf32>
    %374 = arith.mulf %368, %372 : vector<8x32xf32>
    %375 = arith.addf %373, %374 : vector<8x32xf32>
    %376 = math.tanh %375 : vector<8x32xf32>
    %377 = arith.mulf %370, %376 : vector<8x32xf32>
    %378 = vector.shape_cast %362 : vector<8x1xi1> to vector<8x1xi1>
    %379 = vector.broadcast %378 : vector<8x1xi1> to vector<8x32xi1>
    %380 = arith.select %379, %375, %324 : vector<8x32xi1>, vector<8x32xf32>
    %381 = vector.shape_cast %362 : vector<8x1xi1> to vector<8x1xi1>
    %382 = vector.broadcast %381 : vector<8x1xi1> to vector<8x32xi1>
    %383 = arith.select %382, %377, %327 : vector<8x32xi1>, vector<8x32xf32>
    %c1_i32_83 = arith.constant 1 : i32
    %384 = vector.broadcast %c1_i32_83 : i32 to vector<8x1xi32>
    %385 = arith.cmpi sgt, %8, %384 : vector<8x1xi32>
    %386 = arith.negf %360 : vector<8x128xf32>
    %387 = math.exp %386 : vector<8x128xf32>
    %cst_84 = arith.constant 1.000000e+00 : f32
    %388 = vector.broadcast %cst_84 : f32 to vector<8x128xf32>
    %389 = arith.addf %388, %387 : vector<8x128xf32>
    %390 = arith.divf %388, %389 : vector<8x128xf32>
    %391 = vector.extract_strided_slice %390 {offsets = [0, 0], sizes = [8, 32], strides = [1, 1]} : vector<8x128xf32> to vector<8x32xf32>
    %392 = vector.extract_strided_slice %390 {offsets = [0, 32], sizes = [8, 32], strides = [1, 1]} : vector<8x128xf32> to vector<8x32xf32>
    %393 = vector.extract_strided_slice %390 {offsets = [0, 96], sizes = [8, 32], strides = [1, 1]} : vector<8x128xf32> to vector<8x32xf32>
    %394 = vector.extract_strided_slice %360 {offsets = [0, 64], sizes = [8, 32], strides = [1, 1]} : vector<8x128xf32> to vector<8x32xf32>
    %395 = math.tanh %394 : vector<8x32xf32>
    %396 = arith.mulf %392, %347 : vector<8x32xf32>
    %397 = arith.mulf %391, %395 : vector<8x32xf32>
    %398 = arith.addf %396, %397 : vector<8x32xf32>
    %399 = math.tanh %398 : vector<8x32xf32>
    %400 = arith.mulf %393, %399 : vector<8x32xf32>
    %401 = vector.shape_cast %385 : vector<8x1xi1> to vector<8x1xi1>
    %402 = vector.broadcast %401 : vector<8x1xi1> to vector<8x32xi1>
    %403 = arith.select %402, %398, %347 : vector<8x32xi1>, vector<8x32xf32>
    %404 = vector.shape_cast %385 : vector<8x1xi1> to vector<8x1xi1>
    %405 = vector.broadcast %404 : vector<8x1xi1> to vector<8x32xi1>
    %406 = arith.select %405, %400, %350 : vector<8x32xi1>, vector<8x32xf32>
    %c48_85 = arith.constant 48 : index
    %c0_86 = arith.constant 0 : index
    %407 = vector.load %arg6[%c48_85, %c0_86] : memref<64x64xf32, #tpu.memory_space<vmem>>, vector<8x32xf32>
    tpu.vector_store %arg6[%c48_85, %c0_86], %383 {strides = array<i32>} : memref<64x64xf32, #tpu.memory_space<vmem>>, vector<8x32xf32>,
    %c8_87 = arith.constant 8 : index
    %c32_88 = arith.constant 32 : index
    %408 = vector.load %arg6[%c8_87, %c32_88] : memref<64x64xf32, #tpu.memory_space<vmem>>, vector<8x32xf32>
    tpu.vector_store %arg6[%c8_87, %c32_88], %406 {strides = array<i32>} : memref<64x64xf32, #tpu.memory_space<vmem>>, vector<8x32xf32>,
    %c56_89 = arith.constant 56 : index
    %c0_90 = arith.constant 0 : index
    %409 = vector.load %arg5[%c56_89, %c0_90] : memref<64x256xf32, #tpu.memory_space<vmem>>, vector<8x128xf32>
    %c0_91 = arith.constant 0 : index
    %c128_92 = arith.constant 128 : index
    %410 = vector.load %arg5[%c0_91, %c128_92] : memref<64x256xf32, #tpu.memory_space<vmem>>, vector<8x128xf32>
    %411 = tpu.concatenate %383, %406 in 1 : vector<8x32xf32>, vector<8x32xf32> -> vector<8x64xf32>
    %cst_93 = arith.constant dense<0.000000e+00> : vector<8x256xf32>
    %412 = tpu.matmul %411, %15, %cst_93 {dimension_numbers = #tpu.dot_dimension_numbers<[1], [0], [0], [1], [0, 0, 1, 1], [], []>} : vector<8x64xf32>, vector<64x256xf32>, vector<8x256xf32> -> vector<8x256xf32>
    %413 = vector.extract_strided_slice %412 {offsets = [0, 0], sizes = [8, 128], strides = [1, 1]} : vector<8x256xf32> to vector<8x128xf32>
    %414 = arith.addf %409, %413 : vector<8x128xf32>
    %415 = vector.extract_strided_slice %412 {offsets = [0, 128], sizes = [8, 128], strides = [1, 1]} : vector<8x256xf32> to vector<8x128xf32>
    %416 = arith.addf %410, %415 : vector<8x128xf32>
    %c7_i32_94 = arith.constant 7 : i32
    %417 = vector.broadcast %c7_i32_94 : i32 to vector<8x1xi32>
    %418 = arith.cmpi sgt, %8, %417 : vector<8x1xi32>
    %419 = arith.negf %414 : vector<8x128xf32>
    %420 = math.exp %419 : vector<8x128xf32>
    %cst_95 = arith.constant 1.000000e+00 : f32
    %421 = vector.broadcast %cst_95 : f32 to vector<8x128xf32>
    %422 = arith.addf %421, %420 : vector<8x128xf32>
    %423 = arith.divf %421, %422 : vector<8x128xf32>
    %424 = vector.extract_strided_slice %423 {offsets = [0, 0], sizes = [8, 32], strides = [1, 1]} : vector<8x128xf32> to vector<8x32xf32>
    %425 = vector.extract_strided_slice %423 {offsets = [0, 32], sizes = [8, 32], strides = [1, 1]} : vector<8x128xf32> to vector<8x32xf32>
    %426 = vector.extract_strided_slice %423 {offsets = [0, 96], sizes = [8, 32], strides = [1, 1]} : vector<8x128xf32> to vector<8x32xf32>
    %427 = vector.extract_strided_slice %414 {offsets = [0, 64], sizes = [8, 32], strides = [1, 1]} : vector<8x128xf32> to vector<8x32xf32>
    %428 = math.tanh %427 : vector<8x32xf32>
    %429 = arith.mulf %425, %380 : vector<8x32xf32>
    %430 = arith.mulf %424, %428 : vector<8x32xf32>
    %431 = arith.addf %429, %430 : vector<8x32xf32>
    %432 = math.tanh %431 : vector<8x32xf32>
    %433 = arith.mulf %426, %432 : vector<8x32xf32>
    %434 = vector.shape_cast %418 : vector<8x1xi1> to vector<8x1xi1>
    %435 = vector.broadcast %434 : vector<8x1xi1> to vector<8x32xi1>
    %436 = arith.select %435, %433, %383 : vector<8x32xi1>, vector<8x32xf32>
    %c0_i32_96 = arith.constant 0 : i32
    %437 = vector.broadcast %c0_i32_96 : i32 to vector<8x1xi32>
    %438 = arith.cmpi sgt, %8, %437 : vector<8x1xi32>
    %439 = arith.negf %416 : vector<8x128xf32>
    %440 = math.exp %439 : vector<8x128xf32>
    %cst_97 = arith.constant 1.000000e+00 : f32
    %441 = vector.broadcast %cst_97 : f32 to vector<8x128xf32>
    %442 = arith.addf %441, %440 : vector<8x128xf32>
    %443 = arith.divf %441, %442 : vector<8x128xf32>
    %444 = vector.extract_strided_slice %443 {offsets = [0, 0], sizes = [8, 32], strides = [1, 1]} : vector<8x128xf32> to vector<8x32xf32>
    %445 = vector.extract_strided_slice %443 {offsets = [0, 32], sizes = [8, 32], strides = [1, 1]} : vector<8x128xf32> to vector<8x32xf32>
    %446 = vector.extract_strided_slice %443 {offsets = [0, 96], sizes = [8, 32], strides = [1, 1]} : vector<8x128xf32> to vector<8x32xf32>
    %447 = vector.extract_strided_slice %416 {offsets = [0, 64], sizes = [8, 32], strides = [1, 1]} : vector<8x128xf32> to vector<8x32xf32>
    %448 = math.tanh %447 : vector<8x32xf32>
    %449 = arith.mulf %445, %403 : vector<8x32xf32>
    %450 = arith.mulf %444, %448 : vector<8x32xf32>
    %451 = arith.addf %449, %450 : vector<8x32xf32>
    %452 = math.tanh %451 : vector<8x32xf32>
    %453 = arith.mulf %446, %452 : vector<8x32xf32>
    %454 = vector.shape_cast %438 : vector<8x1xi1> to vector<8x1xi1>
    %455 = vector.broadcast %454 : vector<8x1xi1> to vector<8x32xi1>
    %456 = arith.select %455, %453, %406 : vector<8x32xi1>, vector<8x32xf32>
    %c56_98 = arith.constant 56 : index
    %c0_99 = arith.constant 0 : index
    %457 = vector.load %arg6[%c56_98, %c0_99] : memref<64x64xf32, #tpu.memory_space<vmem>>, vector<8x32xf32>
    tpu.vector_store %arg6[%c56_98, %c0_99], %436 {strides = array<i32>} : memref<64x64xf32, #tpu.memory_space<vmem>>, vector<8x32xf32>,
    %c0_100 = arith.constant 0 : index
    %c32_101 = arith.constant 32 : index
    %458 = vector.load %arg6[%c0_100, %c32_101] : memref<64x64xf32, #tpu.memory_space<vmem>>, vector<8x32xf32>
    tpu.vector_store %arg6[%c0_100, %c32_101], %456 {strides = array<i32>} : memref<64x64xf32, #tpu.memory_space<vmem>>, vector<8x32xf32>,
    %c0_102 = arith.constant 0 : index
    %c0_103 = arith.constant 0 : index
    %459 = vector.load %arg6[%c0_102, %c0_103] : memref<64x64xf32, #tpu.memory_space<vmem>>, vector<64x64xf32>
    %c96 = arith.constant 96 : index
    %c0_104 = arith.constant 0 : index
    %460 = vector.load %arg3[%c96, %c0_104] : memref<312x256xf32, #tpu.memory_space<vmem>>, vector<64x256xf32>
    %c232 = arith.constant 232 : index
    %c0_105 = arith.constant 0 : index
    %461 = vector.load %arg3[%c232, %c0_105] : memref<312x256xf32, #tpu.memory_space<vmem>>, vector<1x256xf32>
    %cst_106 = arith.constant dense<0.000000e+00> : vector<64x256xf32>
    %462 = tpu.matmul %459, %460, %cst_106 {dimension_numbers = #tpu.dot_dimension_numbers<[1], [0], [0], [1], [0, 0, 1, 1], [], []>} : vector<64x64xf32>, vector<64x256xf32>, vector<64x256xf32> -> vector<64x256xf32>
    %463 = vector.broadcast %461 : vector<1x256xf32> to vector<64x256xf32>
    %464 = arith.addf %462, %463 : vector<64x256xf32>
    %c0_107 = arith.constant 0 : index
    %c0_108 = arith.constant 0 : index
    %465 = vector.load %arg5[%c0_107, %c0_108] : memref<64x256xf32, #tpu.memory_space<vmem>>, vector<64x256xf32>
    tpu.vector_store %arg5[%c0_107, %c0_108], %464 {strides = array<i32>} : memref<64x256xf32, #tpu.memory_space<vmem>>, vector<64x256xf32>,
    %c160 = arith.constant 160 : index
    %c0_109 = arith.constant 0 : index
    %466 = vector.load %arg3[%c160, %c0_109] : memref<312x256xf32, #tpu.memory_space<vmem>>, vector<64x256xf32>
    %cst_110 = arith.constant 0.000000e+00 : f32
    %467 = vector.broadcast %cst_110 : f32 to vector<8x32xf32>
    %c0_111 = arith.constant 0 : index
    %c0_112 = arith.constant 0 : index
    %468 = vector.load %arg5[%c0_111, %c0_112] : memref<64x256xf32, #tpu.memory_space<vmem>>, vector<8x128xf32>
    %c56_113 = arith.constant 56 : index
    %c128_114 = arith.constant 128 : index
    %469 = vector.load %arg5[%c56_113, %c128_114] : memref<64x256xf32, #tpu.memory_space<vmem>>, vector<8x128xf32>
    %470 = tpu.concatenate %467, %467 in 1 : vector<8x32xf32>, vector<8x32xf32> -> vector<8x64xf32>
    %cst_115 = arith.constant dense<0.000000e+00> : vector<8x256xf32>
    %471 = tpu.matmul %470, %466, %cst_115 {dimension_numbers = #tpu.dot_dimension_numbers<[1], [0], [0], [1], [0, 0, 1, 1], [], []>} : vector<8x64xf32>, vector<64x256xf32>, vector<8x256xf32> -> vector<8x256xf32>
    %472 = vector.extract_strided_slice %471 {offsets = [0, 0], sizes = [8, 128], strides = [1, 1]} : vector<8x256xf32> to vector<8x128xf32>
    %473 = arith.addf %468, %472 : vector<8x128xf32>
    %474 = vector.extract_strided_slice %471 {offsets = [0, 128], sizes = [8, 128], strides = [1, 1]} : vector<8x256xf32> to vector<8x128xf32>
    %475 = arith.addf %469, %474 : vector<8x128xf32>
    %c0_i32_116 = arith.constant 0 : i32
    %476 = vector.broadcast %c0_i32_116 : i32 to vector<8x1xi32>
    %477 = arith.cmpi sgt, %8, %476 : vector<8x1xi32>
    %478 = arith.negf %473 : vector<8x128xf32>
    %479 = math.exp %478 : vector<8x128xf32>
    %cst_117 = arith.constant 1.000000e+00 : f32
    %480 = vector.broadcast %cst_117 : f32 to vector<8x128xf32>
    %481 = arith.addf %480, %479 : vector<8x128xf32>
    %482 = arith.divf %480, %481 : vector<8x128xf32>
    %483 = vector.extract_strided_slice %482 {offsets = [0, 0], sizes = [8, 32], strides = [1, 1]} : vector<8x128xf32> to vector<8x32xf32>
    %484 = vector.extract_strided_slice %482 {offsets = [0, 32], sizes = [8, 32], strides = [1, 1]} : vector<8x128xf32> to vector<8x32xf32>
    %485 = vector.extract_strided_slice %482 {offsets = [0, 96], sizes = [8, 32], strides = [1, 1]} : vector<8x128xf32> to vector<8x32xf32>
    %486 = vector.extract_strided_slice %473 {offsets = [0, 64], sizes = [8, 32], strides = [1, 1]} : vector<8x128xf32> to vector<8x32xf32>
    %487 = math.tanh %486 : vector<8x32xf32>
    %488 = arith.mulf %484, %467 : vector<8x32xf32>
    %489 = arith.mulf %483, %487 : vector<8x32xf32>
    %490 = arith.addf %488, %489 : vector<8x32xf32>
    %491 = math.tanh %490 : vector<8x32xf32>
    %492 = arith.mulf %485, %491 : vector<8x32xf32>
    %493 = vector.shape_cast %477 : vector<8x1xi1> to vector<8x1xi1>
    %494 = vector.broadcast %493 : vector<8x1xi1> to vector<8x32xi1>
    %495 = arith.select %494, %490, %467 : vector<8x32xi1>, vector<8x32xf32>
    %496 = vector.shape_cast %477 : vector<8x1xi1> to vector<8x1xi1>
    %497 = vector.broadcast %496 : vector<8x1xi1> to vector<8x32xi1>
    %498 = arith.select %497, %492, %467 : vector<8x32xi1>, vector<8x32xf32>
    %c7_i32_118 = arith.constant 7 : i32
    %499 = vector.broadcast %c7_i32_118 : i32 to vector<8x1xi32>
    %500 = arith.cmpi sgt, %8, %499 : vector<8x1xi32>
    %501 = arith.negf %475 : vector<8x128xf32>
    %502 = math.exp %501 : vector<8x128xf32>
    %cst_119 = arith.constant 1.000000e+00 : f32
    %503 = vector.broadcast %cst_119 : f32 to vector<8x128xf32>
    %504 = arith.addf %503, %502 : vector<8x128xf32>
    %505 = arith.divf %503, %504 : vector<8x128xf32>
    %506 = vector.extract_strided_slice %505 {offsets = [0, 0], sizes = [8, 32], strides = [1, 1]} : vector<8x128xf32> to vector<8x32xf32>
    %507 = vector.extract_strided_slice %505 {offsets = [0, 32], sizes = [8, 32], strides = [1, 1]} : vector<8x128xf32> to vector<8x32xf32>
    %508 = vector.extract_strided_slice %505 {offsets = [0, 96], sizes = [8, 32], strides = [1, 1]} : vector<8x128xf32> to vector<8x32xf32>
    %509 = vector.extract_strided_slice %475 {offsets = [0, 64], sizes = [8, 32], strides = [1, 1]} : vector<8x128xf32> to vector<8x32xf32>
    %510 = math.tanh %509 : vector<8x32xf32>
    %511 = arith.mulf %507, %467 : vector<8x32xf32>
    %512 = arith.mulf %506, %510 : vector<8x32xf32>
    %513 = arith.addf %511, %512 : vector<8x32xf32>
    %514 = math.tanh %513 : vector<8x32xf32>
    %515 = arith.mulf %508, %514 : vector<8x32xf32>
    %516 = vector.shape_cast %500 : vector<8x1xi1> to vector<8x1xi1>
    %517 = vector.broadcast %516 : vector<8x1xi1> to vector<8x32xi1>
    %518 = arith.select %517, %513, %467 : vector<8x32xi1>, vector<8x32xf32>
    %519 = vector.shape_cast %500 : vector<8x1xi1> to vector<8x1xi1>
    %520 = vector.broadcast %519 : vector<8x1xi1> to vector<8x32xi1>
    %521 = arith.select %520, %515, %467 : vector<8x32xi1>, vector<8x32xf32>
    %c8_120 = arith.constant 8 : index
    %c0_121 = arith.constant 0 : index
    %522 = vector.load %arg5[%c8_120, %c0_121] : memref<64x256xf32, #tpu.memory_space<vmem>>, vector<8x128xf32>
    %c48_122 = arith.constant 48 : index
    %c128_123 = arith.constant 128 : index
    %523 = vector.load %arg5[%c48_122, %c128_123] : memref<64x256xf32, #tpu.memory_space<vmem>>, vector<8x128xf32>
    %524 = tpu.concatenate %498, %521 in 1 : vector<8x32xf32>, vector<8x32xf32> -> vector<8x64xf32>
    %cst_124 = arith.constant dense<0.000000e+00> : vector<8x256xf32>
    %525 = tpu.matmul %524, %466, %cst_124 {dimension_numbers = #tpu.dot_dimension_numbers<[1], [0], [0], [1], [0, 0, 1, 1], [], []>} : vector<8x64xf32>, vector<64x256xf32>, vector<8x256xf32> -> vector<8x256xf32>
    %526 = vector.extract_strided_slice %525 {offsets = [0, 0], sizes = [8, 128], strides = [1, 1]} : vector<8x256xf32> to vector<8x128xf32>
    %527 = arith.addf %522, %526 : vector<8x128xf32>
    %528 = vector.extract_strided_slice %525 {offsets = [0, 128], sizes = [8, 128], strides = [1, 1]} : vector<8x256xf32> to vector<8x128xf32>
    %529 = arith.addf %523, %528 : vector<8x128xf32>
    %c1_i32_125 = arith.constant 1 : i32
    %530 = vector.broadcast %c1_i32_125 : i32 to vector<8x1xi32>
    %531 = arith.cmpi sgt, %8, %530 : vector<8x1xi32>
    %532 = arith.negf %527 : vector<8x128xf32>
    %533 = math.exp %532 : vector<8x128xf32>
    %cst_126 = arith.constant 1.000000e+00 : f32
    %534 = vector.broadcast %cst_126 : f32 to vector<8x128xf32>
    %535 = arith.addf %534, %533 : vector<8x128xf32>
    %536 = arith.divf %534, %535 : vector<8x128xf32>
    %537 = vector.extract_strided_slice %536 {offsets = [0, 0], sizes = [8, 32], strides = [1, 1]} : vector<8x128xf32> to vector<8x32xf32>
    %538 = vector.extract_strided_slice %536 {offsets = [0, 32], sizes = [8, 32], strides = [1, 1]} : vector<8x128xf32> to vector<8x32xf32>
    %539 = vector.extract_strided_slice %536 {offsets = [0, 96], sizes = [8, 32], strides = [1, 1]} : vector<8x128xf32> to vector<8x32xf32>
    %540 = vector.extract_strided_slice %527 {offsets = [0, 64], sizes = [8, 32], strides = [1, 1]} : vector<8x128xf32> to vector<8x32xf32>
    %541 = math.tanh %540 : vector<8x32xf32>
    %542 = arith.mulf %538, %495 : vector<8x32xf32>
    %543 = arith.mulf %537, %541 : vector<8x32xf32>
    %544 = arith.addf %542, %543 : vector<8x32xf32>
    %545 = math.tanh %544 : vector<8x32xf32>
    %546 = arith.mulf %539, %545 : vector<8x32xf32>
    %547 = vector.shape_cast %531 : vector<8x1xi1> to vector<8x1xi1>
    %548 = vector.broadcast %547 : vector<8x1xi1> to vector<8x32xi1>
    %549 = arith.select %548, %544, %495 : vector<8x32xi1>, vector<8x32xf32>
    %550 = vector.shape_cast %531 : vector<8x1xi1> to vector<8x1xi1>
    %551 = vector.broadcast %550 : vector<8x1xi1> to vector<8x32xi1>
    %552 = arith.select %551, %546, %498 : vector<8x32xi1>, vector<8x32xf32>
    %c6_i32_127 = arith.constant 6 : i32
    %553 = vector.broadcast %c6_i32_127 : i32 to vector<8x1xi32>
    %554 = arith.cmpi sgt, %8, %553 : vector<8x1xi32>
    %555 = arith.negf %529 : vector<8x128xf32>
    %556 = math.exp %555 : vector<8x128xf32>
    %cst_128 = arith.constant 1.000000e+00 : f32
    %557 = vector.broadcast %cst_128 : f32 to vector<8x128xf32>
    %558 = arith.addf %557, %556 : vector<8x128xf32>
    %559 = arith.divf %557, %558 : vector<8x128xf32>
    %560 = vector.extract_strided_slice %559 {offsets = [0, 0], sizes = [8, 32], strides = [1, 1]} : vector<8x128xf32> to vector<8x32xf32>
    %561 = vector.extract_strided_slice %559 {offsets = [0, 32], sizes = [8, 32], strides = [1, 1]} : vector<8x128xf32> to vector<8x32xf32>
    %562 = vector.extract_strided_slice %559 {offsets = [0, 96], sizes = [8, 32], strides = [1, 1]} : vector<8x128xf32> to vector<8x32xf32>
    %563 = vector.extract_strided_slice %529 {offsets = [0, 64], sizes = [8, 32], strides = [1, 1]} : vector<8x128xf32> to vector<8x32xf32>
    %564 = math.tanh %563 : vector<8x32xf32>
    %565 = arith.mulf %561, %518 : vector<8x32xf32>
    %566 = arith.mulf %560, %564 : vector<8x32xf32>
    %567 = arith.addf %565, %566 : vector<8x32xf32>
    %568 = math.tanh %567 : vector<8x32xf32>
    %569 = arith.mulf %562, %568 : vector<8x32xf32>
    %570 = vector.shape_cast %554 : vector<8x1xi1> to vector<8x1xi1>
    %571 = vector.broadcast %570 : vector<8x1xi1> to vector<8x32xi1>
    %572 = arith.select %571, %567, %518 : vector<8x32xi1>, vector<8x32xf32>
    %573 = vector.shape_cast %554 : vector<8x1xi1> to vector<8x1xi1>
    %574 = vector.broadcast %573 : vector<8x1xi1> to vector<8x32xi1>
    %575 = arith.select %574, %569, %521 : vector<8x32xi1>, vector<8x32xf32>
    %c16_129 = arith.constant 16 : index
    %c0_130 = arith.constant 0 : index
    %576 = vector.load %arg5[%c16_129, %c0_130] : memref<64x256xf32, #tpu.memory_space<vmem>>, vector<8x128xf32>
    %c40_131 = arith.constant 40 : index
    %c128_132 = arith.constant 128 : index
    %577 = vector.load %arg5[%c40_131, %c128_132] : memref<64x256xf32, #tpu.memory_space<vmem>>, vector<8x128xf32>
    %578 = tpu.concatenate %552, %575 in 1 : vector<8x32xf32>, vector<8x32xf32> -> vector<8x64xf32>
    %cst_133 = arith.constant dense<0.000000e+00> : vector<8x256xf32>
    %579 = tpu.matmul %578, %466, %cst_133 {dimension_numbers = #tpu.dot_dimension_numbers<[1], [0], [0], [1], [0, 0, 1, 1], [], []>} : vector<8x64xf32>, vector<64x256xf32>, vector<8x256xf32> -> vector<8x256xf32>
    %580 = vector.extract_strided_slice %579 {offsets = [0, 0], sizes = [8, 128], strides = [1, 1]} : vector<8x256xf32> to vector<8x128xf32>
    %581 = arith.addf %576, %580 : vector<8x128xf32>
    %582 = vector.extract_strided_slice %579 {offsets = [0, 128], sizes = [8, 128], strides = [1, 1]} : vector<8x256xf32> to vector<8x128xf32>
    %583 = arith.addf %577, %582 : vector<8x128xf32>
    %c2_i32_134 = arith.constant 2 : i32
    %584 = vector.broadcast %c2_i32_134 : i32 to vector<8x1xi32>
    %585 = arith.cmpi sgt, %8, %584 : vector<8x1xi32>
    %586 = arith.negf %581 : vector<8x128xf32>
    %587 = math.exp %586 : vector<8x128xf32>
    %cst_135 = arith.constant 1.000000e+00 : f32
    %588 = vector.broadcast %cst_135 : f32 to vector<8x128xf32>
    %589 = arith.addf %588, %587 : vector<8x128xf32>
    %590 = arith.divf %588, %589 : vector<8x128xf32>
    %591 = vector.extract_strided_slice %590 {offsets = [0, 0], sizes = [8, 32], strides = [1, 1]} : vector<8x128xf32> to vector<8x32xf32>
    %592 = vector.extract_strided_slice %590 {offsets = [0, 32], sizes = [8, 32], strides = [1, 1]} : vector<8x128xf32> to vector<8x32xf32>
    %593 = vector.extract_strided_slice %590 {offsets = [0, 96], sizes = [8, 32], strides = [1, 1]} : vector<8x128xf32> to vector<8x32xf32>
    %594 = vector.extract_strided_slice %581 {offsets = [0, 64], sizes = [8, 32], strides = [1, 1]} : vector<8x128xf32> to vector<8x32xf32>
    %595 = math.tanh %594 : vector<8x32xf32>
    %596 = arith.mulf %592, %549 : vector<8x32xf32>
    %597 = arith.mulf %591, %595 : vector<8x32xf32>
    %598 = arith.addf %596, %597 : vector<8x32xf32>
    %599 = math.tanh %598 : vector<8x32xf32>
    %600 = arith.mulf %593, %599 : vector<8x32xf32>
    %601 = vector.shape_cast %585 : vector<8x1xi1> to vector<8x1xi1>
    %602 = vector.broadcast %601 : vector<8x1xi1> to vector<8x32xi1>
    %603 = arith.select %602, %598, %549 : vector<8x32xi1>, vector<8x32xf32>
    %604 = vector.shape_cast %585 : vector<8x1xi1> to vector<8x1xi1>
    %605 = vector.broadcast %604 : vector<8x1xi1> to vector<8x32xi1>
    %606 = arith.select %605, %600, %552 : vector<8x32xi1>, vector<8x32xf32>
    %c5_i32_136 = arith.constant 5 : i32
    %607 = vector.broadcast %c5_i32_136 : i32 to vector<8x1xi32>
    %608 = arith.cmpi sgt, %8, %607 : vector<8x1xi32>
    %609 = arith.negf %583 : vector<8x128xf32>
    %610 = math.exp %609 : vector<8x128xf32>
    %cst_137 = arith.constant 1.000000e+00 : f32
    %611 = vector.broadcast %cst_137 : f32 to vector<8x128xf32>
    %612 = arith.addf %611, %610 : vector<8x128xf32>
    %613 = arith.divf %611, %612 : vector<8x128xf32>
    %614 = vector.extract_strided_slice %613 {offsets = [0, 0], sizes = [8, 32], strides = [1, 1]} : vector<8x128xf32> to vector<8x32xf32>
    %615 = vector.extract_strided_slice %613 {offsets = [0, 32], sizes = [8, 32], strides = [1, 1]} : vector<8x128xf32> to vector<8x32xf32>
    %616 = vector.extract_strided_slice %613 {offsets = [0, 96], sizes = [8, 32], strides = [1, 1]} : vector<8x128xf32> to vector<8x32xf32>
    %617 = vector.extract_strided_slice %583 {offsets = [0, 64], sizes = [8, 32], strides = [1, 1]} : vector<8x128xf32> to vector<8x32xf32>
    %618 = math.tanh %617 : vector<8x32xf32>
    %619 = arith.mulf %615, %572 : vector<8x32xf32>
    %620 = arith.mulf %614, %618 : vector<8x32xf32>
    %621 = arith.addf %619, %620 : vector<8x32xf32>
    %622 = math.tanh %621 : vector<8x32xf32>
    %623 = arith.mulf %616, %622 : vector<8x32xf32>
    %624 = vector.shape_cast %608 : vector<8x1xi1> to vector<8x1xi1>
    %625 = vector.broadcast %624 : vector<8x1xi1> to vector<8x32xi1>
    %626 = arith.select %625, %621, %572 : vector<8x32xi1>, vector<8x32xf32>
    %627 = vector.shape_cast %608 : vector<8x1xi1> to vector<8x1xi1>
    %628 = vector.broadcast %627 : vector<8x1xi1> to vector<8x32xi1>
    %629 = arith.select %628, %623, %575 : vector<8x32xi1>, vector<8x32xf32>
    %c24_138 = arith.constant 24 : index
    %c0_139 = arith.constant 0 : index
    %630 = vector.load %arg5[%c24_138, %c0_139] : memref<64x256xf32, #tpu.memory_space<vmem>>, vector<8x128xf32>
    %c32_140 = arith.constant 32 : index
    %c128_141 = arith.constant 128 : index
    %631 = vector.load %arg5[%c32_140, %c128_141] : memref<64x256xf32, #tpu.memory_space<vmem>>, vector<8x128xf32>
    %632 = tpu.concatenate %606, %629 in 1 : vector<8x32xf32>, vector<8x32xf32> -> vector<8x64xf32>
    %cst_142 = arith.constant dense<0.000000e+00> : vector<8x256xf32>
    %633 = tpu.matmul %632, %466, %cst_142 {dimension_numbers = #tpu.dot_dimension_numbers<[1], [0], [0], [1], [0, 0, 1, 1], [], []>} : vector<8x64xf32>, vector<64x256xf32>, vector<8x256xf32> -> vector<8x256xf32>
    %634 = vector.extract_strided_slice %633 {offsets = [0, 0], sizes = [8, 128], strides = [1, 1]} : vector<8x256xf32> to vector<8x128xf32>
    %635 = arith.addf %630, %634 : vector<8x128xf32>
    %636 = vector.extract_strided_slice %633 {offsets = [0, 128], sizes = [8, 128], strides = [1, 1]} : vector<8x256xf32> to vector<8x128xf32>
    %637 = arith.addf %631, %636 : vector<8x128xf32>
    %c3_i32_143 = arith.constant 3 : i32
    %638 = vector.broadcast %c3_i32_143 : i32 to vector<8x1xi32>
    %639 = arith.cmpi sgt, %8, %638 : vector<8x1xi32>
    %640 = arith.negf %635 : vector<8x128xf32>
    %641 = math.exp %640 : vector<8x128xf32>
    %cst_144 = arith.constant 1.000000e+00 : f32
    %642 = vector.broadcast %cst_144 : f32 to vector<8x128xf32>
    %643 = arith.addf %642, %641 : vector<8x128xf32>
    %644 = arith.divf %642, %643 : vector<8x128xf32>
    %645 = vector.extract_strided_slice %644 {offsets = [0, 0], sizes = [8, 32], strides = [1, 1]} : vector<8x128xf32> to vector<8x32xf32>
    %646 = vector.extract_strided_slice %644 {offsets = [0, 32], sizes = [8, 32], strides = [1, 1]} : vector<8x128xf32> to vector<8x32xf32>
    %647 = vector.extract_strided_slice %644 {offsets = [0, 96], sizes = [8, 32], strides = [1, 1]} : vector<8x128xf32> to vector<8x32xf32>
    %648 = vector.extract_strided_slice %635 {offsets = [0, 64], sizes = [8, 32], strides = [1, 1]} : vector<8x128xf32> to vector<8x32xf32>
    %649 = math.tanh %648 : vector<8x32xf32>
    %650 = arith.mulf %646, %603 : vector<8x32xf32>
    %651 = arith.mulf %645, %649 : vector<8x32xf32>
    %652 = arith.addf %650, %651 : vector<8x32xf32>
    %653 = math.tanh %652 : vector<8x32xf32>
    %654 = arith.mulf %647, %653 : vector<8x32xf32>
    %655 = vector.shape_cast %639 : vector<8x1xi1> to vector<8x1xi1>
    %656 = vector.broadcast %655 : vector<8x1xi1> to vector<8x32xi1>
    %657 = arith.select %656, %652, %603 : vector<8x32xi1>, vector<8x32xf32>
    %658 = vector.shape_cast %639 : vector<8x1xi1> to vector<8x1xi1>
    %659 = vector.broadcast %658 : vector<8x1xi1> to vector<8x32xi1>
    %660 = arith.select %659, %654, %606 : vector<8x32xi1>, vector<8x32xf32>
    %c4_i32_145 = arith.constant 4 : i32
    %661 = vector.broadcast %c4_i32_145 : i32 to vector<8x1xi32>
    %662 = arith.cmpi sgt, %8, %661 : vector<8x1xi32>
    %663 = arith.negf %637 : vector<8x128xf32>
    %664 = math.exp %663 : vector<8x128xf32>
    %cst_146 = arith.constant 1.000000e+00 : f32
    %665 = vector.broadcast %cst_146 : f32 to vector<8x128xf32>
    %666 = arith.addf %665, %664 : vector<8x128xf32>
    %667 = arith.divf %665, %666 : vector<8x128xf32>
    %668 = vector.extract_strided_slice %667 {offsets = [0, 0], sizes = [8, 32], strides = [1, 1]} : vector<8x128xf32> to vector<8x32xf32>
    %669 = vector.extract_strided_slice %667 {offsets = [0, 32], sizes = [8, 32], strides = [1, 1]} : vector<8x128xf32> to vector<8x32xf32>
    %670 = vector.extract_strided_slice %667 {offsets = [0, 96], sizes = [8, 32], strides = [1, 1]} : vector<8x128xf32> to vector<8x32xf32>
    %671 = vector.extract_strided_slice %637 {offsets = [0, 64], sizes = [8, 32], strides = [1, 1]} : vector<8x128xf32> to vector<8x32xf32>
    %672 = math.tanh %671 : vector<8x32xf32>
    %673 = arith.mulf %669, %626 : vector<8x32xf32>
    %674 = arith.mulf %668, %672 : vector<8x32xf32>
    %675 = arith.addf %673, %674 : vector<8x32xf32>
    %676 = math.tanh %675 : vector<8x32xf32>
    %677 = arith.mulf %670, %676 : vector<8x32xf32>
    %678 = vector.shape_cast %662 : vector<8x1xi1> to vector<8x1xi1>
    %679 = vector.broadcast %678 : vector<8x1xi1> to vector<8x32xi1>
    %680 = arith.select %679, %675, %626 : vector<8x32xi1>, vector<8x32xf32>
    %681 = vector.shape_cast %662 : vector<8x1xi1> to vector<8x1xi1>
    %682 = vector.broadcast %681 : vector<8x1xi1> to vector<8x32xi1>
    %683 = arith.select %682, %677, %629 : vector<8x32xi1>, vector<8x32xf32>
    %c32_147 = arith.constant 32 : index
    %c0_148 = arith.constant 0 : index
    %684 = vector.load %arg5[%c32_147, %c0_148] : memref<64x256xf32, #tpu.memory_space<vmem>>, vector<8x128xf32>
    %c24_149 = arith.constant 24 : index
    %c128_150 = arith.constant 128 : index
    %685 = vector.load %arg5[%c24_149, %c128_150] : memref<64x256xf32, #tpu.memory_space<vmem>>, vector<8x128xf32>
    %686 = tpu.concatenate %660, %683 in 1 : vector<8x32xf32>, vector<8x32xf32> -> vector<8x64xf32>
    %cst_151 = arith.constant dense<0.000000e+00> : vector<8x256xf32>
    %687 = tpu.matmul %686, %466, %cst_151 {dimension_numbers = #tpu.dot_dimension_numbers<[1], [0], [0], [1], [0, 0, 1, 1], [], []>} : vector<8x64xf32>, vector<64x256xf32>, vector<8x256xf32> -> vector<8x256xf32>
    %688 = vector.extract_strided_slice %687 {offsets = [0, 0], sizes = [8, 128], strides = [1, 1]} : vector<8x256xf32> to vector<8x128xf32>
    %689 = arith.addf %684, %688 : vector<8x128xf32>
    %690 = vector.extract_strided_slice %687 {offsets = [0, 128], sizes = [8, 128], strides = [1, 1]} : vector<8x256xf32> to vector<8x128xf32>
    %691 = arith.addf %685, %690 : vector<8x128xf32>
    %c4_i32_152 = arith.constant 4 : i32
    %692 = vector.broadcast %c4_i32_152 : i32 to vector<8x1xi32>
    %693 = arith.cmpi sgt, %8, %692 : vector<8x1xi32>
    %694 = arith.negf %689 : vector<8x128xf32>
    %695 = math.exp %694 : vector<8x128xf32>
    %cst_153 = arith.constant 1.000000e+00 : f32
    %696 = vector.broadcast %cst_153 : f32 to vector<8x128xf32>
    %697 = arith.addf %696, %695 : vector<8x128xf32>
    %698 = arith.divf %696, %697 : vector<8x128xf32>
    %699 = vector.extract_strided_slice %698 {offsets = [0, 0], sizes = [8, 32], strides = [1, 1]} : vector<8x128xf32> to vector<8x32xf32>
    %700 = vector.extract_strided_slice %698 {offsets = [0, 32], sizes = [8, 32], strides = [1, 1]} : vector<8x128xf32> to vector<8x32xf32>
    %701 = vector.extract_strided_slice %698 {offsets = [0, 96], sizes = [8, 32], strides = [1, 1]} : vector<8x128xf32> to vector<8x32xf32>
    %702 = vector.extract_strided_slice %689 {offsets = [0, 64], sizes = [8, 32], strides = [1, 1]} : vector<8x128xf32> to vector<8x32xf32>
    %703 = math.tanh %702 : vector<8x32xf32>
    %704 = arith.mulf %700, %657 : vector<8x32xf32>
    %705 = arith.mulf %699, %703 : vector<8x32xf32>
    %706 = arith.addf %704, %705 : vector<8x32xf32>
    %707 = math.tanh %706 : vector<8x32xf32>
    %708 = arith.mulf %701, %707 : vector<8x32xf32>
    %709 = vector.shape_cast %693 : vector<8x1xi1> to vector<8x1xi1>
    %710 = vector.broadcast %709 : vector<8x1xi1> to vector<8x32xi1>
    %711 = arith.select %710, %706, %657 : vector<8x32xi1>, vector<8x32xf32>
    %712 = vector.shape_cast %693 : vector<8x1xi1> to vector<8x1xi1>
    %713 = vector.broadcast %712 : vector<8x1xi1> to vector<8x32xi1>
    %714 = arith.select %713, %708, %660 : vector<8x32xi1>, vector<8x32xf32>
    %c3_i32_154 = arith.constant 3 : i32
    %715 = vector.broadcast %c3_i32_154 : i32 to vector<8x1xi32>
    %716 = arith.cmpi sgt, %8, %715 : vector<8x1xi32>
    %717 = arith.negf %691 : vector<8x128xf32>
    %718 = math.exp %717 : vector<8x128xf32>
    %cst_155 = arith.constant 1.000000e+00 : f32
    %719 = vector.broadcast %cst_155 : f32 to vector<8x128xf32>
    %720 = arith.addf %719, %718 : vector<8x128xf32>
    %721 = arith.divf %719, %720 : vector<8x128xf32>
    %722 = vector.extract_strided_slice %721 {offsets = [0, 0], sizes = [8, 32], strides = [1, 1]} : vector<8x128xf32> to vector<8x32xf32>
    %723 = vector.extract_strided_slice %721 {offsets = [0, 32], sizes = [8, 32], strides = [1, 1]} : vector<8x128xf32> to vector<8x32xf32>
    %724 = vector.extract_strided_slice %721 {offsets = [0, 96], sizes = [8, 32], strides = [1, 1]} : vector<8x128xf32> to vector<8x32xf32>
    %725 = vector.extract_strided_slice %691 {offsets = [0, 64], sizes = [8, 32], strides = [1, 1]} : vector<8x128xf32> to vector<8x32xf32>
    %726 = math.tanh %725 : vector<8x32xf32>
    %727 = arith.mulf %723, %680 : vector<8x32xf32>
    %728 = arith.mulf %722, %726 : vector<8x32xf32>
    %729 = arith.addf %727, %728 : vector<8x32xf32>
    %730 = math.tanh %729 : vector<8x32xf32>
    %731 = arith.mulf %724, %730 : vector<8x32xf32>
    %732 = vector.shape_cast %716 : vector<8x1xi1> to vector<8x1xi1>
    %733 = vector.broadcast %732 : vector<8x1xi1> to vector<8x32xi1>
    %734 = arith.select %733, %729, %680 : vector<8x32xi1>, vector<8x32xf32>
    %735 = vector.shape_cast %716 : vector<8x1xi1> to vector<8x1xi1>
    %736 = vector.broadcast %735 : vector<8x1xi1> to vector<8x32xi1>
    %737 = arith.select %736, %731, %683 : vector<8x32xi1>, vector<8x32xf32>
    %c40_156 = arith.constant 40 : index
    %c0_157 = arith.constant 0 : index
    %738 = vector.load %arg5[%c40_156, %c0_157] : memref<64x256xf32, #tpu.memory_space<vmem>>, vector<8x128xf32>
    %c16_158 = arith.constant 16 : index
    %c128_159 = arith.constant 128 : index
    %739 = vector.load %arg5[%c16_158, %c128_159] : memref<64x256xf32, #tpu.memory_space<vmem>>, vector<8x128xf32>
    %740 = tpu.concatenate %714, %737 in 1 : vector<8x32xf32>, vector<8x32xf32> -> vector<8x64xf32>
    %cst_160 = arith.constant dense<0.000000e+00> : vector<8x256xf32>
    %741 = tpu.matmul %740, %466, %cst_160 {dimension_numbers = #tpu.dot_dimension_numbers<[1], [0], [0], [1], [0, 0, 1, 1], [], []>} : vector<8x64xf32>, vector<64x256xf32>, vector<8x256xf32> -> vector<8x256xf32>
    %742 = vector.extract_strided_slice %741 {offsets = [0, 0], sizes = [8, 128], strides = [1, 1]} : vector<8x256xf32> to vector<8x128xf32>
    %743 = arith.addf %738, %742 : vector<8x128xf32>
    %744 = vector.extract_strided_slice %741 {offsets = [0, 128], sizes = [8, 128], strides = [1, 1]} : vector<8x256xf32> to vector<8x128xf32>
    %745 = arith.addf %739, %744 : vector<8x128xf32>
    %c5_i32_161 = arith.constant 5 : i32
    %746 = vector.broadcast %c5_i32_161 : i32 to vector<8x1xi32>
    %747 = arith.cmpi sgt, %8, %746 : vector<8x1xi32>
    %748 = arith.negf %743 : vector<8x128xf32>
    %749 = math.exp %748 : vector<8x128xf32>
    %cst_162 = arith.constant 1.000000e+00 : f32
    %750 = vector.broadcast %cst_162 : f32 to vector<8x128xf32>
    %751 = arith.addf %750, %749 : vector<8x128xf32>
    %752 = arith.divf %750, %751 : vector<8x128xf32>
    %753 = vector.extract_strided_slice %752 {offsets = [0, 0], sizes = [8, 32], strides = [1, 1]} : vector<8x128xf32> to vector<8x32xf32>
    %754 = vector.extract_strided_slice %752 {offsets = [0, 32], sizes = [8, 32], strides = [1, 1]} : vector<8x128xf32> to vector<8x32xf32>
    %755 = vector.extract_strided_slice %752 {offsets = [0, 96], sizes = [8, 32], strides = [1, 1]} : vector<8x128xf32> to vector<8x32xf32>
    %756 = vector.extract_strided_slice %743 {offsets = [0, 64], sizes = [8, 32], strides = [1, 1]} : vector<8x128xf32> to vector<8x32xf32>
    %757 = math.tanh %756 : vector<8x32xf32>
    %758 = arith.mulf %754, %711 : vector<8x32xf32>
    %759 = arith.mulf %753, %757 : vector<8x32xf32>
    %760 = arith.addf %758, %759 : vector<8x32xf32>
    %761 = math.tanh %760 : vector<8x32xf32>
    %762 = arith.mulf %755, %761 : vector<8x32xf32>
    %763 = vector.shape_cast %747 : vector<8x1xi1> to vector<8x1xi1>
    %764 = vector.broadcast %763 : vector<8x1xi1> to vector<8x32xi1>
    %765 = arith.select %764, %760, %711 : vector<8x32xi1>, vector<8x32xf32>
    %766 = vector.shape_cast %747 : vector<8x1xi1> to vector<8x1xi1>
    %767 = vector.broadcast %766 : vector<8x1xi1> to vector<8x32xi1>
    %768 = arith.select %767, %762, %714 : vector<8x32xi1>, vector<8x32xf32>
    %c2_i32_163 = arith.constant 2 : i32
    %769 = vector.broadcast %c2_i32_163 : i32 to vector<8x1xi32>
    %770 = arith.cmpi sgt, %8, %769 : vector<8x1xi32>
    %771 = arith.negf %745 : vector<8x128xf32>
    %772 = math.exp %771 : vector<8x128xf32>
    %cst_164 = arith.constant 1.000000e+00 : f32
    %773 = vector.broadcast %cst_164 : f32 to vector<8x128xf32>
    %774 = arith.addf %773, %772 : vector<8x128xf32>
    %775 = arith.divf %773, %774 : vector<8x128xf32>
    %776 = vector.extract_strided_slice %775 {offsets = [0, 0], sizes = [8, 32], strides = [1, 1]} : vector<8x128xf32> to vector<8x32xf32>
    %777 = vector.extract_strided_slice %775 {offsets = [0, 32], sizes = [8, 32], strides = [1, 1]} : vector<8x128xf32> to vector<8x32xf32>
    %778 = vector.extract_strided_slice %775 {offsets = [0, 96], sizes = [8, 32], strides = [1, 1]} : vector<8x128xf32> to vector<8x32xf32>
    %779 = vector.extract_strided_slice %745 {offsets = [0, 64], sizes = [8, 32], strides = [1, 1]} : vector<8x128xf32> to vector<8x32xf32>
    %780 = math.tanh %779 : vector<8x32xf32>
    %781 = arith.mulf %777, %734 : vector<8x32xf32>
    %782 = arith.mulf %776, %780 : vector<8x32xf32>
    %783 = arith.addf %781, %782 : vector<8x32xf32>
    %784 = math.tanh %783 : vector<8x32xf32>
    %785 = arith.mulf %778, %784 : vector<8x32xf32>
    %786 = vector.shape_cast %770 : vector<8x1xi1> to vector<8x1xi1>
    %787 = vector.broadcast %786 : vector<8x1xi1> to vector<8x32xi1>
    %788 = arith.select %787, %783, %734 : vector<8x32xi1>, vector<8x32xf32>
    %789 = vector.shape_cast %770 : vector<8x1xi1> to vector<8x1xi1>
    %790 = vector.broadcast %789 : vector<8x1xi1> to vector<8x32xi1>
    %791 = arith.select %790, %785, %737 : vector<8x32xi1>, vector<8x32xf32>
    %c48_165 = arith.constant 48 : index
    %c0_166 = arith.constant 0 : index
    %792 = vector.load %arg5[%c48_165, %c0_166] : memref<64x256xf32, #tpu.memory_space<vmem>>, vector<8x128xf32>
    %c8_167 = arith.constant 8 : index
    %c128_168 = arith.constant 128 : index
    %793 = vector.load %arg5[%c8_167, %c128_168] : memref<64x256xf32, #tpu.memory_space<vmem>>, vector<8x128xf32>
    %794 = tpu.concatenate %768, %791 in 1 : vector<8x32xf32>, vector<8x32xf32> -> vector<8x64xf32>
    %cst_169 = arith.constant dense<0.000000e+00> : vector<8x256xf32>
    %795 = tpu.matmul %794, %466, %cst_169 {dimension_numbers = #tpu.dot_dimension_numbers<[1], [0], [0], [1], [0, 0, 1, 1], [], []>} : vector<8x64xf32>, vector<64x256xf32>, vector<8x256xf32> -> vector<8x256xf32>
    %796 = vector.extract_strided_slice %795 {offsets = [0, 0], sizes = [8, 128], strides = [1, 1]} : vector<8x256xf32> to vector<8x128xf32>
    %797 = arith.addf %792, %796 : vector<8x128xf32>
    %798 = vector.extract_strided_slice %795 {offsets = [0, 128], sizes = [8, 128], strides = [1, 1]} : vector<8x256xf32> to vector<8x128xf32>
    %799 = arith.addf %793, %798 : vector<8x128xf32>
    %c6_i32_170 = arith.constant 6 : i32
    %800 = vector.broadcast %c6_i32_170 : i32 to vector<8x1xi32>
    %801 = arith.cmpi sgt, %8, %800 : vector<8x1xi32>
    %802 = arith.negf %797 : vector<8x128xf32>
    %803 = math.exp %802 : vector<8x128xf32>
    %cst_171 = arith.constant 1.000000e+00 : f32
    %804 = vector.broadcast %cst_171 : f32 to vector<8x128xf32>
    %805 = arith.addf %804, %803 : vector<8x128xf32>
    %806 = arith.divf %804, %805 : vector<8x128xf32>
    %807 = vector.extract_strided_slice %806 {offsets = [0, 0], sizes = [8, 32], strides = [1, 1]} : vector<8x128xf32> to vector<8x32xf32>
    %808 = vector.extract_strided_slice %806 {offsets = [0, 32], sizes = [8, 32], strides = [1, 1]} : vector<8x128xf32> to vector<8x32xf32>
    %809 = vector.extract_strided_slice %806 {offsets = [0, 96], sizes = [8, 32], strides = [1, 1]} : vector<8x128xf32> to vector<8x32xf32>
    %810 = vector.extract_strided_slice %797 {offsets = [0, 64], sizes = [8, 32], strides = [1, 1]} : vector<8x128xf32> to vector<8x32xf32>
    %811 = math.tanh %810 : vector<8x32xf32>
    %812 = arith.mulf %808, %765 : vector<8x32xf32>
    %813 = arith.mulf %807, %811 : vector<8x32xf32>
    %814 = arith.addf %812, %813 : vector<8x32xf32>
    %815 = math.tanh %814 : vector<8x32xf32>
    %816 = arith.mulf %809, %815 : vector<8x32xf32>
    %817 = vector.shape_cast %801 : vector<8x1xi1> to vector<8x1xi1>
    %818 = vector.broadcast %817 : vector<8x1xi1> to vector<8x32xi1>
    %819 = arith.select %818, %814, %765 : vector<8x32xi1>, vector<8x32xf32>
    %820 = vector.shape_cast %801 : vector<8x1xi1> to vector<8x1xi1>
    %821 = vector.broadcast %820 : vector<8x1xi1> to vector<8x32xi1>
    %822 = arith.select %821, %816, %768 : vector<8x32xi1>, vector<8x32xf32>
    %c1_i32_172 = arith.constant 1 : i32
    %823 = vector.broadcast %c1_i32_172 : i32 to vector<8x1xi32>
    %824 = arith.cmpi sgt, %8, %823 : vector<8x1xi32>
    %825 = arith.negf %799 : vector<8x128xf32>
    %826 = math.exp %825 : vector<8x128xf32>
    %cst_173 = arith.constant 1.000000e+00 : f32
    %827 = vector.broadcast %cst_173 : f32 to vector<8x128xf32>
    %828 = arith.addf %827, %826 : vector<8x128xf32>
    %829 = arith.divf %827, %828 : vector<8x128xf32>
    %830 = vector.extract_strided_slice %829 {offsets = [0, 0], sizes = [8, 32], strides = [1, 1]} : vector<8x128xf32> to vector<8x32xf32>
    %831 = vector.extract_strided_slice %829 {offsets = [0, 32], sizes = [8, 32], strides = [1, 1]} : vector<8x128xf32> to vector<8x32xf32>
    %832 = vector.extract_strided_slice %829 {offsets = [0, 96], sizes = [8, 32], strides = [1, 1]} : vector<8x128xf32> to vector<8x32xf32>
    %833 = vector.extract_strided_slice %799 {offsets = [0, 64], sizes = [8, 32], strides = [1, 1]} : vector<8x128xf32> to vector<8x32xf32>
    %834 = math.tanh %833 : vector<8x32xf32>
    %835 = arith.mulf %831, %788 : vector<8x32xf32>
    %836 = arith.mulf %830, %834 : vector<8x32xf32>
    %837 = arith.addf %835, %836 : vector<8x32xf32>
    %838 = math.tanh %837 : vector<8x32xf32>
    %839 = arith.mulf %832, %838 : vector<8x32xf32>
    %840 = vector.shape_cast %824 : vector<8x1xi1> to vector<8x1xi1>
    %841 = vector.broadcast %840 : vector<8x1xi1> to vector<8x32xi1>
    %842 = arith.select %841, %837, %788 : vector<8x32xi1>, vector<8x32xf32>
    %843 = vector.shape_cast %824 : vector<8x1xi1> to vector<8x1xi1>
    %844 = vector.broadcast %843 : vector<8x1xi1> to vector<8x32xi1>
    %845 = arith.select %844, %839, %791 : vector<8x32xi1>, vector<8x32xf32>
    %c56_174 = arith.constant 56 : index
    %c0_175 = arith.constant 0 : index
    %846 = vector.load %arg5[%c56_174, %c0_175] : memref<64x256xf32, #tpu.memory_space<vmem>>, vector<8x128xf32>
    %c0_176 = arith.constant 0 : index
    %c128_177 = arith.constant 128 : index
    %847 = vector.load %arg5[%c0_176, %c128_177] : memref<64x256xf32, #tpu.memory_space<vmem>>, vector<8x128xf32>
    %848 = tpu.concatenate %822, %845 in 1 : vector<8x32xf32>, vector<8x32xf32> -> vector<8x64xf32>
    %cst_178 = arith.constant dense<0.000000e+00> : vector<8x256xf32>
    %849 = tpu.matmul %848, %466, %cst_178 {dimension_numbers = #tpu.dot_dimension_numbers<[1], [0], [0], [1], [0, 0, 1, 1], [], []>} : vector<8x64xf32>, vector<64x256xf32>, vector<8x256xf32> -> vector<8x256xf32>
    %850 = vector.extract_strided_slice %849 {offsets = [0, 0], sizes = [8, 128], strides = [1, 1]} : vector<8x256xf32> to vector<8x128xf32>
    %851 = arith.addf %846, %850 : vector<8x128xf32>
    %852 = vector.extract_strided_slice %849 {offsets = [0, 128], sizes = [8, 128], strides = [1, 1]} : vector<8x256xf32> to vector<8x128xf32>
    %853 = arith.addf %847, %852 : vector<8x128xf32>
    %c7_i32_179 = arith.constant 7 : i32
    %854 = vector.broadcast %c7_i32_179 : i32 to vector<8x1xi32>
    %855 = arith.cmpi sgt, %8, %854 : vector<8x1xi32>
    %856 = arith.negf %851 : vector<8x128xf32>
    %857 = math.exp %856 : vector<8x128xf32>
    %cst_180 = arith.constant 1.000000e+00 : f32
    %858 = vector.broadcast %cst_180 : f32 to vector<8x128xf32>
    %859 = arith.addf %858, %857 : vector<8x128xf32>
    %860 = arith.divf %858, %859 : vector<8x128xf32>
    %861 = vector.extract_strided_slice %860 {offsets = [0, 0], sizes = [8, 32], strides = [1, 1]} : vector<8x128xf32> to vector<8x32xf32>
    %862 = vector.extract_strided_slice %860 {offsets = [0, 32], sizes = [8, 32], strides = [1, 1]} : vector<8x128xf32> to vector<8x32xf32>
    %863 = vector.extract_strided_slice %860 {offsets = [0, 96], sizes = [8, 32], strides = [1, 1]} : vector<8x128xf32> to vector<8x32xf32>
    %864 = vector.extract_strided_slice %851 {offsets = [0, 64], sizes = [8, 32], strides = [1, 1]} : vector<8x128xf32> to vector<8x32xf32>
    %865 = math.tanh %864 : vector<8x32xf32>
    %866 = arith.mulf %862, %819 : vector<8x32xf32>
    %867 = arith.mulf %861, %865 : vector<8x32xf32>
    %868 = arith.addf %866, %867 : vector<8x32xf32>
    %869 = math.tanh %868 : vector<8x32xf32>
    %870 = arith.mulf %863, %869 : vector<8x32xf32>
    %871 = vector.shape_cast %855 : vector<8x1xi1> to vector<8x1xi1>
    %872 = vector.broadcast %871 : vector<8x1xi1> to vector<8x32xi1>
    %873 = arith.select %872, %870, %822 : vector<8x32xi1>, vector<8x32xf32>
    %c0_i32_181 = arith.constant 0 : i32
    %874 = vector.broadcast %c0_i32_181 : i32 to vector<8x1xi32>
    %875 = arith.cmpi sgt, %8, %874 : vector<8x1xi32>
    %876 = arith.negf %853 : vector<8x128xf32>
    %877 = math.exp %876 : vector<8x128xf32>
    %cst_182 = arith.constant 1.000000e+00 : f32
    %878 = vector.broadcast %cst_182 : f32 to vector<8x128xf32>
    %879 = arith.addf %878, %877 : vector<8x128xf32>
    %880 = arith.divf %878, %879 : vector<8x128xf32>
    %881 = vector.extract_strided_slice %880 {offsets = [0, 0], sizes = [8, 32], strides = [1, 1]} : vector<8x128xf32> to vector<8x32xf32>
    %882 = vector.extract_strided_slice %880 {offsets = [0, 32], sizes = [8, 32], strides = [1, 1]} : vector<8x128xf32> to vector<8x32xf32>
    %883 = vector.extract_strided_slice %880 {offsets = [0, 96], sizes = [8, 32], strides = [1, 1]} : vector<8x128xf32> to vector<8x32xf32>
    %884 = vector.extract_strided_slice %853 {offsets = [0, 64], sizes = [8, 32], strides = [1, 1]} : vector<8x128xf32> to vector<8x32xf32>
    %885 = math.tanh %884 : vector<8x32xf32>
    %886 = arith.mulf %882, %842 : vector<8x32xf32>
    %887 = arith.mulf %881, %885 : vector<8x32xf32>
    %888 = arith.addf %886, %887 : vector<8x32xf32>
    %889 = math.tanh %888 : vector<8x32xf32>
    %890 = arith.mulf %883, %889 : vector<8x32xf32>
    %891 = vector.shape_cast %875 : vector<8x1xi1> to vector<8x1xi1>
    %892 = vector.broadcast %891 : vector<8x1xi1> to vector<8x32xi1>
    %893 = arith.select %892, %890, %845 : vector<8x32xi1>, vector<8x32xf32>
    %894 = tpu.concatenate %873, %893 in 1 : vector<8x32xf32>, vector<8x32xf32> -> vector<8x64xf32>
    %c240 = arith.constant 240 : index
    %c0_183 = arith.constant 0 : index
    %895 = vector.load %arg3[%c240, %c0_183] : memref<312x256xf32, #tpu.memory_space<vmem>>, vector<64x256xf32>
    %c304 = arith.constant 304 : index
    %c0_184 = arith.constant 0 : index
    %896 = vector.load %arg3[%c304, %c0_184] : memref<312x256xf32, #tpu.memory_space<vmem>>, vector<1x256xf32>
    %cst_185 = arith.constant dense<0.000000e+00> : vector<8x256xf32>
    %897 = tpu.matmul %894, %895, %cst_185 {dimension_numbers = #tpu.dot_dimension_numbers<[1], [0], [0], [1], [0, 0, 1, 1], [], []>} : vector<8x64xf32>, vector<64x256xf32>, vector<8x256xf32> -> vector<8x256xf32>
    %898 = vector.broadcast %896 : vector<1x256xf32> to vector<8x256xf32>
    %899 = arith.addf %897, %898 : vector<8x256xf32>
    %900 = vector.extract_strided_slice %899 {offsets = [0, 0], sizes = [2, 4], strides = [1, 1]} : vector<8x256xf32> to vector<2x4xf32>
    %c0_186 = arith.constant 0 : index
    %c0_187 = arith.constant 0 : index
    %901 = vector.load %arg4[%c0_186, %c0_187] : memref<2x4xf32, #tpu.memory_space<vmem>>, vector<2x4xf32>
    tpu.vector_store %arg4[%c0_186, %c0_187], %900 {strides = array<i32>} : memref<2x4xf32, #tpu.memory_space<vmem>>, vector<2x4xf32>,
    return
  }
}

</mosaic_0001>

<bundles_post_ra>
// kernel: lw_lstm_forward.1
= control target key start
LH: loop header
LB: loop body
LE: loop exit
PB: predicated region body
PF: predicated region fallthrough
CT: control target
= control target key end

     0   :  { %9 = vsyncpa [#allocation5], 0  ;;  %s4427_s0 = inlined_call_operand.vmem [shape: s32[64,1], index: 0, kind: input, shape index: {}]   ;;  %s4428_s1 = inlined_call_operand.vmem [shape: s32[8,1], index: 1, kind: input, shape index: {}]   ;;  %s4429_s2 = inlined_call_operand.vmem [shape: f32[64,32], index: 2, kind: input, shape index: {}]   ;;  %s4430_s3 = inlined_call_operand.hbm [shape: f32[312,256], index: 3, kind: input, shape index: {}]   ;;  %s4431_s4 = inlined_call_operand.hbm [shape: f32[2,4], index: 4, kind: output, shape index: {}]  }
   0x1   :  { %10 = vsyncpa [#allocation6], 0  ;;  %s21_s17 = sshll.u32 %s4430_s3, 4  ;;  %s3178_s18 = smov [#allocation4]   ;;  %s22_s17 = int_to_ptr.hbm [resolvable:$true] %s21_s17 }
   0x2   :  { %s23_s19 = sshll.u32 %s3178_s18, 4  ;;  %s3179_s20 = smov 256   ;;  %s24_s19 = int_to_ptr.vmem [resolvable:$true] %s23_s19 }
   0x3   :  { %s3180_s21 = smov 16  }
   0x4   :  { %29 = dma.hbm_to_vmem [thread:$0]  %s22_s17, 9984, %s24_s19, [#allocation5], %s3179_s20, %s3179_s20, %s3180_s21  }
   0x5   :  { %3174 = dma.done.wait [#allocation5], 9984  }
   0x6   :  { %3175 = vsyncadd [#allocation5], 4294957312  ;;  %v3181_v0 = vmov 0   ;;  %v36_v1 = vld [vmem:[%s4427_s0 + $0x10] sm:$0xff]  ;;  %v34_v2 = vld [vmem:[%s4427_s0] sm:$0xff]  ;;  %v42_v17 = vlaneseq  ;;  %vm100_vm0 = vcmask 523264  }
   0x7   :  { %2868 = vset.pattern.permute.xlu1 %v3181_v0  ;;  %2867 = vset.pattern.permute.xlu0 %v3181_v0  ;;  %v38_v3 = vld [vmem:[%s4427_s0 + $0x20] sm:$0xff]  ;;  %v99_v4 = vld [vmem:[%s4429_s2 + $0x38] sm:$0xff]  ;;  %v98_v5 = vld [vmem:[%s4429_s2 + $0x30] sm:$0xff]  ;;  %v3182_v20 = vmov 0.0   ;;  %vm182_vm9 = vcmask 261120   ;;  %s2736_s5 = sshll.u32 %s4431_s4, 4  ;;  %s2737_s5 = int_to_ptr.hbm [resolvable:$true] %s2736_s5 }
   0x8   :  { %2869 = vset.pattern.permute.xlu2 %v3181_v0  ;;  %51 = vperm.xlu1 %2868, %v36_v1   ;;  %v97_v6 = vld [vmem:[%s4429_s2 + $0x28] sm:$0xff]  ;;  %v37_v7 = vld [vmem:[%s4427_s0 + $0x18] sm:$0xff]  ;;  %v96_v9 = vld [vmem:[%s4429_s2 + $0x20] sm:$0xff]  ;;  %v3265_v18 = vand.u32 127, %v42_v17 }
   0x9   :  { %45 = vperm.xlu0 %2867, %v34_v2   ;;  %57 = vperm.xlu2 %2869, %v38_v3   ;;  %v35_v8 = vld [vmem:[%s4427_s0 + $0x8] sm:$0xff]  ;;  %v95_v11 = vld [vmem:[%s4429_s2 + $0x18] sm:$0xff]  ;;  %v94_v12 = vld [vmem:[%s4429_s2 + $0x10] sm:$0xff] }
   0xa   :  { %133 = vmatpush.msra.mxu0 %v99_v4  ;;  %v39_v10 = vld [vmem:[%s4427_s0 + $0x28] sm:$0xff]  ;;  %v41_v14 = vld [vmem:[%s4427_s0 + $0x38] sm:$0xff]  ;;  %v40_v15 = vld [vmem:[%s4427_s0 + $0x30] sm:$0xff]  ;;  %s3183_s0 = smov 64  }
   0xb   :  { %v93_v13 = vld [vmem:[%s4429_s2 + $0x8] sm:$0xff]  ;;  %v92_v16 = vld [vmem:[%s4429_s2] sm:$0xff]  ;;  %v3279_v29 = vld [vmem:[#allocation4 + $0xb0] sm:$0xff]  ;;  %s3184_s2 = smov 32  }
   0xc   :  { %134 = vmatpush.msra.mxu0 %v98_v5  ;;  %v3281_v30 = vld [vmem:[#allocation4 + $0xa0] sm:$0xff]  ;;  %334 = vmatpush.msra.mxu3 %v3279_v29  ;;  %v3286_v31 = vld [vmem:[#allocation4 + $0x90] sm:$0xff]  ;;  %v174_v52 = vld [vmem:[#allocation4 + $0x38] sm:$0xff] }
   0xd   :  { %v173_v32 = vld [vmem:[#allocation4 + $0x30] sm:$0xff]  ;;  %v171_v33 = vld [vmem:[#allocation4 + $0x20] sm:$0xff]  ;;  %v172_v53 = vld [vmem:[#allocation4 + $0x28] sm:$0xff] }
   0xe   :  { %135 = vmatpush.msra.mxu0 %v97_v6  ;;  %335 = vmatpush.msra.mxu3 %v3281_v30  ;;  %v3289_v34 = vld [vmem:[#allocation4 + $0x80] sm:$0xff]  ;;  %v169_v35 = vld [vmem:[#allocation4 + $0x10] sm:$0xff]  ;;  %v170_v54 = vld [vmem:[#allocation4 + $0x18] sm:$0xff] }
   0xf   :  { %219 = vmatpush.msra.mxu1 %v173_v32  ;;  %2855 = vmatpush.msra.mxu2 %v173_v32  ;;  %v3294_v37 = vld [vmem:[#allocation4 + $0x70] sm:$0xff]  ;;  %v3299_v38 = vld [vmem:[#allocation4 + $0x60] sm:$0xff]  ;;  %v168_v55 = vld [vmem:[#allocation4 + $0x8] sm:$0xff] }
  0x10   :  { %54 = vperm.xlu1 %2868, %v37_v7   ;;  %136 = vmatpush.msra.mxu0 %v96_v9  ;;  %v3303_v40 = vld [vmem:[#allocation4 + $0x50] sm:$0xff]  ;;  %v3308_v41 = vld [vmem:[#allocation4 + $0x40] sm:$0xff]  ;;  %v3358_v60 = vld [vmem:[#allocation4 + $0xb8] sm:$0xff] }
  0x11   :  { %48 = vperm.xlu0 %2867, %v35_v8   ;;  %60 = vperm.xlu2 %2869, %v39_v10   ;;  %v167_v47 = vld [vmem:[#allocation4] sm:$0xff]  ;;  %v3360_v61 = vld [vmem:[#allocation4 + $0xa8] sm:$0xff]  ;;  %v3364_v62 = vld [vmem:[#allocation4 + $0x98] sm:$0xff] }
  0x12   :  { %137 = vmatpush.msra.mxu0 %v95_v11  ;;  %336 = vmatpush.msra.mxu3 %v3286_v31  ;;  %v3371_v63 = vld [vmem:[#allocation4 + $0x88] sm:$0xff]  ;;  %v3373_v1 = vld [vmem:[#allocation4 + $0x78] sm:$0xff] }
  0x13   :  { %220 = vmatpush.msra.mxu1 %v171_v33  ;;  %2856 = vmatpush.msra.mxu2 %v171_v33  ;;  %v3377_v2 = vld [vmem:[#allocation4 + $0x68] sm:$0xff]  ;;  %v3381_v3 = vld [vmem:[#allocation4 + $0x58] sm:$0xff] }
  0x14   :  { %138 = vmatpush.msra.mxu0 %v94_v12  ;;  %337 = vmatpush.msra.mxu3 %v3289_v34  ;;  %v3388_v4 = vld [vmem:[#allocation4 + $0x48] sm:$0xff] }
  0x15   :  { %221 = vmatpush.msra.mxu1 %v169_v35  ;;  %2857 = vmatpush.msra.mxu2 %v169_v35  ;;  %v176_v5 = vld [vmem:[#allocation4 + $0x1c0] ss:$8 sm:$0x3] }
  0x16   :  { %139 = vmatpush.msra.mxu0 %v93_v13  ;;  %338 = vmatpush.msra.mxu3 %v3294_v37  ;;  %v3421_v6 = vperm.slane %v176_v5, 0 }
  0x17   :  { %222 = vmatpush.msra.mxu1 %v167_v47  ;;  %2858 = vmatpush.msra.mxu2 %v167_v47 }
  0x18   :  { %66 = vperm.xlu1 %2868, %v41_v14   ;;  %140 = vmatpush.msra.mxu0 %v92_v16 }
  0x19   :  { %63 = vperm.xlu0 %2867, %v40_v15   ;;  %339 = vmatpush.msra.mxu3 %v3299_v38 }
  0x1a   :  { %779 = vmatpush.msrb.mxu0 %v3279_v29  ;;  %631 = vmatpush.msrb.mxu1 %v3279_v29 }
  0x1b   :  { %340 = vmatpush.msra.mxu3 %v3303_v40  ;;  %260 = vmatpush.msrb.mxu2 %v174_v52 }
  0x1c   :  { %780 = vmatpush.msrb.mxu0 %v3281_v30  ;;  %632 = vmatpush.msrb.mxu1 %v3281_v30 }
  0x1d   :  { %341 = vmatpush.msra.mxu3 %v3308_v41  ;;  %261 = vmatpush.msrb.mxu2 %v172_v53 }
  0x1e   :  { %781 = vmatpush.msrb.mxu0 %v3286_v31  ;;  %342 = vmatmul.f32.vlgmr.msra.gmra.mxu3 %v3182_v20 }
  0x1f   :  { %633 = vmatpush.msrb.mxu1 %v3286_v31  ;;  %262 = vmatpush.msrb.mxu2 %v170_v54 }
  0x20   :  { %782 = vmatpush.msrb.mxu0 %v3289_v34  ;;  %354 = vmatpush.msrb.mxu3 %v3358_v60 }
  0x21   :  { %634 = vmatpush.msrb.mxu1 %v3289_v34  ;;  %263 = vmatpush.msrb.mxu2 %v168_v55 }
  0x22   :  { %783 = vmatpush.msrb.mxu0 %v3294_v37  ;;  %355 = vmatpush.msrb.mxu3 %v3360_v61 }
  0x23   :  { %635 = vmatpush.msrb.mxu1 %v3294_v37 }
  0x24   :  { %784 = vmatpush.msrb.mxu0 %v3299_v38  ;;  %356 = vmatpush.msrb.mxu3 %v3364_v62 }
  0x25   :  { %636 = vmatpush.msrb.mxu1 %v3299_v38 }
  0x26   :  { %785 = vmatpush.msrb.mxu0 %v3303_v40  ;;  %357 = vmatpush.msrb.mxu3 %v3371_v63 }
  0x27   :  { %637 = vmatpush.msrb.mxu1 %v3303_v40 }
  0x28   :  { %786 = vmatpush.msrb.mxu0 %v3308_v41  ;;  %358 = vmatpush.msrb.mxu3 %v3373_v1 }
  0x29   :  { %638 = vmatpush.msrb.mxu1 %v3308_v41 }
  0x2a   :  { %359 = vmatpush.msrb.mxu3 %v3377_v2 }
  0x2c   :  { %360 = vmatpush.msrb.mxu3 %v3381_v3 }
  0x2e   :  { %361 = vmatpush.msrb.mxu3 %v3388_v4 }
  0x2f   :  { %362 = vmatmul.f32.vlgmr.msrb.gmra.mxu3 %v3182_v20 }
  0x30   :  { %483 = vmatpush.msra.mxu3 %v3279_v29 }
  0x32   :  { %484 = vmatpush.msra.mxu3 %v3281_v30 }
  0x34   :  { %485 = vmatpush.msra.mxu3 %v3286_v31 }
  0x36   :  { %486 = vmatpush.msra.mxu3 %v3289_v34 }
  0x38   :  { %487 = vmatpush.msra.mxu3 %v3294_v37 }
  0x3a   :  { %488 = vmatpush.msra.mxu3 %v3299_v38 }
  0x3c   :  { %489 = vmatpush.msra.mxu3 %v3303_v40 }
  0x3e   :  { %490 = vmatpush.msra.mxu3 %v3308_v41 }
  0x40   :  { %503 = vmatpush.msrb.mxu3 %v3358_v60 }
  0x42   :  { %504 = vmatpush.msrb.mxu3 %v3360_v61 }
  0x44   :  { %505 = vmatpush.msrb.mxu3 %v3364_v62 }
  0x46   :  { %506 = vmatpush.msrb.mxu3 %v3371_v63 }
  0x48   :  { %507 = vmatpush.msrb.mxu3 %v3373_v1 }
  0x4a   :  { %508 = vmatpush.msrb.mxu3 %v3377_v2 }
  0x4c   :  { %509 = vmatpush.msrb.mxu3 %v3381_v3 }
  0x4e   :  { %510 = vmatpush.msrb.mxu3 %v3388_v4 }
  0x63   :  { %v58_v28 = vpop.permute.xlu2 %57 }
  0x64   :  { %vm72_vm5 = vcmp.eq.s32.totalorder %v58_v28, %v3265_v18 }
  0x65   :  { %v2750_v36 = vsel %vm72_vm5, 1.0, %v3182_v20 }
  0x6b   :  { %v61_v39 = vpop.permute.xlu2 %60 }
  0x6c   :  { %vm73_vm6 = vcmp.eq.s32.totalorder %v61_v39, %v3265_v18 }
  0x6d   :  { %v2751_v42 = vsel %vm73_vm6, 1.0, %v3182_v20 }
  0x7a   :  { %v52_v24 = vpop.permute.xlu1 %51 }
  0x7b   :  { %v46_v19 = vpop.permute.xlu0 %45  ;;  %vm70_vm3 = vcmp.eq.s32.totalorder %v52_v24, %v3265_v18 }
  0x7c   :  { %vm68_vm1 = vcmp.eq.s32.totalorder %v46_v19, %v3265_v18  ;;  %v2748_v25 = vsel %vm70_vm3, 1.0, %v3182_v20 }
  0x7d   :  { %v2746_v21 = vsel %vm68_vm1, 1.0, %v3182_v20 }
  0x7e   :  { %2754 = vmatmul.msk.f32.vlgmr.msra.gmra.mxu0 %vm100_vm0, %v2746_v21 }
  0x7f   :  { %1063 = vmatpush.msra.mxu0 %v3279_v29 }
  0x81   :  { %1064 = vmatpush.msra.mxu0 %v3281_v30 }
  0x82   :  { %v55_v26 = vpop.permute.xlu1 %54 }
  0x83   :  { %v49_v22 = vpop.permute.xlu0 %48  ;;  %vm71_vm4 = vcmp.eq.s32.totalorder %v55_v26, %v3265_v18  ;;  %1065 = vmatpush.msra.mxu0 %v3286_v31 }
  0x84   :  { %vm69_vm2 = vcmp.eq.s32.totalorder %v49_v22, %v3265_v18  ;;  %v2749_v27 = vsel %vm71_vm4, 1.0, %v3182_v20 }
  0x85   :  { %v2747_v23 = vsel %vm69_vm2, 1.0, %v3182_v20  ;;  %1066 = vmatpush.msra.mxu0 %v3289_v34 }
  0x86   :  { %2755 = vmatmul.msk.f32.gmra.mxu0 %vm100_vm0, %v2747_v23 }
  0x87   :  { %1067 = vmatpush.msra.mxu0 %v3294_v37 }
  0x89   :  { %1068 = vmatpush.msra.mxu0 %v3299_v38 }
  0x8a   :  { %v67_v45 = vpop.permute.xlu1 %66 }
  0x8b   :  { %v64_v43 = vpop.permute.xlu0 %63  ;;  %vm75_vm8 = vcmp.eq.s32.totalorder %v67_v45, %v3265_v18  ;;  %1069 = vmatpush.msra.mxu0 %v3303_v40 }
  0x8c   :  { %vm74_vm7 = vcmp.eq.s32.totalorder %v64_v43, %v3265_v18  ;;  %v2753_v46 = vsel %vm75_vm8, 1.0, %v3182_v20 }
  0x8d   :  { %v2752_v44 = vsel %vm74_vm7, 1.0, %v3182_v20  ;;  %1070 = vmatpush.msra.mxu0 %v3308_v41  ;;  %vm467_vm7 = vcmask 523520  }
  0x8e   :  { %2756 = vmatmul.msk.f32.gmra.mxu0 %vm100_vm0, %v2748_v25  ;;  %v179_v25 = vperm.slane %v176_v5, 1 }
  0x96   :  { %2757 = vmatmul.msk.f32.gmra.mxu0 %vm100_vm0, %v2749_v27 }
  0x9e   :  { %2758 = vmatmul.msk.f32.gmra.mxu0 %vm100_vm0, %v2750_v36 }
  0xa1   :  { %v343_v8 = vpop.f32.mrf.mxu3 }
  0xa6   :  { %2759 = vmatmul.msk.f32.gmra.mxu0 %vm100_vm0, %v2751_v42 }
  0xae   :  { %2760 = vmatmul.msk.f32.gmra.mxu0 %vm100_vm0, %v2752_v44 }
  0xb6   :  { %2761 = vmatmul.msk.f32.gmra.mxu0 %vm100_vm0, %v2753_v46 }
  0xfb   :  { %v142_v48 = vpop.f32.mrf.mxu0 }
  0xfc   :  { %2762 = vmatmul.msk.f32.vlgmr.msra.gmra.mxu1 %vm182_vm9, %v142_v48 }
  0xfd   :  { %927 = vmatpush.msra.mxu1 %v3279_v29 }
  0xff   :  { %928 = vmatpush.msra.mxu1 %v3281_v30 }
 0x101   :  { %929 = vmatpush.msra.mxu1 %v3286_v31 }
 0x103   :  { %v145_v49 = vpop.f32.mrf.mxu0  ;;  %930 = vmatpush.msra.mxu1 %v3289_v34 }
 0x104   :  { %2763 = vmatmul.msk.f32.gmra.mxu1 %vm182_vm9, %v145_v49 }
 0x105   :  { %931 = vmatpush.msra.mxu1 %v3294_v37 }
 0x107   :  { %932 = vmatpush.msra.mxu1 %v3299_v38 }
 0x109   :  { %933 = vmatpush.msra.mxu1 %v3303_v40 }
 0x10b   :  { %v148_v50 = vpop.f32.mrf.mxu0  ;;  %934 = vmatpush.msra.mxu1 %v3308_v41 }
 0x10c   :  { %2764 = vmatmul.msk.f32.gmra.mxu1 %vm182_vm9, %v148_v50 }
 0x113   :  { %v151_v51 = vpop.f32.mrf.mxu0 }
 0x114   :  { %2765 = vmatmul.msk.f32.gmra.mxu1 %vm182_vm9, %v151_v51 }
 0x11b   :  { %v154_v56 = vpop.f32.mrf.mxu0 }
 0x11c   :  { %2766 = vmatmul.msk.f32.gmra.mxu1 %vm182_vm9, %v154_v56 }
 0x123   :  { %v157_v57 = vpop.f32.mrf.mxu0 }
 0x124   :  { %2767 = vmatmul.msk.f32.gmra.mxu1 %vm182_vm9, %v157_v57 }
 0x12b   :  { %v160_v58 = vpop.f32.mrf.mxu0 }
 0x12c   :  { %2768 = vmatmul.msk.f32.gmra.mxu1 %vm182_vm9, %v160_v58 }
 0x133   :  { %v163_v59 = vpop.f32.mrf.mxu0 }
 0x134   :  { %2769 = vmatmul.msk.f32.vlgmr.msra.gmra.mxu2 %vm182_vm9, %v163_v59 }
 0x135   :  { %651 = vmatpush.msra.mxu2 %v3358_v60 }
 0x137   :  { %652 = vmatpush.msra.mxu2 %v3360_v61 }
 0x139   :  { %653 = vmatpush.msra.mxu2 %v3364_v62 }
 0x13b   :  { %654 = vmatpush.msra.mxu2 %v3371_v63 }
 0x13c   :  { %2770 = vmatmul.msk.f32.vlgmr.msrb.gmra.mxu2 %vm182_vm9, %v142_v48 }
 0x13d   :  { %655 = vmatpush.msra.mxu2 %v3373_v1 }
 0x13f   :  { %656 = vmatpush.msra.mxu2 %v3377_v2 }
 0x141   :  { %657 = vmatpush.msra.mxu2 %v3381_v3 }
 0x143   :  { %658 = vmatpush.msra.mxu2 %v3388_v4 }
 0x144   :  { %2771 = vmatmul.msk.f32.gmra.mxu2 %vm182_vm9, %v145_v49 }
 0x145   :  { %947 = vmatpush.msrb.mxu2 %v3358_v60 }
 0x147   :  { %948 = vmatpush.msrb.mxu2 %v3360_v61 }
 0x149   :  { %949 = vmatpush.msrb.mxu2 %v3364_v62 }
 0x14b   :  { %950 = vmatpush.msrb.mxu2 %v3371_v63 }
 0x14c   :  { %2772 = vmatmul.msk.f32.gmra.mxu2 %vm182_vm9, %v148_v50 }
 0x14d   :  { %951 = vmatpush.msrb.mxu2 %v3373_v1 }
 0x14f   :  { %952 = vmatpush.msrb.mxu2 %v3377_v2 }
 0x151   :  { %953 = vmatpush.msrb.mxu2 %v3381_v3 }
 0x153   :  { %954 = vmatpush.msrb.mxu2 %v3388_v4 }
 0x154   :  { %2773 = vmatmul.msk.f32.gmra.mxu2 %vm182_vm9, %v151_v51 }
 0x15c   :  { %2774 = vmatmul.msk.f32.gmra.mxu2 %vm182_vm9, %v154_v56 }
 0x164   :  { %2775 = vmatmul.msk.f32.gmra.mxu2 %vm182_vm9, %v157_v57 }
 0x16c   :  { %2776 = vmatmul.msk.f32.gmra.mxu2 %vm182_vm9, %v160_v58 }
 0x174   :  { %2777 = vmatmul.msk.f32.gmra.mxu2 %vm182_vm9, %v163_v59 }
 0x179   :  { %v224_v7 = vpop.f32.mrf.mxu1 }
 0x17a   :  { %v225_v9 = vadd.f32 %v224_v7, %v3421_v6 }
 0x17c   :  { %v366_v10 = vadd.f32 %v343_v8, %v225_v9  ;;  %v363_v8 = vpop.f32.mrf.mxu3 }
 0x17e   :  { %2870 = vtanh.f32 %v366_v10  ;;  %v2778_v21 = vmul.f32 -1.442695, %v366_v10 }
 0x180   :  { %2872 = vpow2.f32 %v2778_v21 }
 0x181   :  { %v3424_v11 = vpop.f32.mrf.mxu1 }
 0x184   :  { %v2871_v12 = vpop.eup %2870 }
 0x185   :  { %391 = vrot.lane.b32.xlu2 %v2871_v12, %s3183_s0 }
 0x186   :  { %v2873_v24 = vpop.eup %2872 }
 0x187   :  { %v372_v26 = vadd.f32 1.0, %v2873_v24 }
 0x189   :  { %v3427_v13 = vpop.f32.mrf.mxu1  ;;  %2874 = vrcp.f32 %v372_v26  ;;  %v384_v48 = vand.u32 2147483648, %v372_v26  ;;  %vm378_vm11 = vweird.f32 %v372_v26  ;;  %v382_v49 = vand.u32 2147483647, %v372_v26 }
 0x18b   :  { %v385_v51 = vor.u32 1.1754944e-38, %v384_v48  ;;  %vm383_vm13 = vcmp.eq.f32.partialorder %v382_v49, 8.507059e+37 }
 0x18f   :  { %v2875_v35 = vpop.eup %2874 }
 0x190   :  { %v374_v36 = vmul.f32 %v2875_v35, %v372_v26  ;;  %vm379_vm10 = vweird.f32 %v2875_v35 }
 0x191   :  { %v233_v14 = vpop.f32.mrf.mxu1  ;;  %vm380_vm12 = vmor %vm378_vm11, %vm379_vm10 }
 0x192   :  { %v3430_v15 = vadd.f32 %v233_v14, %v3421_v6  ;;  %v375_v43 = vsub.f32 1.0, %v374_v36 }
 0x194   :  { %v376_v44 = vmul.f32 %v2875_v35, %v375_v43 }
 0x196   :  { %v377_v47 = vadd.f32 %v2875_v35, %v376_v44 }
 0x198   :  { %v381_v50 = vsel %vm380_vm12, %v2875_v35, %v377_v47 }
 0x199   :  { %v236_v16 = vpop.f32.mrf.mxu1  ;;  %v386_v53 = vsel %vm383_vm13, %v385_v51, %v381_v50 }
 0x19a   :  { %v3433_v17 = vadd.f32 %v236_v16, %v3421_v6 }
 0x1a1   :  { %v239_v18 = vpop.f32.mrf.mxu1 }
 0x1a2   :  { %v3436_v19 = vadd.f32 %v239_v18, %v3421_v6  ;;  %v389_v18 = vmul.f32 0.0, %v386_v53 }
 0x1b7   :  { %v245_v22 = vpop.f32.mrf.mxu2 }
 0x1b8   :  { %v3439_v23 = vadd.f32 %v245_v22, %v3421_v6 }
 0x1bf   :  { %v265_v27 = vpop.f32.mrf.mxu2 }
 0x1c0   :  { %v3441_v28 = vadd.f32 %v265_v27, %v179_v25 }
 0x1c7   :  { %v268_v32 = vpop.f32.mrf.mxu2 }
 0x1c8   :  { %v3443_v33 = vadd.f32 %v268_v32, %v179_v25 }
 0x1cf   :  { %v271_v39 = vpop.f32.mrf.mxu2 }
 0x1d0   :  { %v3445_v42 = vadd.f32 %v271_v39, %v179_v25 }
 0x1d7   :  { %v274_v45 = vpop.f32.mrf.mxu2 }
 0x1d8   :  { %v3447_v46 = vadd.f32 %v274_v45, %v179_v25 }
 0x1df   :  { %v392_v52 = vpop.permute.xlu2 %391  ;;  %v277_v54 = vpop.f32.mrf.mxu2 }
 0x1e0   :  { %v394_v55 = vmul.f32 %v392_v52, %v386_v53  ;;  %v3449_v56 = vadd.f32 %v277_v54, %v179_v25 }
 0x1e2   :  { %396 = vrot.lane.b32.xlu1 %v394_v55, %s3184_s2 }
 0x1e7   :  { %v280_v57 = vpop.f32.mrf.mxu2 }
 0x1e8   :  { %v3452_v58 = vadd.f32 %v280_v57, %v179_v25 }
 0x1ef   :  { %v283_v59 = vpop.f32.mrf.mxu2 }
 0x1f0   :  { %v3454_v5 = vadd.f32 %v283_v59, %v179_v25 }
 0x1f7   :  { %v286_v7 = vpop.f32.mrf.mxu2 }
 0x1f8   :  { %v287_v9 = vadd.f32 %v286_v7, %v179_v25  ;;  %v3463_v25 = vld [vmem:[%s4428_s1] sm:$0xff]  ;;  %s3185_s1 = smov [#allocation7]  }
 0x1f9   :  { %vm413_vm14 = vcmp.gt.s32.totalorder %v3463_v25, 7  ;;  %vm368_vm4 = vcmp.gt.s32.totalorder %v3463_v25, 0  ;;  %s2734_s28 = sshll.u32 %s3185_s1, 4  ;;  %s2735_s28 = int_to_ptr.vmem [resolvable:$true] %s2734_s28 }
 0x1fa   :  { %v367_v10 = vadd.f32 %v363_v8, %v287_v9  ;;  %v451_v35 = vsel %vm413_vm14, 1, %v3181_v0  ;;  %v406_v52 = vsel %vm368_vm4, 1, %v3181_v0 }
 0x1fc   :  { %2876 = vtanh.f32 %v367_v10  ;;  %v2779_v14 = vmul.f32 -1.442695, %v367_v10 }
 0x1fe   :  { %2878 = vpow2.f32 %v2779_v14 }
 0x202   :  { %v2877_v12 = vpop.eup %2876 }
 0x203   :  { %436 = vrot.lane.b32.xlu0 %v2877_v12, %s3183_s0 }
 0x204   :  { %v2879_v16 = vpop.eup %2878 }
 0x205   :  { %v417_v22 = vadd.f32 1.0, %v2879_v16 }
 0x207   :  { %v429_v44 = vand.u32 2147483648, %v417_v22  ;;  %vm423_vm1 = vweird.f32 %v417_v22  ;;  %v427_v45 = vand.u32 2147483647, %v417_v22 }
 0x209   :  { %v430_v48 = vor.u32 1.1754944e-38, %v429_v44  ;;  %vm428_vm3 = vcmp.eq.f32.partialorder %v427_v45, 8.507059e+37 }
 0x254   :  { %v397_v21 = vpop.permute.xlu1 %396 }
 0x255   :  { %v3457_v24 = vadd.f32 %v397_v21, %v389_v18 }
 0x257   :  { %2880 = vtanh.f32 %v3457_v24 }
 0x258   :  { %2882 = vrcp.f32 %v417_v22 }
 0x25d   :  { %v2881_v26 = vpop.eup %2880 }
 0x25e   :  { %402 = vrot.lane.b32.xlu0 %v2881_v26, %s3183_s0  ;;  %v2883_v27 = vpop.eup %2882  ;;  %v228_v26 = vadd.f32 %v3424_v11, %v3421_v6 }
 0x25f   :  { %v419_v32 = vmul.f32 %v2883_v27, %v417_v22  ;;  %vm424_vm15 = vweird.f32 %v2883_v27 }
 0x260   :  { %vm425_vm2 = vmor %vm423_vm1, %vm424_vm15 }
 0x261   :  { %v420_v36 = vsub.f32 1.0, %v419_v32 }
 0x263   :  { %v421_v39 = vmul.f32 %v2883_v27, %v420_v36 }
 0x265   :  { %v422_v43 = vadd.f32 %v2883_v27, %v421_v39 }
 0x266   :  { %453 = vperm.xlu0 %2867, %v451_v35  }
 0x267   :  { %v426_v47 = vsel %vm425_vm2, %v2883_v27, %v422_v43  ;;  %vm517_vm2 = vcmp.gt.s32.totalorder %v3463_v25, 1 }
 0x268   :  { %v431_v50 = vsel %vm428_vm3, %v430_v48, %v426_v47  ;;  %vm562_vm3 = vcmp.gt.s32.totalorder %v3463_v25, 6 }
 0x269   :  { %v434_v54 = vmul.f32 0.0, %v431_v50 }
 0x275   :  { %v437_v49 = vpop.permute.xlu0 %436 }
 0x276   :  { %v439_v51 = vmul.f32 %v437_v49, %v431_v50 }
 0x278   :  { %441 = vrot.lane.b32.xlu2 %v439_v51, %s3184_s2 }
 0x280   :  { %408 = vperm.xlu2 %2869, %v406_v52  }
 0x2d0   :  { %v403_v8 = vpop.permute.xlu0 %402 }
 0x2d1   :  { %v405_v9 = vmul.f32 %v403_v8, %v386_v53 }
 0x2d2   :  { %v442_v55 = vpop.permute.xlu2 %441 }
 0x2d3   :  { %v3471_v57 = vadd.f32 %v442_v55, %v434_v54 }
 0x2d5   :  { %2884 = vtanh.f32 %v3471_v57 }
 0x2d8   :  { %v3484_v12 = vpop.permute.xlu0 %453 }
 0x2d9   :  { %vm4432_vm6 = vcmp.eq.s32.totalorder %v3484_v12, 1 }
 0x2da   :  { %v3475_v7 = vpop.permute.xlu2 %408 }
 0x2db   :  { %v2885_v59 = vpop.eup %2884  ;;  %vm4433_vm5 = vcmp.eq.s32.totalorder %v3475_v7, 1 }
 0x2dc   :  { %447 = vrot.lane.b32.xlu1 %v2885_v59, %s3183_s0  ;;  %v3480_v10 = vsel %vm4433_vm5, %v405_v9, 0.0 }
 0x2e4   :  { %459 = vrot.lane.b32.xlu1 %v3480_v10, %s3184_s2 }
 0x34e   :  { %v448_v14 = vpop.permute.xlu1 %447 }
 0x34f   :  { %v450_v16 = vmul.f32 %v448_v14, %v431_v50 }
 0x351   :  { %v3489_v18 = vsel %vm4432_vm6, %v450_v16, 0.0 }
 0x352   :  { %464 = vrot.lane.b32.xlu2 %v3489_v18, %s3183_s0 }
 0x356   :  { %v460_v53 = vpop.permute.xlu1 %459 }
 0x357   :  { %462 = vst.msk [vmem:[#allocation3] sm:$0xff] %vm182_vm9, %v460_v53 }
 0x3ac   :  { %v465_v21 = vpop.permute.xlu2 %464 }
 0x3ad   :  { %468 = vst.msk [vmem:[#allocation3 + $0x38] sm:$0xff] %vm467_vm7, %v465_v21  ;;  %v471_v22 = vsel %vm182_vm9, %v460_v53, %v465_v21 }
 0x3ae   :  { %2780 = vmatmul.msk.f32.vlgmr.msra.gmra.mxu3 %vm100_vm0, %v471_v22 }
 0x3af   :  { %799 = vmatpush.msra.mxu3 %v3358_v60 }
 0x3b1   :  { %800 = vmatpush.msra.mxu3 %v3360_v61 }
 0x3b3   :  { %801 = vmatpush.msra.mxu3 %v3364_v62 }
 0x3b5   :  { %802 = vmatpush.msra.mxu3 %v3371_v63 }
 0x3b6   :  { %2781 = vmatmul.msk.f32.vlgmr.msrb.gmra.mxu3 %vm100_vm0, %v471_v22 }
 0x3b7   :  { %803 = vmatpush.msra.mxu3 %v3373_v1 }
 0x3b9   :  { %804 = vmatpush.msra.mxu3 %v3377_v2 }
 0x3bb   :  { %805 = vmatpush.msra.mxu3 %v3381_v3 }
 0x3bd   :  { %806 = vmatpush.msra.mxu3 %v3388_v4 }
 0x3bf   :  { %1083 = vmatpush.msrb.mxu3 %v3358_v60 }
 0x3c1   :  { %1084 = vmatpush.msrb.mxu3 %v3360_v61 }
 0x3c3   :  { %1085 = vmatpush.msrb.mxu3 %v3364_v62 }
 0x3c5   :  { %1086 = vmatpush.msrb.mxu3 %v3371_v63 }
 0x3c7   :  { %1087 = vmatpush.msrb.mxu3 %v3373_v1 }
 0x3c9   :  { %1088 = vmatpush.msrb.mxu3 %v3377_v2 }
 0x3cb   :  { %1089 = vmatpush.msrb.mxu3 %v3381_v3 }
 0x3cd   :  { %1090 = vmatpush.msrb.mxu3 %v3388_v4 }
 0x431   :  { %v492_v27 = vpop.f32.mrf.mxu3 }
 0x432   :  { %v515_v32 = vadd.f32 %v492_v27, %v228_v26 }
 0x434   :  { %2886 = vtanh.f32 %v515_v32  ;;  %v2782_v44 = vmul.f32 -1.442695, %v515_v32 }
 0x439   :  { %v512_v35 = vpop.f32.mrf.mxu3 }
 0x43a   :  { %v2887_v36 = vpop.eup %2886  ;;  %v516_v39 = vadd.f32 %v512_v35, %v3454_v5 }
 0x43b   :  { %540 = vrot.lane.b32.xlu0 %v2887_v36, %s3183_s0 }
 0x43c   :  { %2888 = vtanh.f32 %v516_v39  ;;  %v2783_v45 = vmul.f32 -1.442695, %v516_v39 }
 0x43d   :  { %2890 = vpow2.f32 %v2782_v44 }
 0x43e   :  { %2892 = vpow2.f32 %v2783_v45 }
 0x442   :  { %v2889_v43 = vpop.eup %2888 }
 0x443   :  { %585 = vrot.lane.b32.xlu1 %v2889_v43, %s3183_s0  ;;  %v2891_v47 = vpop.eup %2890 }
 0x444   :  { %v521_v48 = vadd.f32 1.0, %v2891_v47  ;;  %v2893_v11 = vpop.eup %2892 }
 0x445   :  { %v566_v49 = vadd.f32 1.0, %v2893_v11  ;;  %v3526_v11 = vsel %vm4433_vm5, %v3457_v24, 0.0  ;;  %v3538_v24 = vsel %vm4432_vm6, %v3471_v57, 0.0 }
 0x446   :  { %2894 = vrcp.f32 %v521_v48  ;;  %v533_v9 = vand.u32 2147483648, %v521_v48  ;;  %vm527_vm10 = vweird.f32 %v521_v48  ;;  %v531_v14 = vand.u32 2147483647, %v521_v48 }
 0x447   :  { %2896 = vrcp.f32 %v566_v49  ;;  %v578_v35 = vand.u32 2147483648, %v566_v49  ;;  %vm572_vm14 = vweird.f32 %v566_v49  ;;  %v576_v36 = vand.u32 2147483647, %v566_v49 }
 0x448   :  { %v534_v21 = vor.u32 1.1754944e-38, %v533_v9  ;;  %vm532_vm12 = vcmp.eq.f32.partialorder %v531_v14, 8.507059e+37 }
 0x449   :  { %v579_v43 = vor.u32 1.1754944e-38, %v578_v35  ;;  %vm577_vm1 = vcmp.eq.f32.partialorder %v576_v36, 8.507059e+37  ;;  %v231_v35 = vadd.f32 %v3427_v13, %v3421_v6 }
 0x44c   :  { %v2895_v50 = vpop.eup %2894 }
 0x44d   :  { %v523_v51 = vmul.f32 %v2895_v50, %v521_v48  ;;  %v2897_v5 = vpop.eup %2896  ;;  %vm528_vm8 = vweird.f32 %v2895_v50  ;;  %v555_v48 = vsel %vm517_vm2, 1, %v3181_v0 }
 0x44e   :  { %v568_v55 = vmul.f32 %v2897_v5, %v566_v49  ;;  %vm529_vm11 = vmor %vm527_vm10, %vm528_vm8  ;;  %vm573_vm13 = vweird.f32 %v2897_v5 }
 0x44f   :  { %v524_v52 = vsub.f32 1.0, %v523_v51  ;;  %vm574_vm15 = vmor %vm572_vm14, %vm573_vm13  ;;  %vm665_vm14 = vcmp.gt.s32.totalorder %v3463_v25, 2 }
 0x450   :  { %v569_v8 = vsub.f32 1.0, %v568_v55 }
 0x451   :  { %v525_v54 = vmul.f32 %v2895_v50, %v524_v52 }
 0x452   :  { %v570_v53 = vmul.f32 %v2897_v5, %v569_v8 }
 0x453   :  { %v526_v59 = vadd.f32 %v2895_v50, %v525_v54 }
 0x454   :  { %v571_v32 = vadd.f32 %v2897_v5, %v570_v53 }
 0x455   :  { %v530_v16 = vsel %vm529_vm11, %v2895_v50, %v526_v59 }
 0x456   :  { %v535_v26 = vsel %vm532_vm12, %v534_v21, %v530_v16  ;;  %v575_v39 = vsel %vm574_vm15, %v2897_v5, %v571_v32  ;;  %v600_v5 = vsel %vm562_vm3, 1, %v3181_v0 }
 0x457   :  { %v580_v45 = vsel %vm577_vm1, %v579_v43, %v575_v39  ;;  %v538_v49 = vmul.f32 %v535_v26, %v3526_v11 }
 0x458   :  { %v583_v54 = vmul.f32 %v580_v45, %v3538_v24 }
 0x4ad   :  { %v541_v22 = vpop.permute.xlu0 %540 }
 0x4ae   :  { %v543_v27 = vmul.f32 %v541_v22, %v535_v26 }
 0x4b0   :  { %545 = vrot.lane.b32.xlu2 %v543_v27, %s3184_s2 }
 0x4b5   :  { %v586_v44 = vpop.permute.xlu1 %585 }
 0x4b6   :  { %v588_v47 = vmul.f32 %v586_v44, %v580_v45 }
 0x4b8   :  { %590 = vrot.lane.b32.xlu0 %v588_v47, %s3184_s2 }
 0x4c0   :  { %557 = vperm.xlu0 %2867, %v555_v48  }
 0x50a   :  { %v546_v50 = vpop.permute.xlu2 %545 }
 0x50b   :  { %v3529_v51 = vadd.f32 %v546_v50, %v538_v49 }
 0x50d   :  { %2898 = vtanh.f32 %v3529_v51 }
 0x513   :  { %v2899_v52 = vpop.eup %2898 }
 0x514   :  { %551 = vrot.lane.b32.xlu1 %v2899_v52, %s3183_s0 }
 0x51c   :  { %602 = vperm.xlu1 %2868, %v600_v5  }
 0x52a   :  { %v591_v55 = vpop.permute.xlu0 %590 }
 0x52b   :  { %v3541_v59 = vadd.f32 %v591_v55, %v583_v54 }
 0x52d   :  { %2900 = vtanh.f32 %v3541_v59 }
 0x532   :  { %v3545_v9 = vpop.permute.xlu0 %557 }
 0x533   :  { %v2901_v8 = vpop.eup %2900  ;;  %vm4434_vm4 = vcmp.eq.s32.totalorder %v3545_v9, 1 }
 0x534   :  { %596 = vrot.lane.b32.xlu2 %v2901_v8, %s3183_s0 }
 0x586   :  { %v552_v14 = vpop.permute.xlu1 %551 }
 0x587   :  { %v554_v16 = vmul.f32 %v552_v14, %v535_v26 }
 0x589   :  { %v3551_v57 = vsel %vm4434_vm4, %v554_v16, %v3480_v10 }
 0x58a   :  { %608 = vrot.lane.b32.xlu2 %v3551_v57, %s3184_s2 }
 0x58e   :  { %v3555_v53 = vpop.permute.xlu1 %602  ;;  %v597_v21 = vpop.permute.xlu2 %596 }
 0x58f   :  { %vm604_vm8 = vcmp.eq.s32.totalorder %v3555_v53, 1  ;;  %v599_v22 = vmul.f32 %v597_v21, %v580_v45 }
 0x591   :  { %v3561_v26 = vsel %vm604_vm8, %v599_v22, %v3489_v18  ;;  %v3586_v18 = vpop.f32.mrf.mxu1 }
 0x592   :  { %613 = vrot.lane.b32.xlu0 %v3561_v26, %s3183_s0 }
 0x5e4   :  { %v609_v27 = vpop.permute.xlu2 %608 }
 0x5e5   :  { %611 = vst.msk [vmem:[#allocation3 + $0x8] sm:$0xff] %vm182_vm9, %v609_v27 }
 0x604   :  { %v614_v10 = vpop.permute.xlu0 %613 }
 0x605   :  { %616 = vst.msk [vmem:[#allocation3 + $0x30] sm:$0xff] %vm467_vm7, %v614_v10  ;;  %v619_v32 = vsel %vm182_vm9, %v609_v27, %v614_v10 }
 0x606   :  { %2784 = vmatmul.msk.f32.vlgmr.msrb.gmra.mxu1 %vm100_vm0, %v619_v32  ;;  %2785 = vmatmul.msk.f32.vlgmr.msra.gmra.mxu2 %vm100_vm0, %v619_v32 }
 0x607   :  { %1199 = vmatpush.msrb.mxu1 %v3279_v29  ;;  %1219 = vmatpush.msra.mxu2 %v3358_v60 }
 0x609   :  { %1200 = vmatpush.msrb.mxu1 %v3281_v30  ;;  %1220 = vmatpush.msra.mxu2 %v3360_v61 }
 0x60b   :  { %1201 = vmatpush.msrb.mxu1 %v3286_v31  ;;  %1221 = vmatpush.msra.mxu2 %v3364_v62 }
 0x60d   :  { %1202 = vmatpush.msrb.mxu1 %v3289_v34  ;;  %1222 = vmatpush.msra.mxu2 %v3371_v63 }
 0x60f   :  { %1203 = vmatpush.msrb.mxu1 %v3294_v37  ;;  %1223 = vmatpush.msra.mxu2 %v3373_v1 }
 0x611   :  { %1204 = vmatpush.msrb.mxu1 %v3299_v38  ;;  %1224 = vmatpush.msra.mxu2 %v3377_v2 }
 0x613   :  { %1205 = vmatpush.msrb.mxu1 %v3303_v40  ;;  %1225 = vmatpush.msra.mxu2 %v3381_v3 }
 0x615   :  { %1206 = vmatpush.msrb.mxu1 %v3308_v41  ;;  %1226 = vmatpush.msra.mxu2 %v3388_v4 }
 0x683   :  { %v640_v36 = vpop.f32.mrf.mxu1 }
 0x684   :  { %v663_v39 = vadd.f32 %v640_v36, %v231_v35 }
 0x686   :  { %2902 = vtanh.f32 %v663_v39  ;;  %v2786_v52 = vmul.f32 -1.442695, %v663_v39 }
 0x689   :  { %v660_v43 = vpop.f32.mrf.mxu2 }
 0x68a   :  { %v664_v44 = vadd.f32 %v660_v43, %v3452_v58 }
 0x68c   :  { %v2903_v45 = vpop.eup %2902  ;;  %2904 = vtanh.f32 %v664_v44  ;;  %v2787_v48 = vmul.f32 -1.442695, %v664_v44 }
 0x68d   :  { %688 = vrot.lane.b32.xlu1 %v2903_v45, %s3183_s0  ;;  %v703_v45 = vsel %vm665_vm14, 1, %v3181_v0 }
 0x68e   :  { %2906 = vpow2.f32 %v2787_v48 }
 0x692   :  { %v2905_v47 = vpop.eup %2904 }
 0x693   :  { %733 = vrot.lane.b32.xlu2 %v2905_v47, %s3183_s0 }
 0x694   :  { %v2907_v49 = vpop.eup %2906 }
 0x695   :  { %v714_v50 = vadd.f32 1.0, %v2907_v49 }
 0x697   :  { %2908 = vrcp.f32 %v714_v50  ;;  %v726_v16 = vand.u32 2147483648, %v714_v50  ;;  %vm720_vm11 = vweird.f32 %v714_v50  ;;  %v724_v21 = vand.u32 2147483647, %v714_v50 }
 0x698   :  { %2910 = vpow2.f32 %v2786_v52 }
 0x699   :  { %v727_v10 = vor.u32 1.1754944e-38, %v726_v16  ;;  %vm725_vm13 = vcmp.eq.f32.partialorder %v724_v21, 8.507059e+37  ;;  %v3612_v21 = vsel %vm4434_vm4, %v3529_v51, %v3526_v11 }
 0x69d   :  { %v2909_v13 = vpop.eup %2908 }
 0x69e   :  { %v716_v5 = vmul.f32 %v2909_v13, %v714_v50  ;;  %v2911_v54 = vpop.eup %2910  ;;  %vm721_vm10 = vweird.f32 %v2909_v13 }
 0x69f   :  { %v669_v8 = vadd.f32 1.0, %v2911_v54  ;;  %vm722_vm12 = vmor %vm720_vm11, %vm721_vm10  ;;  %vm710_vm10 = vcmp.gt.s32.totalorder %v3463_v25, 5 }
 0x6a0   :  { %v717_v55 = vsub.f32 1.0, %v716_v5 }
 0x6a1   :  { %2912 = vrcp.f32 %v669_v8  ;;  %v681_v48 = vand.u32 2147483648, %v669_v8  ;;  %vm675_vm1 = vweird.f32 %v669_v8  ;;  %v679_v49 = vand.u32 2147483647, %v669_v8 }
 0x6a2   :  { %v718_v58 = vmul.f32 %v2909_v13, %v717_v55  ;;  %v3601_v55 = vsel %vm604_vm8, %v3541_v59, %v3538_v24 }
 0x6a3   :  { %v682_v52 = vor.u32 1.1754944e-38, %v681_v48  ;;  %vm680_vm3 = vcmp.eq.f32.partialorder %v679_v49, 8.507059e+37 }
 0x6a4   :  { %v719_v14 = vadd.f32 %v2909_v13, %v718_v58 }
 0x6a6   :  { %v723_v27 = vsel %vm722_vm12, %v2909_v13, %v719_v14 }
 0x6a7   :  { %v2913_v22 = vpop.eup %2912  ;;  %v728_v36 = vsel %vm725_vm13, %v727_v10, %v723_v27  ;;  %v748_v10 = vsel %vm710_vm10, 1, %v3181_v0 }
 0x6a8   :  { %v671_v32 = vmul.f32 %v2913_v22, %v669_v8  ;;  %vm676_vm15 = vweird.f32 %v2913_v22  ;;  %v731_v58 = vmul.f32 %v728_v36, %v3601_v55 }
 0x6a9   :  { %vm677_vm2 = vmor %vm675_vm1, %vm676_vm15 }
 0x6aa   :  { %v672_v43 = vsub.f32 1.0, %v671_v32 }
 0x6ac   :  { %v673_v44 = vmul.f32 %v2913_v22, %v672_v43 }
 0x6ae   :  { %v674_v47 = vadd.f32 %v2913_v22, %v673_v44 }
 0x6b0   :  { %v678_v50 = vsel %vm677_vm2, %v2913_v22, %v674_v47 }
 0x6b1   :  { %v683_v5 = vsel %vm680_vm3, %v682_v52, %v678_v50 }
 0x6b2   :  { %v686_v22 = vmul.f32 %v683_v5, %v3612_v21 }
 0x6ed   :  { %v734_v35 = vpop.permute.xlu2 %733 }
 0x6ee   :  { %v736_v39 = vmul.f32 %v734_v35, %v728_v36 }
 0x6f0   :  { %738 = vrot.lane.b32.xlu1 %v736_v39, %s3184_s2 }
 0x6f8   :  { %705 = vperm.xlu1 %2868, %v703_v45  }
 0x6ff   :  { %v689_v13 = vpop.permute.xlu1 %688 }
 0x700   :  { %v691_v54 = vmul.f32 %v689_v13, %v683_v5 }
 0x702   :  { %693 = vrot.lane.b32.xlu0 %v691_v54, %s3184_s2 }
 0x762   :  { %v739_v14 = vpop.permute.xlu1 %738 }
 0x763   :  { %v3604_v16 = vadd.f32 %v739_v14, %v731_v58 }
 0x765   :  { %2914 = vtanh.f32 %v3604_v16 }
 0x76a   :  { %v3621_v32 = vpop.permute.xlu1 %705 }
 0x76b   :  { %v2915_v8 = vpop.eup %2914  ;;  %vm707_vm11 = vcmp.eq.s32.totalorder %v3621_v32, 1 }
 0x76c   :  { %744 = vrot.lane.b32.xlu0 %v2915_v8, %s3183_s0 }
 0x774   :  { %v694_v24 = vpop.permute.xlu0 %693 }
 0x775   :  { %v3615_v59 = vadd.f32 %v694_v24, %v686_v22 }
 0x777   :  { %2916 = vtanh.f32 %v3615_v59 }
 0x77d   :  { %v2917_v27 = vpop.eup %2916 }
 0x77e   :  { %699 = vrot.lane.b32.xlu2 %v2917_v27, %s3183_s0 }
 0x786   :  { %750 = vperm.xlu2 %2869, %v748_v10  }
 0x7d8   :  { %v700_v35 = vpop.permute.xlu2 %699 }
 0x7d9   :  { %v702_v11 = vmul.f32 %v700_v35, %v683_v5 }
 0x7db   :  { %v3627_v51 = vsel %vm707_vm11, %v702_v11, %v3551_v57 }
 0x7dc   :  { %756 = vrot.lane.b32.xlu0 %v3627_v51, %s3184_s2 }
 0x7de   :  { %v745_v39 = vpop.permute.xlu0 %744 }
 0x7df   :  { %v747_v43 = vmul.f32 %v745_v39, %v728_v36 }
 0x7e0   :  { %v3631_v44 = vpop.permute.xlu2 %750 }
 0x7e1   :  { %vm752_vm12 = vcmp.eq.s32.totalorder %v3631_v44, 1 }
 0x7e2   :  { %v3637_v45 = vsel %vm752_vm12, %v747_v43, %v3561_v26 }
 0x7e3   :  { %761 = vrot.lane.b32.xlu1 %v3637_v45, %s3183_s0 }
 0x84e   :  { %v757_v47 = vpop.permute.xlu0 %756 }
 0x84f   :  { %759 = vst.msk [vmem:[#allocation3 + $0x10] sm:$0xff] %vm182_vm9, %v757_v47 }
 0x855   :  { %v762_v57 = vpop.permute.xlu1 %761 }
 0x856   :  { %764 = vst.msk [vmem:[#allocation3 + $0x28] sm:$0xff] %vm467_vm7, %v762_v57  ;;  %v767_v36 = vsel %vm182_vm9, %v757_v47, %v762_v57  ;;  %v3674_v47 = vsel %vm707_vm11, %v3615_v59, %v3612_v21 }
 0x857   :  { %2788 = vmatmul.msk.f32.vlgmr.msrb.gmra.mxu0 %vm100_vm0, %v767_v36  ;;  %2789 = vmatmul.msk.f32.vlgmr.msra.gmra.mxu3 %vm100_vm0, %v767_v36 }
 0x858   :  { %1335 = vmatpush.msrb.mxu0 %v3279_v29  ;;  %1355 = vmatpush.msra.mxu3 %v3358_v60 }
 0x85a   :  { %1336 = vmatpush.msrb.mxu0 %v3281_v30  ;;  %1356 = vmatpush.msra.mxu3 %v3360_v61 }
 0x85c   :  { %1337 = vmatpush.msrb.mxu0 %v3286_v31  ;;  %1357 = vmatpush.msra.mxu3 %v3364_v62 }
 0x85e   :  { %1338 = vmatpush.msrb.mxu0 %v3289_v34  ;;  %1358 = vmatpush.msra.mxu3 %v3371_v63 }
 0x860   :  { %1339 = vmatpush.msrb.mxu0 %v3294_v37  ;;  %1359 = vmatpush.msra.mxu3 %v3373_v1 }
 0x862   :  { %1340 = vmatpush.msrb.mxu0 %v3299_v38  ;;  %1360 = vmatpush.msra.mxu3 %v3377_v2 }
 0x864   :  { %1341 = vmatpush.msrb.mxu0 %v3303_v40  ;;  %1361 = vmatpush.msra.mxu3 %v3381_v3 }
 0x866   :  { %1342 = vmatpush.msrb.mxu0 %v3308_v41  ;;  %1362 = vmatpush.msra.mxu3 %v3388_v4 }
 0x8d4   :  { %v788_v29 = vpop.f32.mrf.mxu0 }
 0x8d5   :  { %v811_v30 = vadd.f32 %v788_v29, %v3430_v15 }
 0x8d7   :  { %2918 = vtanh.f32 %v811_v30  ;;  %v2790_v40 = vmul.f32 -1.442695, %v811_v30  ;;  %v3684_v30 = vsel %vm752_vm12, %v3604_v16, %v3601_v55 }
 0x8da   :  { %v808_v31 = vpop.f32.mrf.mxu3 }
 0x8db   :  { %v812_v34 = vadd.f32 %v808_v31, %v3449_v56 }
 0x8dd   :  { %v2919_v37 = vpop.eup %2918  ;;  %2920 = vtanh.f32 %v812_v34  ;;  %v2791_v63 = vmul.f32 -1.442695, %v812_v34 }
 0x8de   :  { %836 = vrot.lane.b32.xlu2 %v2919_v37, %s3183_s0  ;;  %2922 = vpow2.f32 %v2790_v40 }
 0x8e3   :  { %v2921_v38 = vpop.eup %2920 }
 0x8e4   :  { %881 = vrot.lane.b32.xlu0 %v2921_v38, %s3183_s0  ;;  %v2923_v60 = vpop.eup %2922 }
 0x8e5   :  { %v817_v41 = vadd.f32 1.0, %v2923_v60 }
 0x8e7   :  { %2924 = vrcp.f32 %v817_v41  ;;  %v829_v4 = vand.u32 2147483648, %v817_v41  ;;  %vm823_vm14 = vweird.f32 %v817_v41  ;;  %v827_v56 = vand.u32 2147483647, %v817_v41 }
 0x8e8   :  { %2926 = vpow2.f32 %v2791_v63 }
 0x8e9   :  { %v830_v49 = vor.u32 1.1754944e-38, %v829_v4  ;;  %vm828_vm1 = vcmp.eq.f32.partialorder %v827_v56, 8.507059e+37 }
 0x8ed   :  { %v2925_v61 = vpop.eup %2924 }
 0x8ee   :  { %v819_v62 = vmul.f32 %v2925_v61, %v817_v41  ;;  %vm824_vm13 = vweird.f32 %v2925_v61  ;;  %v2927_v15 = vpop.eup %2926 }
 0x8ef   :  { %vm825_vm15 = vmor %vm823_vm14, %vm824_vm13  ;;  %v862_v48 = vadd.f32 1.0, %v2927_v15  ;;  %vm813_vm14 = vcmp.gt.s32.totalorder %v3463_v25, 3 }
 0x8f0   :  { %v820_v1 = vsub.f32 1.0, %v819_v62  ;;  %v851_v43 = vsel %vm813_vm14, 1, %v3181_v0 }
 0x8f1   :  { %2928 = vrcp.f32 %v862_v48  ;;  %v874_v22 = vand.u32 2147483648, %v862_v48  ;;  %vm868_vm3 = vweird.f32 %v862_v48  ;;  %v872_v24 = vand.u32 2147483647, %v862_v48 }
 0x8f2   :  { %v821_v2 = vmul.f32 %v2925_v61, %v820_v1 }
 0x8f3   :  { %v875_v10 = vor.u32 1.1754944e-38, %v874_v22  ;;  %vm873_vm13 = vcmp.eq.f32.partialorder %v872_v24, 8.507059e+37 }
 0x8f4   :  { %v822_v3 = vadd.f32 %v2925_v61, %v821_v2 }
 0x8f6   :  { %v826_v26 = vsel %vm825_vm15, %v2925_v61, %v822_v3  ;;  %vm858_vm15 = vcmp.gt.s32.totalorder %v3463_v25, 4 }
 0x8f7   :  { %v831_v52 = vsel %vm828_vm1, %v830_v49, %v826_v26  ;;  %v2929_v5 = vpop.eup %2928  ;;  %v896_v38 = vsel %vm858_vm15, 1, %v3181_v0 }
 0x8f8   :  { %v864_v54 = vmul.f32 %v2929_v5, %v862_v48  ;;  %vm869_vm2 = vweird.f32 %v2929_v5  ;;  %v834_v57 = vmul.f32 %v831_v52, %v3674_v47 }
 0x8f9   :  { %vm870_vm10 = vmor %vm868_vm3, %vm869_vm2 }
 0x8fa   :  { %v865_v58 = vsub.f32 1.0, %v864_v54 }
 0x8fc   :  { %v866_v14 = vmul.f32 %v2929_v5, %v865_v58 }
 0x8fe   :  { %v867_v8 = vadd.f32 %v2929_v5, %v866_v14 }
 0x900   :  { %v871_v27 = vsel %vm870_vm10, %v2929_v5, %v867_v8 }
 0x901   :  { %v876_v11 = vsel %vm873_vm13, %v875_v10, %v871_v27 }
 0x902   :  { %v879_v31 = vmul.f32 %v876_v11, %v3684_v30 }
 0x938   :  { %v837_v50 = vpop.permute.xlu2 %836 }
 0x939   :  { %v839_v13 = vmul.f32 %v837_v50, %v831_v52 }
 0x93b   :  { %841 = vrot.lane.b32.xlu1 %v839_v13, %s3184_s2 }
 0x956   :  { %v882_v35 = vpop.permute.xlu0 %881 }
 0x957   :  { %v884_v39 = vmul.f32 %v882_v35, %v876_v11 }
 0x959   :  { %886 = vrot.lane.b32.xlu2 %v884_v39, %s3184_s2 }
 0x961   :  { %853 = vperm.xlu2 %2869, %v851_v43  }
 0x9ad   :  { %v842_v36 = vpop.permute.xlu1 %841 }
 0x9ae   :  { %v3677_v29 = vadd.f32 %v842_v36, %v834_v57 }
 0x9b0   :  { %2930 = vtanh.f32 %v3677_v29 }
 0x9b3   :  { %v887_v34 = vpop.permute.xlu2 %886 }
 0x9b4   :  { %v3687_v37 = vadd.f32 %v887_v34, %v879_v31 }
 0x9b6   :  { %v2931_v21 = vpop.eup %2930  ;;  %2932 = vtanh.f32 %v3687_v37 }
 0x9b7   :  { %847 = vrot.lane.b32.xlu0 %v2931_v21, %s3183_s0 }
 0x9bb   :  { %v3694_v55 = vpop.permute.xlu2 %853 }
 0x9bc   :  { %v2933_v59 = vpop.eup %2932  ;;  %vm855_vm1 = vcmp.eq.s32.totalorder %v3694_v55, 1 }
 0x9bd   :  { %892 = vrot.lane.b32.xlu1 %v2933_v59, %s3183_s0 }
 0x9bf   :  { %898 = vperm.xlu0 %2867, %v896_v38  }
 0xa29   :  { %v848_v16 = vpop.permute.xlu0 %847 }
 0xa2a   :  { %v850_v40 = vmul.f32 %v848_v16, %v831_v52 }
 0xa2c   :  { %v3700_v60 = vsel %vm855_vm1, %v850_v40, %v3627_v51  ;;  %v3729_v40 = vsel %vm855_vm1, %v3677_v29, %v3674_v47 }
 0xa2d   :  { %904 = vrot.lane.b32.xlu1 %v3700_v60, %s3184_s2 }
 0xa2f   :  { %v893_v25 = vpop.permute.xlu1 %892 }
 0xa30   :  { %v895_v41 = vmul.f32 %v893_v25, %v876_v11 }
 0xa31   :  { %v3704_v0 = vpop.permute.xlu0 %898 }
 0xa32   :  { %vm900_vm2 = vcmp.eq.s32.totalorder %v3704_v0, 1 }
 0xa33   :  { %v3710_v61 = vsel %vm900_vm2, %v895_v41, %v3637_v45 }
 0xa34   :  { %909 = vrot.lane.b32.xlu2 %v3710_v61, %s3183_s0 }
 0xa8e   :  { %v910_v62 = vpop.permute.xlu2 %909 }
 0xa8f   :  { %912 = vst.msk [vmem:[#allocation3 + $0x20] sm:$0xff] %vm467_vm7, %v910_v62 }
 0xa9f   :  { %v905_v51 = vpop.permute.xlu1 %904 }
 0xaa0   :  { %907 = vst.msk [vmem:[#allocation3 + $0x18] sm:$0xff] %vm182_vm9, %v905_v51  ;;  %v915_v63 = vsel %vm182_vm9, %v905_v51, %v910_v62 }
 0xaa1   :  { %2792 = vmatmul.msk.f32.vlgmr.msra.gmra.mxu1 %vm100_vm0, %v915_v63  ;;  %2793 = vmatmul.msk.f32.vlgmr.msrb.gmra.mxu2 %vm100_vm0, %v915_v63  ;;  %v3740_v63 = vsel %vm900_vm2, %v3687_v37, %v3684_v30 }
 0xb1e   :  { %v936_v1 = vpop.f32.mrf.mxu1 }
 0xb1f   :  { %v959_v2 = vadd.f32 %v936_v1, %v3433_v17 }
 0xb21   :  { %2934 = vtanh.f32 %v959_v2  ;;  %v2794_v56 = vmul.f32 -1.442695, %v959_v2 }
 0xb24   :  { %v956_v45 = vpop.f32.mrf.mxu2 }
 0xb25   :  { %v960_v3 = vadd.f32 %v956_v45, %v3447_v46 }
 0xb27   :  { %v2935_v4 = vpop.eup %2934  ;;  %2936 = vtanh.f32 %v960_v3  ;;  %v2795_v26 = vmul.f32 -1.442695, %v960_v3 }
 0xb28   :  { %983 = vrot.lane.b32.xlu0 %v2935_v4, %s3183_s0  ;;  %2938 = vpow2.f32 %v2794_v56 }
 0xb29   :  { %2940 = vpow2.f32 %v2795_v26 }
 0xb2d   :  { %v2937_v15 = vpop.eup %2936 }
 0xb2e   :  { %1022 = vrot.lane.b32.xlu1 %v2937_v15, %s3183_s0  ;;  %v2939_v48 = vpop.eup %2938 }
 0xb2f   :  { %v964_v49 = vadd.f32 1.0, %v2939_v48  ;;  %v2941_v50 = vpop.eup %2940 }
 0xb30   :  { %v1003_v17 = vadd.f32 1.0, %v2941_v50 }
 0xb31   :  { %2942 = vrcp.f32 %v964_v49  ;;  %v976_v22 = vand.u32 2147483648, %v964_v49  ;;  %vm970_vm10 = vweird.f32 %v964_v49  ;;  %v974_v24 = vand.u32 2147483647, %v964_v49 }
 0xb32   :  { %2944 = vrcp.f32 %v1003_v17  ;;  %v1015_v57 = vand.u32 2147483648, %v1003_v17  ;;  %vm1009_vm6 = vweird.f32 %v1003_v17  ;;  %v1013_v31 = vand.u32 2147483647, %v1003_v17 }
 0xb33   :  { %v977_v35 = vor.u32 1.1754944e-38, %v976_v22  ;;  %vm975_vm14 = vcmp.eq.f32.partialorder %v974_v24, 8.507059e+37 }
 0xb34   :  { %v1016_v21 = vor.u32 1.1754944e-38, %v1015_v57  ;;  %vm1014_vm4 = vcmp.eq.f32.partialorder %v1013_v31, 8.507059e+37 }
 0xb37   :  { %v2943_v52 = vpop.eup %2942 }
 0xb38   :  { %v966_v13 = vmul.f32 %v2943_v52, %v964_v49  ;;  %v2945_v46 = vpop.eup %2944  ;;  %vm971_vm3 = vweird.f32 %v2943_v52 }
 0xb39   :  { %v1005_v54 = vmul.f32 %v2945_v46, %v1003_v17  ;;  %vm972_vm13 = vmor %vm970_vm10, %vm971_vm3  ;;  %vm1010_vm15 = vweird.f32 %v2945_v46 }
 0xb3a   :  { %v967_v5 = vsub.f32 1.0, %v966_v13  ;;  %vm1011_vm5 = vmor %vm1009_vm6, %vm1010_vm15 }
 0xb3b   :  { %v1006_v14 = vsub.f32 1.0, %v1005_v54 }
 0xb3c   :  { %v968_v58 = vmul.f32 %v2943_v52, %v967_v5 }
 0xb3d   :  { %v1007_v27 = vmul.f32 %v2945_v46, %v1006_v14 }
 0xb3e   :  { %v969_v8 = vadd.f32 %v2943_v52, %v968_v58 }
 0xb3f   :  { %v1008_v11 = vadd.f32 %v2945_v46, %v1007_v27 }
 0xb40   :  { %v973_v10 = vsel %vm972_vm13, %v2943_v52, %v969_v8 }
 0xb41   :  { %v978_v43 = vsel %vm975_vm14, %v977_v35, %v973_v10  ;;  %v1012_v34 = vsel %vm1011_vm5, %v2945_v46, %v1008_v11 }
 0xb42   :  { %v1017_v38 = vsel %vm1014_vm4, %v1016_v21, %v1012_v34  ;;  %v981_v25 = vmul.f32 %v978_v43, %v3729_v40 }
 0xb43   :  { %v1020_v1 = vmul.f32 %v1017_v38, %v3740_v63 }
 0xb9a   :  { %v984_v39 = vpop.permute.xlu0 %983 }
 0xb9b   :  { %v986_v36 = vmul.f32 %v984_v39, %v978_v43 }
 0xb9d   :  { %988 = vrot.lane.b32.xlu2 %v986_v36, %s3184_s2 }
 0xba0   :  { %v1023_v59 = vpop.permute.xlu1 %1022 }
 0xba1   :  { %v1025_v16 = vmul.f32 %v1023_v59, %v1017_v38 }
 0xba3   :  { %1027 = vrot.lane.b32.xlu0 %v1025_v16, %s3184_s2 }
 0xbf7   :  { %v989_v41 = vpop.permute.xlu2 %988 }
 0xbf8   :  { %v3732_v62 = vadd.f32 %v989_v41, %v981_v25 }
 0xbfa   :  { %2946 = vtanh.f32 %v3732_v62 }
 0xc00   :  { %v2947_v51 = vpop.eup %2946 }
 0xc01   :  { %994 = vrot.lane.b32.xlu1 %v2947_v51, %s3183_s0 }
 0xc15   :  { %v1028_v47 = vpop.permute.xlu0 %1027 }
 0xc16   :  { %v3743_v29 = vadd.f32 %v1028_v47, %v1020_v1 }
 0xc18   :  { %2948 = vtanh.f32 %v3743_v29 }
 0xc1e   :  { %v2949_v2 = vpop.eup %2948 }
 0xc1f   :  { %1033 = vrot.lane.b32.xlu2 %v2949_v2, %s3183_s0  ;;  %v3776_v2 = vsel %vm900_vm2, %v3732_v62, %v3729_v40 }
 0xc73   :  { %v995_v45 = vpop.permute.xlu1 %994 }
 0xc74   :  { %v997_v3 = vmul.f32 %v995_v45, %v978_v43 }
 0xc76   :  { %v3750_v4 = vsel %vm900_vm2, %v997_v3, %v3700_v60 }
 0xc77   :  { %1040 = vrot.lane.b32.xlu0 %v3750_v4, %s3184_s2 }
 0xc79   :  { %v1034_v30 = vpop.permute.xlu2 %1033 }
 0xc7a   :  { %v1036_v37 = vmul.f32 %v1034_v30, %v1017_v38 }
 0xc7c   :  { %v3757_v15 = vsel %vm855_vm1, %v1036_v37, %v3710_v61  ;;  %v3786_v37 = vsel %vm855_vm1, %v3743_v29, %v3740_v63 }
 0xc7d   :  { %1045 = vrot.lane.b32.xlu1 %v3757_v15, %s3183_s0 }
 0xce9   :  { %v1041_v56 = vpop.permute.xlu0 %1040 }
 0xcea   :  { %1043 = vst.msk [vmem:[#allocation3 + $0x20] sm:$0xff] %vm182_vm9, %v1041_v56 }
 0xcef   :  { %v1046_v26 = vpop.permute.xlu1 %1045 }
 0xcf0   :  { %1048 = vst.msk [vmem:[#allocation3 + $0x18] sm:$0xff] %vm467_vm7, %v1046_v26  ;;  %v1051_v60 = vsel %vm182_vm9, %v1041_v56, %v1046_v26 }
 0xcf1   :  { %2796 = vmatmul.msk.f32.vlgmr.msra.gmra.mxu0 %vm100_vm0, %v1051_v60  ;;  %2797 = vmatmul.msk.f32.vlgmr.msrb.gmra.mxu3 %vm100_vm0, %v1051_v60 }
 0xd6e   :  { %v1072_v48 = vpop.f32.mrf.mxu0 }
 0xd6f   :  { %v1095_v49 = vadd.f32 %v1072_v48, %v3436_v19 }
 0xd71   :  { %2950 = vtanh.f32 %v1095_v49  ;;  %v2798_v13 = vmul.f32 -1.442695, %v1095_v49 }
 0xd74   :  { %v1092_v61 = vpop.f32.mrf.mxu3 }
 0xd75   :  { %v1096_v50 = vadd.f32 %v1092_v61, %v3445_v42 }
 0xd77   :  { %v2951_v17 = vpop.eup %2950  ;;  %2952 = vtanh.f32 %v1096_v50  ;;  %v2799_v14 = vmul.f32 -1.442695, %v1096_v50 }
 0xd78   :  { %1119 = vrot.lane.b32.xlu2 %v2951_v17, %s3183_s0  ;;  %2954 = vpow2.f32 %v2798_v13  ;;  %v243_v13 = vadd.f32 %v3586_v18, %v3421_v6 }
 0xd7d   :  { %v2953_v52 = vpop.eup %2952 }
 0xd7e   :  { %1158 = vrot.lane.b32.xlu0 %v2953_v52, %s3183_s0  ;;  %v2955_v46 = vpop.eup %2954 }
 0xd7f   :  { %v1100_v5 = vadd.f32 1.0, %v2955_v46 }
 0xd81   :  { %2956 = vrcp.f32 %v1100_v5  ;;  %v1112_v42 = vand.u32 2147483648, %v1100_v5  ;;  %vm1106_vm6 = vweird.f32 %v1100_v5  ;;  %v1110_v27 = vand.u32 2147483647, %v1100_v5 }
 0xd82   :  { %2958 = vpow2.f32 %v2799_v14 }
 0xd83   :  { %v1113_v11 = vor.u32 1.1754944e-38, %v1112_v42  ;;  %vm1111_vm3 = vcmp.eq.f32.partialorder %v1110_v27, 8.507059e+37 }
 0xd87   :  { %v2957_v54 = vpop.eup %2956 }
 0xd88   :  { %v1102_v58 = vmul.f32 %v2957_v54, %v1100_v5  ;;  %vm1107_vm5 = vweird.f32 %v2957_v54  ;;  %v2959_v24 = vpop.eup %2958 }
 0xd89   :  { %vm1108_vm4 = vmor %vm1106_vm6, %vm1107_vm5  ;;  %v1139_v35 = vadd.f32 1.0, %v2959_v24 }
 0xd8a   :  { %v1103_v19 = vsub.f32 1.0, %v1102_v58 }
 0xd8b   :  { %2960 = vrcp.f32 %v1139_v35  ;;  %v1151_v38 = vand.u32 2147483648, %v1139_v35  ;;  %vm1145_vm13 = vweird.f32 %v1139_v35  ;;  %v1149_v16 = vand.u32 2147483647, %v1139_v35 }
 0xd8c   :  { %v1104_v8 = vmul.f32 %v2957_v54, %v1103_v19 }
 0xd8d   :  { %v1152_v41 = vor.u32 1.1754944e-38, %v1151_v38  ;;  %vm1150_vm15 = vcmp.eq.f32.partialorder %v1149_v16, 8.507059e+37 }
 0xd8e   :  { %v1105_v22 = vadd.f32 %v2957_v54, %v1104_v8 }
 0xd90   :  { %v1109_v10 = vsel %vm1108_vm4, %v2957_v54, %v1105_v22 }
 0xd91   :  { %v1114_v43 = vsel %vm1111_vm3, %v1113_v11, %v1109_v10  ;;  %v2961_v36 = vpop.eup %2960 }
 0xd92   :  { %v1141_v31 = vmul.f32 %v2961_v36, %v1139_v35  ;;  %vm1146_vm10 = vweird.f32 %v2961_v36  ;;  %v1117_v45 = vmul.f32 %v1114_v43, %v3776_v2 }
 0xd93   :  { %vm1147_vm14 = vmor %vm1145_vm13, %vm1146_vm10 }
 0xd94   :  { %v1142_v34 = vsub.f32 1.0, %v1141_v31 }
 0xd96   :  { %v1143_v21 = vmul.f32 %v2961_v36, %v1142_v34 }
 0xd98   :  { %v1144_v59 = vadd.f32 %v2961_v36, %v1143_v21 }
 0xd9a   :  { %v1148_v25 = vsel %vm1147_vm14, %v2961_v36, %v1144_v59 }
 0xd9b   :  { %v1153_v1 = vsel %vm1150_vm15, %v1152_v41, %v1148_v25 }
 0xd9c   :  { %v1156_v56 = vmul.f32 %v1153_v1, %v3786_v37 }
 0xdd2   :  { %v1120_v39 = vpop.permute.xlu2 %1119 }
 0xdd3   :  { %v1122_v57 = vmul.f32 %v1120_v39, %v1114_v43 }
 0xdd5   :  { %1124 = vrot.lane.b32.xlu1 %v1122_v57, %s3184_s2 }
 0xdf0   :  { %v1159_v51 = vpop.permute.xlu0 %1158 }
 0xdf1   :  { %v1161_v47 = vmul.f32 %v1159_v51, %v1153_v1 }
 0xdf3   :  { %1163 = vrot.lane.b32.xlu2 %v1161_v47, %s3184_s2 }
 0xe47   :  { %v1125_v3 = vpop.permute.xlu1 %1124 }
 0xe48   :  { %v3779_v30 = vadd.f32 %v1125_v3, %v1117_v45 }
 0xe4a   :  { %2962 = vtanh.f32 %v3779_v30 }
 0xe4d   :  { %v1164_v26 = vpop.permute.xlu2 %1163 }
 0xe4e   :  { %v3789_v60 = vadd.f32 %v1164_v26, %v1156_v56 }
 0xe50   :  { %v2963_v40 = vpop.eup %2962  ;;  %2964 = vtanh.f32 %v3789_v60  ;;  %v3824_v26 = vsel %vm707_vm11, %v3789_v60, %v3786_v37 }
 0xe51   :  { %1130 = vrot.lane.b32.xlu0 %v2963_v40, %s3183_s0 }
 0xe56   :  { %v2965_v62 = vpop.eup %2964 }
 0xe57   :  { %1169 = vrot.lane.b32.xlu1 %v2965_v62, %s3183_s0 }
 0xec3   :  { %v1131_v48 = vpop.permute.xlu0 %1130 }
 0xec4   :  { %v1133_v49 = vmul.f32 %v1131_v48, %v1114_v43 }
 0xec6   :  { %v3797_v63 = vsel %vm752_vm12, %v1133_v49, %v3750_v4 }
 0xec7   :  { %1176 = vrot.lane.b32.xlu2 %v3797_v63, %s3184_s2 }
 0xec9   :  { %v1170_v29 = vpop.permute.xlu1 %1169 }
 0xeca   :  { %v1172_v61 = vmul.f32 %v1170_v29, %v1153_v1  ;;  %v3835_v29 = vsel %vm752_vm12, %v3779_v30, %v3776_v2 }
 0xecc   :  { %v3804_v50 = vsel %vm707_vm11, %v1172_v61, %v3757_v15 }
 0xecd   :  { %1181 = vrot.lane.b32.xlu0 %v3804_v50, %s3183_s0 }
 0xf21   :  { %v1177_v17 = vpop.permute.xlu2 %1176 }
 0xf22   :  { %1179 = vst.msk [vmem:[#allocation3 + $0x28] sm:$0xff] %vm182_vm9, %v1177_v17 }
 0xf3f   :  { %v1182_v52 = vpop.permute.xlu0 %1181 }
 0xf40   :  { %1184 = vst.msk [vmem:[#allocation3 + $0x10] sm:$0xff] %vm467_vm7, %v1182_v52  ;;  %v1187_v4 = vsel %vm182_vm9, %v1177_v17, %v1182_v52 }
 0xf41   :  { %2800 = vmatmul.msk.f32.vlgmr.msrb.gmra.mxu1 %vm100_vm0, %v1187_v4  ;;  %2801 = vmatmul.msk.f32.vlgmr.msra.gmra.mxu2 %vm100_vm0, %v1187_v4 }
 0xfbe   :  { %v1208_v15 = vpop.f32.mrf.mxu1 }
 0xfbf   :  { %v1231_v46 = vadd.f32 %v1208_v15, %v243_v13 }
 0xfc1   :  { %2966 = vtanh.f32 %v1231_v46  ;;  %v2802_v42 = vmul.f32 -1.442695, %v1231_v46 }
 0xfc4   :  { %v1228_v5 = vpop.f32.mrf.mxu2 }
 0xfc5   :  { %v1232_v54 = vadd.f32 %v1228_v5, %v3443_v33 }
 0xfc7   :  { %v2967_v58 = vpop.eup %2966  ;;  %2968 = vtanh.f32 %v1232_v54  ;;  %v2803_v19 = vmul.f32 -1.442695, %v1232_v54 }
 0xfc8   :  { %1255 = vrot.lane.b32.xlu1 %v2967_v58, %s3183_s0 }
 0xfc9   :  { %2970 = vpow2.f32 %v2803_v19 }
 0xfcd   :  { %v2969_v14 = vpop.eup %2968 }
 0xfce   :  { %1294 = vrot.lane.b32.xlu2 %v2969_v14, %s3183_s0 }
 0xfcf   :  { %v2971_v8 = vpop.eup %2970 }
 0xfd0   :  { %v1275_v22 = vadd.f32 1.0, %v2971_v8 }
 0xfd2   :  { %2972 = vrcp.f32 %v1275_v22  ;;  %v1287_v11 = vand.u32 2147483648, %v1275_v22  ;;  %vm1281_vm6 = vweird.f32 %v1275_v22  ;;  %v1285_v39 = vand.u32 2147483647, %v1275_v22 }
 0xfd3   :  { %2974 = vpow2.f32 %v2802_v42 }
 0xfd4   :  { %v1288_v36 = vor.u32 1.1754944e-38, %v1287_v11  ;;  %vm1286_vm3 = vcmp.eq.f32.partialorder %v1285_v39, 8.507059e+37 }
 0xfd8   :  { %v2973_v6 = vpop.eup %2972 }
 0xfd9   :  { %v1277_v18 = vmul.f32 %v2973_v6, %v1275_v22  ;;  %v2975_v24 = vpop.eup %2974  ;;  %vm1282_vm5 = vweird.f32 %v2973_v6 }
 0xfda   :  { %v1236_v10 = vadd.f32 1.0, %v2975_v24  ;;  %vm1283_vm4 = vmor %vm1281_vm6, %vm1282_vm5  ;;  %vm4435_vm5 = vcmp.eq.s32.totalorder %v3545_v9, 1 }
 0xfdb   :  { %v1278_v27 = vsub.f32 1.0, %v1277_v18 }
 0xfdc   :  { %2976 = vrcp.f32 %v1236_v10  ;;  %v1248_v41 = vand.u32 2147483648, %v1236_v10  ;;  %vm1242_vm13 = vweird.f32 %v1236_v10  ;;  %v1246_v51 = vand.u32 2147483647, %v1236_v10 }
 0xfdd   :  { %v1279_v33 = vmul.f32 %v2973_v6, %v1278_v27 }
 0xfde   :  { %v1249_v47 = vor.u32 1.1754944e-38, %v1248_v41  ;;  %vm1247_vm15 = vcmp.eq.f32.partialorder %v1246_v51, 8.507059e+37 }
 0xfdf   :  { %v1280_v35 = vadd.f32 %v2973_v6, %v1279_v33 }
 0xfe1   :  { %v1284_v57 = vsel %vm1283_vm4, %v2973_v6, %v1280_v35 }
 0xfe2   :  { %v2977_v43 = vpop.eup %2976  ;;  %v1289_v21 = vsel %vm1286_vm3, %v1288_v36, %v1284_v57 }
 0xfe3   :  { %v1238_v31 = vmul.f32 %v2977_v43, %v1236_v10  ;;  %vm1243_vm10 = vweird.f32 %v2977_v43  ;;  %v1292_v40 = vmul.f32 %v1289_v21, %v3824_v26 }
 0xfe4   :  { %vm1244_vm14 = vmor %vm1242_vm13, %vm1243_vm10 }
 0xfe5   :  { %v1239_v38 = vsub.f32 1.0, %v1238_v31 }
 0xfe7   :  { %v1240_v16 = vmul.f32 %v2977_v43, %v1239_v38 }
 0xfe9   :  { %v1241_v25 = vadd.f32 %v2977_v43, %v1240_v16 }
 0xfeb   :  { %v1245_v1 = vsel %vm1244_vm14, %v2977_v43, %v1241_v25 }
 0xfec   :  { %v1250_v3 = vsel %vm1247_vm15, %v1249_v47, %v1245_v1 }
 0xfed   :  { %v1253_v61 = vmul.f32 %v1250_v3, %v3835_v29 }
0x1028   :  { %v1295_v34 = vpop.permute.xlu2 %1294 }
0x1029   :  { %v1297_v59 = vmul.f32 %v1295_v34, %v1289_v21 }
0x102b   :  { %1299 = vrot.lane.b32.xlu1 %v1297_v59, %s3184_s2 }
0x103a   :  { %v1256_v45 = vpop.permute.xlu1 %1255 }
0x103b   :  { %v1258_v56 = vmul.f32 %v1256_v45, %v1250_v3 }
0x103d   :  { %1260 = vrot.lane.b32.xlu0 %v1258_v56, %s3184_s2 }
0x109d   :  { %v1300_v62 = vpop.permute.xlu1 %1299 }
0x109e   :  { %v3827_v48 = vadd.f32 %v1300_v62, %v1292_v40 }
0x10a0   :  { %2978 = vtanh.f32 %v3827_v48 }
0x10a6   :  { %v2979_v49 = vpop.eup %2978 }
0x10a7   :  { %1305 = vrot.lane.b32.xlu0 %v2979_v49, %s3183_s0 }
0x10af   :  { %v1261_v37 = vpop.permute.xlu0 %1260 }
0x10b0   :  { %v3838_v60 = vadd.f32 %v1261_v37, %v1253_v61 }
0x10b2   :  { %2980 = vtanh.f32 %v3838_v60  ;;  %v1270_v37 = vsel %vm604_vm8, %v3838_v60, %v3835_v29  ;;  %v1473_v29 = vld [vmem:[#allocation4 + $0x110] sm:$0xff]  ;;  %v1474_v60 = vld [vmem:[#allocation4 + $0x118] sm:$0xff] }
0x10b8   :  { %v2981_v17 = vpop.eup %2980 }
0x10b9   :  { %1266 = vrot.lane.b32.xlu2 %v2981_v17, %s3183_s0 }
0x1113   :  { %v1267_v52 = vpop.permute.xlu2 %1266 }
0x1114   :  { %v1269_v4 = vmul.f32 %v1267_v52, %v1250_v3 }
0x1116   :  { %v3845_v13 = vsel %vm604_vm8, %v1269_v4, %v3797_v63 }
0x1117   :  { %1312 = vrot.lane.b32.xlu1 %v3845_v13, %s3184_s2 }
0x1119   :  { %v1306_v2 = vpop.permute.xlu0 %1305 }
0x111a   :  { %v1308_v30 = vmul.f32 %v1306_v2, %v1289_v21 }
0x111c   :  { %v3852_v15 = vsel %vm4435_vm5, %v1308_v30, %v3804_v50 }
0x111d   :  { %1317 = vrot.lane.b32.xlu2 %v3852_v15, %s3183_s0 }
0x1177   :  { %v1318_v46 = vpop.permute.xlu2 %1317 }
0x1178   :  { %1320 = vst.msk [vmem:[#allocation3 + $0x8] sm:$0xff] %vm467_vm7, %v1318_v46 }
0x1189   :  { %v1313_v5 = vpop.permute.xlu1 %1312 }
0x118a   :  { %1315 = vst.msk [vmem:[#allocation3 + $0x30] sm:$0xff] %vm182_vm9, %v1313_v5  ;;  %v1323_v63 = vsel %vm182_vm9, %v1313_v5, %v1318_v46  ;;  %v1475_v46 = vld [vmem:[#allocation4 + $0x120] sm:$0xff]  ;;  %v1476_v5 = vld [vmem:[#allocation4 + $0x128] sm:$0xff] }
0x118b   :  { %2804 = vmatmul.msk.f32.vlgmr.msrb.gmra.mxu0 %vm100_vm0, %v1323_v63  ;;  %2805 = vmatmul.msk.f32.vlgmr.msra.gmra.mxu3 %vm100_vm0, %v1323_v63  ;;  %v3877_v63 = vld [vmem:[#allocation4 + $0x1b0] sm:$0xff] }
0x118c   :  { %1634 = vmatpush.msra.mxu0 %v3877_v63 }
0x1208   :  { %v1344_v54 = vpop.f32.mrf.mxu0 }
0x1209   :  { %v1367_v58 = vadd.f32 %v1344_v54, %v3439_v23  ;;  %v3880_v54 = vld [vmem:[#allocation4 + $0x1a0] sm:$0xff] }
0x120a   :  { %1635 = vmatpush.msra.mxu0 %v3880_v54 }
0x120b   :  { %2982 = vtanh.f32 %v1367_v58  ;;  %v2806_v42 = vmul.f32 -1.442695, %v1367_v58  ;;  %v3882_v58 = vld [vmem:[#allocation4 + $0x190] sm:$0xff] }
0x120c   :  { %1636 = vmatpush.msra.mxu0 %v3882_v58 }
0x120e   :  { %v1364_v50 = vpop.f32.mrf.mxu3 }
0x120f   :  { %v1368_v14 = vadd.f32 %v1364_v50, %v3441_v28  ;;  %v1471_v50 = vld [vmem:[#allocation4 + $0x100] sm:$0xff] }
0x1211   :  { %v2983_v19 = vpop.eup %2982  ;;  %2984 = vtanh.f32 %v1368_v14  ;;  %v2807_v22 = vmul.f32 -1.442695, %v1368_v14  ;;  %v1472_v14 = vld [vmem:[#allocation4 + $0x108] sm:$0xff] }
0x1212   :  { %1391 = vrot.lane.b32.xlu2 %v2983_v19, %s3183_s0 }
0x1213   :  { %2986 = vpow2.f32 %v2807_v22 }
0x1214   :  { %2988 = vpow2.f32 %v2806_v42 }
0x1217   :  { %v2985_v8 = vpop.eup %2984 }
0x1218   :  { %1429 = vrot.lane.b32.xlu0 %v2985_v8, %s3183_s0 }
0x1219   :  { %v2987_v6 = vpop.eup %2986 }
0x121a   :  { %v1410_v18 = vadd.f32 1.0, %v2987_v6  ;;  %v2989_v24 = vpop.eup %2988 }
0x121b   :  { %v1372_v23 = vadd.f32 1.0, %v2989_v24  ;;  %v1469_v24 = vld [vmem:[#allocation4 + $0xf0] sm:$0xff] }
0x121c   :  { %2990 = vrcp.f32 %v1410_v18  ;;  %v1422_v57 = vand.u32 2147483648, %v1410_v18  ;;  %vm1416_vm4 = vweird.f32 %v1410_v18  ;;  %v1420_v36 = vand.u32 2147483647, %v1410_v18 }
0x121d   :  { %2992 = vrcp.f32 %v1372_v23  ;;  %v1384_v41 = vand.u32 2147483648, %v1372_v23  ;;  %vm1378_vm14 = vweird.f32 %v1372_v23  ;;  %v1382_v51 = vand.u32 2147483647, %v1372_v23 }
0x121e   :  { %v1423_v21 = vor.u32 1.1754944e-38, %v1422_v57  ;;  %vm1421_vm10 = vcmp.eq.f32.partialorder %v1420_v36, 8.507059e+37  ;;  %v3906_v57 = vld [vmem:[#allocation4 + $0x140] sm:$0xff] }
0x121f   :  { %v1385_v45 = vor.u32 1.1754944e-38, %v1384_v41  ;;  %vm1383_vm5 = vcmp.eq.f32.partialorder %v1382_v51, 8.507059e+37  ;;  %v3962_v41 = vld [vmem:[#allocation4 + $0x178] sm:$0xff]  ;;  %v3966_v51 = vld [vmem:[#allocation4 + $0x168] sm:$0xff] }
0x1222   :  { %v2991_v27 = vpop.eup %2990 }
0x1223   :  { %v1412_v10 = vmul.f32 %v2991_v27, %v1410_v18  ;;  %v2993_v33 = vpop.eup %2992  ;;  %vm1417_vm6 = vweird.f32 %v2991_v27 }
0x1224   :  { %v1374_v35 = vmul.f32 %v2993_v33, %v1372_v23  ;;  %vm1418_vm3 = vmor %vm1416_vm4, %vm1417_vm6  ;;  %vm1379_vm13 = vweird.f32 %v2993_v33  ;;  %vm4436_vm6 = vcmp.eq.s32.totalorder %v3545_v9, 1  ;;  %vm4437_vm4 = vcmp.eq.s32.totalorder %v3475_v7, 1  ;;  %v1470_v23 = vld [vmem:[#allocation4 + $0xf8] sm:$0xff] }
0x1225   :  { %v1413_v28 = vsub.f32 1.0, %v1412_v10  ;;  %vm1380_vm15 = vmor %vm1378_vm14, %vm1379_vm13  ;;  %v1309_v40 = vsel %vm4436_vm6, %v3827_v48, %v3824_v26  ;;  %v1477_v26 = vld [vmem:[#allocation4 + $0x130] sm:$0xff]  ;;  %v1478_v48 = vld [vmem:[#allocation4 + $0x138] sm:$0xff] }
0x1226   :  { %v1375_v39 = vsub.f32 1.0, %v1374_v35  ;;  %1518 = vmatpush.msra.mxu1 %v1477_v26  ;;  %1559 = vmatpush.msrb.mxu2 %v1478_v48  ;;  %v1467_v10 = vld [vmem:[#allocation4 + $0xe0] sm:$0xff]  ;;  %v1466_v35 = vld [vmem:[#allocation4 + $0xd8] sm:$0xff] }
0x1227   :  { %v1414_v11 = vmul.f32 %v2991_v27, %v1413_v28  ;;  %v1468_v28 = vld [vmem:[#allocation4 + $0xe8] sm:$0xff] }
0x1228   :  { %v1376_v31 = vmul.f32 %v2993_v33, %v1375_v39  ;;  %1519 = vmatpush.msra.mxu1 %v1475_v46  ;;  %1560 = vmatpush.msrb.mxu2 %v1476_v5  ;;  %v1464_v39 = vld [vmem:[#allocation4 + $0xc8] sm:$0xff] }
0x1229   :  { %v1415_v43 = vadd.f32 %v2991_v27, %v1414_v11  ;;  %v3899_v11 = vld [vmem:[#allocation4 + $0x160] sm:$0xff] }
0x122a   :  { %v1377_v16 = vadd.f32 %v2993_v33, %v1376_v31  ;;  %1520 = vmatpush.msra.mxu1 %v1473_v29  ;;  %1561 = vmatpush.msrb.mxu2 %v1474_v60 }
0x122b   :  { %v1419_v34 = vsel %vm1418_vm3, %v2991_v27, %v1415_v43  ;;  %vm4438_vm3 = vcmp.eq.s32.totalorder %v3484_v12, 1  ;;  %v3894_v27 = vld [vmem:[#allocation4 + $0x180] sm:$0xff]  ;;  %v3902_v43 = vld [vmem:[#allocation4 + $0x150] sm:$0xff] }
0x122c   :  { %v1424_v38 = vsel %vm1421_vm10, %v1423_v21, %v1419_v34  ;;  %v1381_v1 = vsel %vm1380_vm15, %v2993_v33, %v1377_v16  ;;  %1521 = vmatpush.msra.mxu1 %v1471_v50  ;;  %1562 = vmatpush.msrb.mxu2 %v1472_v14  ;;  %v3896_v33 = vld [vmem:[#allocation4 + $0x170] sm:$0xff]  ;;  %v1456_v34 = vld [vmem:[#allocation3 + $0x8] sm:$0xff]  ;;  %v3943_v21 = vld [vmem:[#allocation4 + $0x1b8] sm:$0xff] }
0x122d   :  { %v1386_v3 = vsel %vm1383_vm5, %v1385_v45, %v1381_v1  ;;  %v1427_v62 = vmul.f32 %v1424_v38, %v1309_v40  ;;  %1637 = vmatpush.msra.mxu0 %v3894_v27  ;;  %1654 = vmatpush.msrb.mxu3 %v3943_v21  ;;  %v1457_v16 = vld [vmem:[#allocation3 + $0x10] sm:$0xff]  ;;  %v3971_v1 = vld [vmem:[#allocation4 + $0x158] sm:$0xff] }
0x122e   :  { %v1389_v17 = vmul.f32 %v1386_v3, %v1270_v37  ;;  %1522 = vmatpush.msra.mxu1 %v1469_v24  ;;  %1563 = vmatpush.msrb.mxu2 %v1470_v23  ;;  %v1458_v45 = vld [vmem:[#allocation3 + $0x18] sm:$0xff]  ;;  %v1461_v40 = vld [vmem:[#allocation3 + $0x30] sm:$0xff] }
0x122f   :  { %1638 = vmatpush.msra.mxu0 %v3896_v33 }
0x1230   :  { %1523 = vmatpush.msra.mxu1 %v1467_v10  ;;  %1564 = vmatpush.msrb.mxu2 %v1468_v28 }
0x1231   :  { %1639 = vmatpush.msra.mxu0 %v3899_v11 }
0x1232   :  { %1565 = vmatpush.msrb.mxu2 %v1466_v35 }
0x1233   :  { %1640 = vmatpush.msra.mxu0 %v3902_v43 }
0x1234   :  { %1566 = vmatpush.msrb.mxu2 %v1464_v39 }
0x1235   :  { %1641 = vmatpush.msra.mxu0 %v3906_v57 }
0x1236   :  { %1642 = vmatmul.f32.vlgmr.msra.gmra.mxu0 %v3182_v20  ;;  %2190 = vmatpush.msra.mxu2 %v3943_v21 }
0x1237   :  { %1768 = vmatpush.msrb.mxu0 %v3877_v63 }
0x1239   :  { %1769 = vmatpush.msrb.mxu0 %v3880_v54 }
0x123b   :  { %1770 = vmatpush.msrb.mxu0 %v3882_v58 }
0x123d   :  { %1771 = vmatpush.msrb.mxu0 %v3894_v27 }
0x123f   :  { %1772 = vmatpush.msrb.mxu0 %v3896_v33 }
0x1241   :  { %1773 = vmatpush.msrb.mxu0 %v3899_v11 }
0x1243   :  { %1774 = vmatpush.msrb.mxu0 %v3902_v43 }
0x1245   :  { %1775 = vmatpush.msrb.mxu0 %v3906_v57 }
0x1247   :  { %1902 = vmatpush.msra.mxu0 %v3877_v63 }
0x1249   :  { %1903 = vmatpush.msra.mxu0 %v3880_v54 }
0x124b   :  { %1904 = vmatpush.msra.mxu0 %v3882_v58 }
0x124d   :  { %1905 = vmatpush.msra.mxu0 %v3894_v27 }
0x124f   :  { %1906 = vmatpush.msra.mxu0 %v3896_v33 }
0x1251   :  { %1907 = vmatpush.msra.mxu0 %v3899_v11 }
0x1253   :  { %1908 = vmatpush.msra.mxu0 %v3902_v43 }
0x1255   :  { %1909 = vmatpush.msra.mxu0 %v3906_v57 }
0x126c   :  { %v1392_v47 = vpop.permute.xlu2 %1391 }
0x126d   :  { %v1394_v56 = vmul.f32 %v1392_v47, %v1386_v3 }
0x128a   :  { %v1430_v59 = vpop.permute.xlu0 %1429 }
0x128b   :  { %v1432_v25 = vmul.f32 %v1430_v59, %v1424_v38  ;;  %v3945_v59 = vld [vmem:[#allocation4 + $0x1a8] sm:$0xff] }
0x128c   :  { %1655 = vmatpush.msrb.mxu3 %v3945_v59  ;;  %2191 = vmatpush.msra.mxu2 %v3945_v59 }
0x128d   :  { %1434 = vrot.lane.b32.xlu1 %v1432_v25, %s3184_s2  ;;  %v3960_v25 = vld [vmem:[#allocation4 + $0x188] sm:$0xff] }
0x1295   :  { %1396 = vrot.lane.b32.xlu1 %v1394_v56, %s3184_s2  ;;  %v1459_v56 = vld [vmem:[#allocation3 + $0x20] sm:$0xff] }
0x12ff   :  { %v1435_v49 = vpop.permute.xlu1 %1434 }
0x1300   :  { %v1437_v61 = vadd.f32 %v1435_v49, %v1427_v62  ;;  %v1480_v49 = vld [vmem:[#allocation4 + $0x1d0] ss:$8 sm:$0x3] }
0x1302   :  { %2994 = vtanh.f32 %v1437_v61  ;;  %v4017_v61 = vperm.slane %v1480_v49, 0 }
0x1307   :  { %v1397_v52 = vpop.permute.xlu1 %1396 }
0x1308   :  { %v2995_v4 = vpop.eup %2994  ;;  %v1399_v2 = vadd.f32 %v1397_v52, %v1389_v17  ;;  %v1643_v17 = vpop.f32.mrf.mxu0 }
0x1309   :  { %1440 = vrot.lane.b32.xlu0 %v2995_v4, %s3183_s0 }
0x130a   :  { %2996 = vtanh.f32 %v1399_v2  ;;  %v1483_v2 = vperm.slane %v1480_v49, 1 }
0x1310   :  { %v2997_v30 = vpop.eup %2996 }
0x1311   :  { %1402 = vrot.lane.b32.xlu0 %v2997_v30, %s3183_s0 }
0x137b   :  { %v1441_v19 = vpop.permute.xlu0 %1440 }
0x137c   :  { %v1443_v8 = vmul.f32 %v1441_v19, %v1424_v38  ;;  %v3949_v38 = vld [vmem:[#allocation4 + $0x198] sm:$0xff] }
0x137d   :  { %1656 = vmatpush.msrb.mxu3 %v3949_v38  ;;  %2192 = vmatpush.msra.mxu2 %v3949_v38 }
0x137e   :  { %v1444_v22 = vsel %vm4437_vm4, %v1443_v8, %v3852_v15  ;;  %v1465_v15 = vld [vmem:[#allocation4 + $0xd0] sm:$0xff] }
0x137f   :  { %1451 = vrot.lane.b32.xlu2 %v1444_v22, %s3183_s0  ;;  %1524 = vmatpush.msra.mxu1 %v1465_v15 }
0x1380   :  { %1657 = vmatpush.msrb.mxu3 %v3960_v25  ;;  %2193 = vmatpush.msra.mxu2 %v3960_v25 }
0x1382   :  { %1658 = vmatpush.msrb.mxu3 %v3962_v41  ;;  %2194 = vmatpush.msra.mxu2 %v3962_v41 }
0x1383   :  { %v1403_v42 = vpop.permute.xlu0 %1402 }
0x1384   :  { %v1405_v6 = vmul.f32 %v1403_v42, %v1386_v3  ;;  %1659 = vmatpush.msrb.mxu3 %v3966_v51  ;;  %2195 = vmatpush.msra.mxu2 %v3966_v51  ;;  %v3980_v3 = vld [vmem:[#allocation4 + $0x148] sm:$0xff] }
0x1386   :  { %v1406_v18 = vsel %vm4438_vm3, %v1405_v6, %v3845_v13  ;;  %v1463_v13 = vld [vmem:[#allocation4 + $0xc0] sm:$0xff]  ;;  %1660 = vmatpush.msrb.mxu3 %v3971_v1  ;;  %2196 = vmatpush.msra.mxu2 %v3971_v1  ;;  %vm4439_vm3 = vcmp.eq.s32.totalorder %v3475_v7, 1 }
0x1387   :  { %1446 = vrot.lane.b32.xlu1 %v1406_v18, %s3184_s2  ;;  %1525 = vmatpush.msra.mxu1 %v1463_v13 }
0x1388   :  { %1661 = vmatpush.msrb.mxu3 %v3980_v3  ;;  %2197 = vmatpush.msra.mxu2 %v3980_v3 }
0x1389   :  { %2170 = vmatpush.msrb.mxu1 %v3877_v63  ;;  %1662 = vmatmul.f32.vlgmr.msrb.gmra.mxu3 %v3182_v20  ;;  %v1460_v20 = vld [vmem:[#allocation3 + $0x28] sm:$0xff] }
0x138a   :  { %1788 = vmatpush.msra.mxu3 %v3943_v21 }
0x138b   :  { %2171 = vmatpush.msrb.mxu1 %v3880_v54 }
0x138c   :  { %1789 = vmatpush.msra.mxu3 %v3945_v59 }
0x138d   :  { %2172 = vmatpush.msrb.mxu1 %v3882_v58 }
0x138e   :  { %1790 = vmatpush.msra.mxu3 %v3949_v38 }
0x138f   :  { %2173 = vmatpush.msrb.mxu1 %v3894_v27 }
0x1390   :  { %1791 = vmatpush.msra.mxu3 %v3960_v25 }
0x1391   :  { %2174 = vmatpush.msrb.mxu1 %v3896_v33 }
0x1392   :  { %1792 = vmatpush.msra.mxu3 %v3962_v41 }
0x1393   :  { %2175 = vmatpush.msrb.mxu1 %v3899_v11 }
0x1394   :  { %1793 = vmatpush.msra.mxu3 %v3966_v51 }
0x1395   :  { %2176 = vmatpush.msrb.mxu1 %v3902_v43 }
0x1396   :  { %1794 = vmatpush.msra.mxu3 %v3971_v1 }
0x1397   :  { %2177 = vmatpush.msrb.mxu1 %v3906_v57 }
0x1398   :  { %1795 = vmatpush.msra.mxu3 %v3980_v3 }
0x139a   :  { %1922 = vmatpush.msrb.mxu3 %v3943_v21 }
0x139c   :  { %1923 = vmatpush.msrb.mxu3 %v3945_v59 }
0x139e   :  { %1924 = vmatpush.msrb.mxu3 %v3949_v38 }
0x13a0   :  { %1925 = vmatpush.msrb.mxu3 %v3960_v25 }
0x13a2   :  { %1926 = vmatpush.msrb.mxu3 %v3962_v41 }
0x13a4   :  { %1927 = vmatpush.msrb.mxu3 %v3966_v51 }
0x13a6   :  { %1928 = vmatpush.msrb.mxu3 %v3971_v1 }
0x13a8   :  { %1929 = vmatpush.msrb.mxu3 %v3980_v3 }
0x13d9   :  { %v1452_v36 = vpop.permute.xlu2 %1451 }
0x13da   :  { %1454 = vst.msk [vmem:[#allocation3] sm:$0xff] %vm467_vm7, %v1452_v36 }
0x13e1   :  { %v1455_v31 = vld [vmem:[#allocation3] sm:$0xff] }
0x13e2   :  { %2808 = vmatmul.msk.f32.vlgmr.msra.gmra.mxu1 %vm100_vm0, %v1455_v31  ;;  %2816 = vmatmul.msk.f32.vlgmr.msrb.gmra.mxu2 %vm100_vm0, %v1455_v31 }
0x13e3   :  { %2438 = vmatpush.msra.mxu1 %v3877_v63  ;;  %2458 = vmatpush.msrb.mxu2 %v3943_v21 }
0x13e5   :  { %2439 = vmatpush.msra.mxu1 %v3880_v54  ;;  %2459 = vmatpush.msrb.mxu2 %v3945_v59 }
0x13e7   :  { %2440 = vmatpush.msra.mxu1 %v3882_v58  ;;  %2460 = vmatpush.msrb.mxu2 %v3949_v38 }
0x13e9   :  { %2441 = vmatpush.msra.mxu1 %v3894_v27  ;;  %2461 = vmatpush.msrb.mxu2 %v3960_v25 }
0x13ea   :  { %2809 = vmatmul.msk.f32.gmra.mxu1 %vm100_vm0, %v1456_v34  ;;  %2817 = vmatmul.msk.f32.gmra.mxu2 %vm100_vm0, %v1456_v34 }
0x13eb   :  { %2442 = vmatpush.msra.mxu1 %v3896_v33  ;;  %2462 = vmatpush.msrb.mxu2 %v3962_v41 }
0x13ed   :  { %2443 = vmatpush.msra.mxu1 %v3899_v11  ;;  %2463 = vmatpush.msrb.mxu2 %v3966_v51 }
0x13ef   :  { %2444 = vmatpush.msra.mxu1 %v3902_v43  ;;  %2464 = vmatpush.msrb.mxu2 %v3971_v1 }
0x13f1   :  { %2445 = vmatpush.msra.mxu1 %v3906_v57  ;;  %2465 = vmatpush.msrb.mxu2 %v3980_v3 }
0x13f2   :  { %2810 = vmatmul.msk.f32.gmra.mxu1 %vm100_vm0, %v1457_v16  ;;  %2818 = vmatmul.msk.f32.gmra.mxu2 %vm100_vm0, %v1457_v16 }
0x13f9   :  { %v1447_v47 = vpop.permute.xlu1 %1446 }
0x13fa   :  { %1449 = vst.msk [vmem:[#allocation3 + $0x38] sm:$0xff] %vm182_vm9, %v1447_v47  ;;  %2811 = vmatmul.msk.f32.gmra.mxu1 %vm100_vm0, %v1458_v45  ;;  %2819 = vmatmul.msk.f32.gmra.mxu2 %vm100_vm0, %v1458_v45 }
0x1401   :  { %v1462_v62 = vld [vmem:[#allocation3 + $0x38] sm:$0xff] }
0x1402   :  { %2812 = vmatmul.msk.f32.gmra.mxu1 %vm100_vm0, %v1459_v56  ;;  %2820 = vmatmul.msk.f32.gmra.mxu2 %vm100_vm0, %v1459_v56 }
0x140a   :  { %2813 = vmatmul.msk.f32.gmra.mxu1 %vm100_vm0, %v1460_v20  ;;  %2821 = vmatmul.msk.f32.gmra.mxu2 %vm100_vm0, %v1460_v20 }
0x140c   :  { %v1663_v34 = vpop.f32.mrf.mxu3 }
0x1412   :  { %2814 = vmatmul.msk.f32.gmra.mxu1 %vm100_vm0, %v1461_v40  ;;  %2822 = vmatmul.msk.f32.gmra.mxu2 %vm100_vm0, %v1461_v40 }
0x141a   :  { %2815 = vmatmul.msk.f32.gmra.mxu1 %vm100_vm0, %v1462_v62  ;;  %2823 = vmatmul.msk.f32.gmra.mxu2 %vm100_vm0, %v1462_v62 }
0x145f   :  { %v1527_v37 = vpop.f32.mrf.mxu1 }
0x1460   :  { %v1528_v52 = vadd.f32 %v1527_v37, %v4017_v61 }
0x1462   :  { %v1666_v4 = vadd.f32 %v1643_v17, %v1528_v52 }
0x1464   :  { %2998 = vtanh.f32 %v1666_v4  ;;  %v2824_v36 = vmul.f32 -1.442695, %v1666_v4 }
0x1465   :  { %v1568_v30 = vpop.f32.mrf.mxu2 }
0x1466   :  { %v4020_v26 = vadd.f32 %v1568_v30, %v1483_v2  ;;  %3000 = vpow2.f32 %v2824_v36 }
0x1467   :  { %v4022_v48 = vpop.f32.mrf.mxu1 }
0x146a   :  { %v2999_v46 = vpop.eup %2998 }
0x146b   :  { %1690 = vrot.lane.b32.xlu2 %v2999_v46, %s3183_s0 }
0x146c   :  { %v3001_v45 = vpop.eup %3000 }
0x146d   :  { %v1571_v5 = vpop.f32.mrf.mxu2  ;;  %v1671_v56 = vadd.f32 1.0, %v3001_v45 }
0x146e   :  { %v4025_v29 = vadd.f32 %v1571_v5, %v1483_v2 }
0x146f   :  { %v4027_v60 = vpop.f32.mrf.mxu1  ;;  %v1683_v52 = vand.u32 2147483648, %v1671_v56  ;;  %vm1677_vm10 = vweird.f32 %v1671_v56  ;;  %v1681_v4 = vand.u32 2147483647, %v1671_v56 }
0x1471   :  { %vm1682_vm14 = vcmp.eq.f32.partialorder %v1681_v4, 8.507059e+37 }
0x1475   :  { %v1574_v50 = vpop.f32.mrf.mxu2 }
0x1476   :  { %v4029_v14 = vadd.f32 %v1574_v50, %v1483_v2 }
0x1477   :  { %v4031_v19 = vpop.f32.mrf.mxu1 }
0x147d   :  { %v1577_v8 = vpop.f32.mrf.mxu2 }
0x147e   :  { %v4033_v22 = vadd.f32 %v1577_v8, %v1483_v2 }
0x147f   :  { %v4035_v42 = vpop.f32.mrf.mxu1 }
0x1485   :  { %v1580_v6 = vpop.f32.mrf.mxu2 }
0x1486   :  { %v4037_v18 = vadd.f32 %v1580_v6, %v1483_v2 }
0x1487   :  { %v1542_v24 = vpop.f32.mrf.mxu1 }
0x1488   :  { %v4040_v23 = vadd.f32 %v1542_v24, %v4017_v61 }
0x148d   :  { %v1583_v10 = vpop.f32.mrf.mxu2 }
0x148e   :  { %v4042_v28 = vadd.f32 %v1583_v10, %v1483_v2 }
0x148f   :  { %v1545_v15 = vpop.f32.mrf.mxu1 }
0x1490   :  { %v4045_v35 = vadd.f32 %v1545_v15, %v4017_v61 }
0x1495   :  { %v1586_v13 = vpop.f32.mrf.mxu2 }
0x1496   :  { %v4047_v39 = vadd.f32 %v1586_v13, %v1483_v2 }
0x149d   :  { %v1589_v31 = vpop.f32.mrf.mxu2 }
0x149e   :  { %v1590_v16 = vadd.f32 %v1589_v31, %v1483_v2  ;;  %v1684_v2 = vor.u32 1.1754944e-38, %v1683_v52 }
0x14a0   :  { %v1667_v47 = vadd.f32 %v1663_v34, %v1590_v16 }
0x14a2   :  { %3002 = vtanh.f32 %v1667_v47  ;;  %v2825_v8 = vmul.f32 -1.442695, %v1667_v47 }
0x14a3   :  { %3004 = vrcp.f32 %v1671_v56 }
0x14a4   :  { %3006 = vpow2.f32 %v2825_v8 }
0x14a8   :  { %v3003_v20 = vpop.eup %3002 }
0x14a9   :  { %1729 = vrot.lane.b32.xlu0 %v3003_v20, %s3183_s0  ;;  %v3005_v40 = vpop.eup %3004 }
0x14aa   :  { %v1673_v62 = vmul.f32 %v3005_v40, %v1671_v56  ;;  %vm1678_vm7 = vweird.f32 %v3005_v40  ;;  %v3007_v6 = vpop.eup %3006 }
0x14ab   :  { %vm1679_vm13 = vmor %vm1677_vm10, %vm1678_vm7  ;;  %v1710_v24 = vadd.f32 1.0, %v3007_v6  ;;  %vm4440_vm7 = vcmp.eq.s32.totalorder %v3484_v12, 1 }
0x14ac   :  { %v1674_v49 = vsub.f32 1.0, %v1673_v62 }
0x14ad   :  { %3008 = vrcp.f32 %v1710_v24  ;;  %v1722_v34 = vand.u32 2147483648, %v1710_v24  ;;  %vm1716_vm5 = vweird.f32 %v1710_v24  ;;  %v1720_v16 = vand.u32 2147483647, %v1710_v24 }
0x14ae   :  { %v1675_v37 = vmul.f32 %v3005_v40, %v1674_v49 }
0x14af   :  { %v1723_v56 = vor.u32 1.1754944e-38, %v1722_v34  ;;  %vm1721_vm4 = vcmp.eq.f32.partialorder %v1720_v16, 8.507059e+37 }
0x14b0   :  { %v1676_v17 = vadd.f32 %v3005_v40, %v1675_v37 }
0x14b2   :  { %v1680_v30 = vsel %vm1679_vm13, %v3005_v40, %v1676_v17 }
0x14b3   :  { %v1685_v5 = vsel %vm1682_vm14, %v1684_v2, %v1680_v30  ;;  %v3009_v10 = vpop.eup %3008 }
0x14b4   :  { %v1712_v15 = vmul.f32 %v3009_v10, %v1710_v24  ;;  %vm1717_vm15 = vweird.f32 %v3009_v10  ;;  %v1688_v62 = vmul.f32 0.0, %v1685_v5 }
0x14b5   :  { %vm1718_vm6 = vmor %vm1716_vm5, %vm1717_vm15 }
0x14b6   :  { %v1713_v13 = vsub.f32 1.0, %v1712_v15 }
0x14b8   :  { %v1714_v36 = vmul.f32 %v3009_v10, %v1713_v13 }
0x14ba   :  { %v1715_v31 = vadd.f32 %v3009_v10, %v1714_v36  ;;  %v1531_v36 = vadd.f32 %v4022_v48, %v4017_v61 }
0x14bc   :  { %v1719_v45 = vsel %vm1718_vm6, %v3009_v10, %v1715_v31 }
0x14bd   :  { %v1724_v40 = vsel %vm1721_vm4, %v1723_v56, %v1719_v45 }
0x14be   :  { %v1727_v52 = vmul.f32 0.0, %v1724_v40 }
0x14c5   :  { %v1691_v46 = vpop.permute.xlu2 %1690 }
0x14c6   :  { %v1693_v50 = vmul.f32 %v1691_v46, %v1685_v5 }
0x14c8   :  { %1695 = vrot.lane.b32.xlu1 %v1693_v50, %s3184_s2 }
0x151b   :  { %v1730_v20 = vpop.permute.xlu0 %1729 }
0x151c   :  { %v1732_v47 = vmul.f32 %v1730_v20, %v1724_v40 }
0x151e   :  { %1734 = vrot.lane.b32.xlu2 %v1732_v47, %s3184_s2 }
0x153a   :  { %v1696_v49 = vpop.permute.xlu1 %1695 }
0x153b   :  { %v4052_v37 = vadd.f32 %v1696_v49, %v1688_v62 }
0x153d   :  { %3010 = vtanh.f32 %v4052_v37 }
0x1543   :  { %v3011_v17 = vpop.eup %3010 }
0x1544   :  { %1701 = vrot.lane.b32.xlu0 %v3011_v17, %s3183_s0 }
0x1578   :  { %v1735_v4 = vpop.permute.xlu2 %1734 }
0x1579   :  { %v4056_v30 = vadd.f32 %v1735_v4, %v1727_v52 }
0x157b   :  { %3012 = vtanh.f32 %v4056_v30 }
0x1581   :  { %v3013_v2 = vpop.eup %3012 }
0x1582   :  { %1740 = vrot.lane.b32.xlu1 %v3013_v2, %s3183_s0 }
0x15b6   :  { %v1702_v46 = vpop.permute.xlu0 %1701 }
0x15b7   :  { %v1704_v50 = vmul.f32 %v1702_v46, %v1685_v5 }
0x15b9   :  { %v4062_v8 = vsel %vm4439_vm3, %v1704_v50, 0.0 }
0x15ba   :  { %1749 = vrot.lane.b32.xlu2 %v4062_v8, %s3184_s2 }
0x15f4   :  { %v1741_v6 = vpop.permute.xlu1 %1740 }
0x15f5   :  { %v1743_v24 = vmul.f32 %v1741_v6, %v1724_v40 }
0x15f7   :  { %v4068_v10 = vsel %vm4440_vm7, %v1743_v24, 0.0 }
0x15f8   :  { %1753 = vrot.lane.b32.xlu0 %v4068_v10, %s3183_s0 }
0x1614   :  { %v1750_v15 = vpop.permute.xlu2 %1749 }
0x166a   :  { %v1754_v13 = vpop.permute.xlu0 %1753 }
0x166b   :  { %v1756_v5 = vsel %vm182_vm9, %v1750_v15, %v1754_v13 }
0x166c   :  { %2826 = vmatmul.msk.f32.vlgmr.msrb.gmra.mxu0 %vm100_vm0, %v1756_v5  ;;  %2827 = vmatmul.msk.f32.vlgmr.msra.gmra.mxu3 %vm100_vm0, %v1756_v5 }
0x166d   :  { %2036 = vmatpush.msrb.mxu0 %v3877_v63  ;;  %2056 = vmatpush.msra.mxu3 %v3943_v21 }
0x166f   :  { %2037 = vmatpush.msrb.mxu0 %v3880_v54  ;;  %2057 = vmatpush.msra.mxu3 %v3945_v59 }
0x1671   :  { %2038 = vmatpush.msrb.mxu0 %v3882_v58  ;;  %2058 = vmatpush.msra.mxu3 %v3949_v38 }
0x1673   :  { %2039 = vmatpush.msrb.mxu0 %v3894_v27  ;;  %2059 = vmatpush.msra.mxu3 %v3960_v25 }
0x1675   :  { %2040 = vmatpush.msrb.mxu0 %v3896_v33  ;;  %2060 = vmatpush.msra.mxu3 %v3962_v41 }
0x1677   :  { %2041 = vmatpush.msrb.mxu0 %v3899_v11  ;;  %2061 = vmatpush.msra.mxu3 %v3966_v51 }
0x1679   :  { %2042 = vmatpush.msrb.mxu0 %v3902_v43  ;;  %2062 = vmatpush.msra.mxu3 %v3971_v1 }
0x167b   :  { %2043 = vmatpush.msrb.mxu0 %v3906_v57  ;;  %2063 = vmatpush.msra.mxu3 %v3980_v3 }
0x16e9   :  { %v1777_v31 = vpop.f32.mrf.mxu0 }
0x16ea   :  { %v1800_v34 = vadd.f32 %v1777_v31, %v1531_v36 }
0x16ec   :  { %3014 = vtanh.f32 %v1800_v34  ;;  %v2828_v49 = vmul.f32 -1.442695, %v1800_v34 }
0x16ef   :  { %v1797_v16 = vpop.f32.mrf.mxu3 }
0x16f0   :  { %v1801_v45 = vadd.f32 %v1797_v16, %v4047_v39 }
0x16f2   :  { %v3015_v56 = vpop.eup %3014  ;;  %3016 = vtanh.f32 %v1801_v45  ;;  %v2829_v40 = vmul.f32 -1.442695, %v1801_v45 }
0x16f3   :  { %1824 = vrot.lane.b32.xlu1 %v3015_v56, %s3183_s0 }
0x16f4   :  { %3018 = vpow2.f32 %v2829_v40 }
0x16f8   :  { %v3017_v20 = vpop.eup %3016 }
0x16f9   :  { %1863 = vrot.lane.b32.xlu2 %v3017_v20, %s3183_s0 }
0x16fa   :  { %v3019_v47 = vpop.eup %3018 }
0x16fb   :  { %v1844_v62 = vadd.f32 1.0, %v3019_v47 }
0x16fd   :  { %3020 = vrcp.f32 %v1844_v62  ;;  %v1856_v50 = vand.u32 2147483648, %v1844_v62  ;;  %vm1850_vm13 = vweird.f32 %v1844_v62  ;;  %v1854_v6 = vand.u32 2147483647, %v1844_v62 }
0x16fe   :  { %3022 = vpow2.f32 %v2828_v49 }
0x16ff   :  { %v1857_v13 = vor.u32 1.1754944e-38, %v1856_v50  ;;  %vm1855_vm15 = vcmp.eq.f32.partialorder %v1854_v6, 8.507059e+37 }
0x1703   :  { %v3021_v48 = vpop.eup %3020 }
0x1704   :  { %v1846_v17 = vmul.f32 %v3021_v48, %v1844_v62  ;;  %v3023_v52 = vpop.eup %3022  ;;  %vm1851_vm10 = vweird.f32 %v3021_v48 }
0x1705   :  { %v1805_v2 = vadd.f32 1.0, %v3023_v52  ;;  %vm1852_vm14 = vmor %vm1850_vm13, %vm1851_vm10  ;;  %v4101_v52 = vsel %vm4440_vm7, %v4056_v30, 0.0  ;;  %vm4441_vm10 = vcmp.eq.s32.totalorder %v3475_v7, 1  ;;  %vm4442_vm13 = vcmp.eq.s32.totalorder %v3545_v9, 1 }
0x1706   :  { %v1847_v4 = vsub.f32 1.0, %v1846_v17  ;;  %v4111_v50 = vsel %vm4441_vm10, %v4052_v37, 0.0 }
0x1707   :  { %3024 = vrcp.f32 %v1805_v2  ;;  %v1817_v20 = vand.u32 2147483648, %v1805_v2  ;;  %vm1811_vm6 = vweird.f32 %v1805_v2  ;;  %v1815_v40 = vand.u32 2147483647, %v1805_v2 }
0x1708   :  { %v1848_v39 = vmul.f32 %v3021_v48, %v1847_v4 }
0x1709   :  { %v1818_v62 = vor.u32 1.1754944e-38, %v1817_v20  ;;  %vm1816_vm3 = vcmp.eq.f32.partialorder %v1815_v40, 8.507059e+37 }
0x170a   :  { %v1849_v46 = vadd.f32 %v3021_v48, %v1848_v39 }
0x170c   :  { %v1853_v15 = vsel %vm1852_vm14, %v3021_v48, %v1849_v46 }
0x170d   :  { %v3025_v24 = vpop.eup %3024  ;;  %v1858_v31 = vsel %vm1855_vm15, %v1857_v13, %v1853_v15 }
0x170e   :  { %v1807_v5 = vmul.f32 %v3025_v24, %v1805_v2  ;;  %vm1812_vm5 = vweird.f32 %v3025_v24  ;;  %v1861_v4 = vmul.f32 %v1858_v31, %v4101_v52 }
0x170f   :  { %vm1813_vm4 = vmor %vm1811_vm6, %vm1812_vm5 }
0x1710   :  { %v1808_v16 = vsub.f32 1.0, %v1807_v5 }
0x1712   :  { %v1809_v45 = vmul.f32 %v3025_v24, %v1808_v16 }
0x1714   :  { %v1810_v56 = vadd.f32 %v3025_v24, %v1809_v45 }
0x1716   :  { %v1814_v47 = vsel %vm1813_vm4, %v3025_v24, %v1810_v56 }
0x1717   :  { %v1819_v48 = vsel %vm1816_vm3, %v1818_v62, %v1814_v47 }
0x1718   :  { %v1822_v6 = vmul.f32 %v1819_v48, %v4111_v50 }
0x1753   :  { %v1864_v36 = vpop.permute.xlu2 %1863 }
0x1754   :  { %v1866_v34 = vmul.f32 %v1864_v36, %v1858_v31 }
0x1756   :  { %1868 = vrot.lane.b32.xlu1 %v1866_v34, %s3184_s2 }
0x1765   :  { %v1825_v49 = vpop.permute.xlu1 %1824 }
0x1766   :  { %v1827_v17 = vmul.f32 %v1825_v49, %v1819_v48 }
0x1768   :  { %1829 = vrot.lane.b32.xlu0 %v1827_v17, %s3184_s2 }
0x17c8   :  { %v1869_v39 = vpop.permute.xlu1 %1868 }
0x17c9   :  { %v4104_v46 = vadd.f32 %v1869_v39, %v1861_v4 }
0x17cb   :  { %3026 = vtanh.f32 %v4104_v46 }
0x17d1   :  { %v3027_v2 = vpop.eup %3026 }
0x17d2   :  { %1874 = vrot.lane.b32.xlu0 %v3027_v2, %s3183_s0 }
0x17da   :  { %v1830_v24 = vpop.permute.xlu0 %1829 }
0x17db   :  { %v4114_v30 = vadd.f32 %v1830_v24, %v1822_v6 }
0x17dd   :  { %3028 = vtanh.f32 %v4114_v30 }
0x17e3   :  { %v3029_v15 = vpop.eup %3028 }
0x17e4   :  { %1835 = vrot.lane.b32.xlu2 %v3029_v15, %s3183_s0 }
0x183e   :  { %v1836_v13 = vpop.permute.xlu2 %1835 }
0x183f   :  { %v1838_v5 = vmul.f32 %v1836_v13, %v1819_v48 }
0x1841   :  { %v4121_v36 = vsel %vm4442_vm13, %v1838_v5, %v4062_v8  ;;  %v1534_v8 = vadd.f32 %v4027_v60, %v4017_v61 }
0x1842   :  { %1883 = vrot.lane.b32.xlu1 %v4121_v36, %s3184_s2 }
0x1844   :  { %v1875_v37 = vpop.permute.xlu0 %1874 }
0x1845   :  { %v1877_v34 = vmul.f32 %v1875_v37, %v1858_v31 }
0x1847   :  { %v4128_v16 = vsel %vm604_vm8, %v1877_v34, %v4068_v10 }
0x1848   :  { %1887 = vrot.lane.b32.xlu2 %v4128_v16, %s3183_s0 }
0x18a2   :  { %v1888_v45 = vpop.permute.xlu2 %1887 }
0x18b4   :  { %v1884_v56 = vpop.permute.xlu1 %1883 }
0x18b5   :  { %v1890_v20 = vsel %vm182_vm9, %v1884_v56, %v1888_v45 }
0x18b6   :  { %2830 = vmatmul.msk.f32.vlgmr.msra.gmra.mxu0 %vm100_vm0, %v1890_v20  ;;  %2831 = vmatmul.msk.f32.vlgmr.msrb.gmra.mxu3 %vm100_vm0, %v1890_v20 }
0x18b7   :  { %2304 = vmatpush.msra.mxu0 %v3877_v63  ;;  %2324 = vmatpush.msrb.mxu3 %v3943_v21 }
0x18b9   :  { %2305 = vmatpush.msra.mxu0 %v3880_v54  ;;  %2325 = vmatpush.msrb.mxu3 %v3945_v59 }
0x18bb   :  { %2306 = vmatpush.msra.mxu0 %v3882_v58  ;;  %2326 = vmatpush.msrb.mxu3 %v3949_v38 }
0x18bd   :  { %2307 = vmatpush.msra.mxu0 %v3894_v27  ;;  %2327 = vmatpush.msrb.mxu3 %v3960_v25 }
0x18bf   :  { %2308 = vmatpush.msra.mxu0 %v3896_v33  ;;  %2328 = vmatpush.msrb.mxu3 %v3962_v41 }
0x18c1   :  { %2309 = vmatpush.msra.mxu0 %v3899_v11  ;;  %2329 = vmatpush.msrb.mxu3 %v3966_v51 }
0x18c3   :  { %2310 = vmatpush.msra.mxu0 %v3902_v43  ;;  %2330 = vmatpush.msrb.mxu3 %v3971_v1 }
0x18c5   :  { %2311 = vmatpush.msra.mxu0 %v3906_v57  ;;  %2331 = vmatpush.msrb.mxu3 %v3980_v3 }
0x1933   :  { %v1911_v10 = vpop.f32.mrf.mxu0 }
0x1934   :  { %v1934_v31 = vadd.f32 %v1911_v10, %v1534_v8 }
0x1936   :  { %3030 = vtanh.f32 %v1934_v31  ;;  %v2832_v48 = vmul.f32 -1.442695, %v1934_v31 }
0x1939   :  { %v1931_v40 = vpop.f32.mrf.mxu3 }
0x193a   :  { %v1935_v47 = vadd.f32 %v1931_v40, %v4042_v28 }
0x193c   :  { %v3031_v62 = vpop.eup %3030  ;;  %3032 = vtanh.f32 %v1935_v47  ;;  %v2833_v17 = vmul.f32 -1.442695, %v1935_v47 }
0x193d   :  { %1958 = vrot.lane.b32.xlu0 %v3031_v62, %s3183_s0  ;;  %3034 = vpow2.f32 %v2832_v48 }
0x193e   :  { %3036 = vpow2.f32 %v2833_v17 }
0x1942   :  { %v3033_v49 = vpop.eup %3032 }
0x1943   :  { %1997 = vrot.lane.b32.xlu1 %v3033_v49, %s3183_s0  ;;  %v3035_v4 = vpop.eup %3034 }
0x1944   :  { %v1939_v39 = vadd.f32 1.0, %v3035_v4  ;;  %v3037_v60 = vpop.eup %3036 }
0x1945   :  { %v1978_v2 = vadd.f32 1.0, %v3037_v60 }
0x1946   :  { %3038 = vrcp.f32 %v1939_v39  ;;  %v1951_v45 = vand.u32 2147483648, %v1939_v39  ;;  %vm1945_vm15 = vweird.f32 %v1939_v39  ;;  %v1949_v56 = vand.u32 2147483647, %v1939_v39 }
0x1947   :  { %3040 = vrcp.f32 %v1978_v2  ;;  %v1990_v62 = vand.u32 2147483648, %v1978_v2  ;;  %vm1984_vm3 = vweird.f32 %v1978_v2  ;;  %v1988_v48 = vand.u32 2147483647, %v1978_v2 }
0x1948   :  { %v1952_v10 = vor.u32 1.1754944e-38, %v1951_v45  ;;  %vm1950_vm6 = vcmp.eq.f32.partialorder %v1949_v56, 8.507059e+37 }
0x1949   :  { %v1991_v4 = vor.u32 1.1754944e-38, %v1990_v62  ;;  %vm1989_vm10 = vcmp.eq.f32.partialorder %v1988_v48, 8.507059e+37 }
0x194c   :  { %v3039_v6 = vpop.eup %3038 }
0x194d   :  { %v1941_v24 = vmul.f32 %v3039_v6, %v1939_v39  ;;  %v3041_v28 = vpop.eup %3040  ;;  %vm1946_vm14 = vweird.f32 %v3039_v6 }
0x194e   :  { %v1980_v13 = vmul.f32 %v3041_v28, %v1978_v2  ;;  %vm1947_vm5 = vmor %vm1945_vm15, %vm1946_vm14  ;;  %vm1985_vm4 = vweird.f32 %v3041_v28 }
0x194f   :  { %v1942_v15 = vsub.f32 1.0, %v1941_v24  ;;  %vm1986_vm7 = vmor %vm1984_vm3, %vm1985_vm4 }
0x1950   :  { %v1981_v37 = vsub.f32 1.0, %v1980_v13 }
0x1951   :  { %v1943_v5 = vmul.f32 %v3039_v6, %v1942_v15 }
0x1952   :  { %v1982_v20 = vmul.f32 %v3041_v28, %v1981_v37 }
0x1953   :  { %v1944_v34 = vadd.f32 %v3039_v6, %v1943_v5  ;;  %v4173_v5 = vsel %vm604_vm8, %v4104_v46, %v4101_v52 }
0x1954   :  { %v1983_v31 = vadd.f32 %v3041_v28, %v1982_v20 }
0x1955   :  { %v1948_v8 = vsel %vm1947_vm5, %v3039_v6, %v1944_v34  ;;  %v4162_v6 = vsel %vm4442_vm13, %v4114_v30, %v4111_v50 }
0x1956   :  { %v1953_v47 = vsel %vm1950_vm6, %v1952_v10, %v1948_v8  ;;  %v1987_v17 = vsel %vm1986_vm7, %v3041_v28, %v1983_v31 }
0x1957   :  { %v1992_v60 = vsel %vm1989_vm10, %v1991_v4, %v1987_v17  ;;  %v1956_v15 = vmul.f32 %v1953_v47, %v4162_v6 }
0x1958   :  { %v1995_v37 = vmul.f32 %v1992_v60, %v4173_v5 }
0x19af   :  { %v1959_v40 = vpop.permute.xlu0 %1958 }
0x19b0   :  { %v1961_v49 = vmul.f32 %v1959_v40, %v1953_v47 }
0x19b2   :  { %1963 = vrot.lane.b32.xlu2 %v1961_v49, %s3184_s2 }
0x19b5   :  { %v1998_v39 = vpop.permute.xlu1 %1997 }
0x19b6   :  { %v2000_v24 = vmul.f32 %v1998_v39, %v1992_v60 }
0x19b8   :  { %2002 = vrot.lane.b32.xlu0 %v2000_v24, %s3184_s2 }
0x1a0c   :  { %v1964_v2 = vpop.permute.xlu2 %1963 }
0x1a0d   :  { %v4165_v13 = vadd.f32 %v1964_v2, %v1956_v15 }
0x1a0f   :  { %3042 = vtanh.f32 %v4165_v13 }
0x1a15   :  { %v3043_v28 = vpop.eup %3042 }
0x1a16   :  { %1969 = vrot.lane.b32.xlu1 %v3043_v28, %s3183_s0 }
0x1a2a   :  { %v2003_v50 = vpop.permute.xlu0 %2002 }
0x1a2b   :  { %v4176_v30 = vadd.f32 %v2003_v50, %v1995_v37 }
0x1a2d   :  { %3044 = vtanh.f32 %v4176_v30 }
0x1a33   :  { %v3045_v34 = vpop.eup %3044 }
0x1a34   :  { %2008 = vrot.lane.b32.xlu2 %v3045_v34, %s3183_s0 }
0x1a88   :  { %v1970_v45 = vpop.permute.xlu1 %1969 }
0x1a89   :  { %v1972_v56 = vmul.f32 %v1970_v45, %v1953_v47 }
0x1a8b   :  { %v4183_v20 = vsel %vm707_vm11, %v1972_v56, %v4121_v36 }
0x1a8c   :  { %2017 = vrot.lane.b32.xlu0 %v4183_v20, %s3184_s2 }
0x1a8e   :  { %v2009_v52 = vpop.permute.xlu2 %2008 }
0x1a8f   :  { %v2011_v46 = vmul.f32 %v2009_v52, %v1992_v60  ;;  %v4224_v52 = vsel %vm707_vm11, %v4165_v13, %v4162_v6 }
0x1a91   :  { %v4190_v8 = vsel %vm752_vm12, %v2011_v46, %v4128_v16 }
0x1a92   :  { %2021 = vrot.lane.b32.xlu1 %v4190_v8, %s3183_s0 }
0x1afe   :  { %v2018_v10 = vpop.permute.xlu0 %2017 }
0x1b04   :  { %v2022_v31 = vpop.permute.xlu1 %2021 }
0x1b05   :  { %v2024_v40 = vsel %vm182_vm9, %v2018_v10, %v2022_v31 }
0x1b06   :  { %2834 = vmatmul.msk.f32.vlgmr.msrb.gmra.mxu0 %vm100_vm0, %v2024_v40  ;;  %2835 = vmatmul.msk.f32.vlgmr.msra.gmra.mxu3 %vm100_vm0, %v2024_v40  ;;  %v4234_v40 = vsel %vm752_vm12, %v4176_v30, %v4173_v5 }
0x1b07   :  { %2572 = vmatpush.msrb.mxu0 %v3877_v63  ;;  %2592 = vmatpush.msra.mxu3 %v3943_v21  ;;  %v1537_v63 = vadd.f32 %v4031_v19, %v4017_v61 }
0x1b09   :  { %2573 = vmatpush.msrb.mxu0 %v3880_v54  ;;  %2593 = vmatpush.msra.mxu3 %v3945_v59 }
0x1b0b   :  { %2574 = vmatpush.msrb.mxu0 %v3882_v58  ;;  %2594 = vmatpush.msra.mxu3 %v3949_v38 }
0x1b0d   :  { %2575 = vmatpush.msrb.mxu0 %v3894_v27  ;;  %2595 = vmatpush.msra.mxu3 %v3960_v25 }
0x1b0f   :  { %2576 = vmatpush.msrb.mxu0 %v3896_v33  ;;  %2596 = vmatpush.msra.mxu3 %v3962_v41 }
0x1b11   :  { %2577 = vmatpush.msrb.mxu0 %v3899_v11  ;;  %2597 = vmatpush.msra.mxu3 %v3966_v51 }
0x1b13   :  { %2578 = vmatpush.msrb.mxu0 %v3902_v43  ;;  %2598 = vmatpush.msra.mxu3 %v3971_v1 }
0x1b15   :  { %2579 = vmatpush.msrb.mxu0 %v3906_v57  ;;  %2599 = vmatpush.msra.mxu3 %v3980_v3 }
0x1b83   :  { %v2045_v54 = vpop.f32.mrf.mxu0 }
0x1b84   :  { %v2068_v58 = vadd.f32 %v2045_v54, %v1537_v63 }
0x1b86   :  { %3046 = vtanh.f32 %v2068_v58  ;;  %v2836_v21 = vmul.f32 -1.442695, %v2068_v58 }
0x1b89   :  { %v2065_v27 = vpop.f32.mrf.mxu3 }
0x1b8a   :  { %v2069_v33 = vadd.f32 %v2065_v27, %v4037_v18 }
0x1b8c   :  { %v3047_v11 = vpop.eup %3046  ;;  %3048 = vtanh.f32 %v2069_v33  ;;  %v2837_v41 = vmul.f32 -1.442695, %v2069_v33 }
0x1b8d   :  { %2092 = vrot.lane.b32.xlu2 %v3047_v11, %s3183_s0  ;;  %3050 = vpow2.f32 %v2836_v21 }
0x1b92   :  { %v3049_v43 = vpop.eup %3048 }
0x1b93   :  { %2131 = vrot.lane.b32.xlu0 %v3049_v43, %s3183_s0  ;;  %v3051_v57 = vpop.eup %3050 }
0x1b94   :  { %v2073_v59 = vadd.f32 1.0, %v3051_v57 }
0x1b96   :  { %3052 = vrcp.f32 %v2073_v59  ;;  %v2085_v19 = vand.u32 2147483648, %v2073_v59  ;;  %vm2079_vm15 = vweird.f32 %v2073_v59  ;;  %v2083_v36 = vand.u32 2147483647, %v2073_v59 }
0x1b97   :  { %3054 = vpow2.f32 %v2837_v41 }
0x1b98   :  { %v2086_v62 = vor.u32 1.1754944e-38, %v2085_v19  ;;  %vm2084_vm6 = vcmp.eq.f32.partialorder %v2083_v36, 8.507059e+37 }
0x1b9c   :  { %v3053_v38 = vpop.eup %3052 }
0x1b9d   :  { %v2075_v25 = vmul.f32 %v3053_v38, %v2073_v59  ;;  %vm2080_vm14 = vweird.f32 %v3053_v38  ;;  %v3055_v18 = vpop.eup %3054 }
0x1b9e   :  { %vm2081_vm5 = vmor %vm2079_vm15, %vm2080_vm14  ;;  %v2112_v47 = vadd.f32 1.0, %v3055_v18 }
0x1b9f   :  { %v2076_v51 = vsub.f32 1.0, %v2075_v25 }
0x1ba0   :  { %3056 = vrcp.f32 %v2112_v47  ;;  %v2124_v2 = vand.u32 2147483648, %v2112_v47  ;;  %vm2118_vm3 = vweird.f32 %v2112_v47  ;;  %v2122_v28 = vand.u32 2147483647, %v2112_v47 }
0x1ba1   :  { %v2077_v1 = vmul.f32 %v3053_v38, %v2076_v51 }
0x1ba2   :  { %v2125_v50 = vor.u32 1.1754944e-38, %v2124_v2  ;;  %vm2123_vm10 = vcmp.eq.f32.partialorder %v2122_v28, 8.507059e+37 }
0x1ba3   :  { %v2078_v3 = vadd.f32 %v3053_v38, %v2077_v1 }
0x1ba5   :  { %v2082_v16 = vsel %vm2081_vm5, %v3053_v38, %v2078_v3  ;;  %v1540_v38 = vadd.f32 %v4035_v42, %v4017_v61 }
0x1ba6   :  { %v2087_v48 = vsel %vm2084_vm6, %v2086_v62, %v2082_v16  ;;  %v3057_v4 = vpop.eup %3056 }
0x1ba7   :  { %v2114_v39 = vmul.f32 %v3057_v4, %v2112_v47  ;;  %vm2119_vm4 = vweird.f32 %v3057_v4  ;;  %v2090_v46 = vmul.f32 %v2087_v48, %v4224_v52 }
0x1ba8   :  { %vm2120_vm7 = vmor %vm2118_vm3, %vm2119_vm4 }
0x1ba9   :  { %v2115_v60 = vsub.f32 1.0, %v2114_v39 }
0x1bab   :  { %v2116_v24 = vmul.f32 %v3057_v4, %v2115_v60 }
0x1bad   :  { %v2117_v15 = vadd.f32 %v3057_v4, %v2116_v24 }
0x1baf   :  { %v2121_v37 = vsel %vm2120_vm7, %v3057_v4, %v2117_v15 }
0x1bb0   :  { %v2126_v45 = vsel %vm2123_vm10, %v2125_v50, %v2121_v37 }
0x1bb1   :  { %v2129_v63 = vmul.f32 %v2126_v45, %v4234_v40 }
0x1be7   :  { %v2093_v49 = vpop.permute.xlu2 %2092 }
0x1be8   :  { %v2095_v17 = vmul.f32 %v2093_v49, %v2087_v48 }
0x1bea   :  { %2097 = vrot.lane.b32.xlu1 %v2095_v17, %s3184_s2 }
0x1c05   :  { %v2132_v34 = vpop.permute.xlu0 %2131 }
0x1c06   :  { %v2134_v56 = vmul.f32 %v2132_v34, %v2126_v45 }
0x1c08   :  { %2136 = vrot.lane.b32.xlu2 %v2134_v56, %s3184_s2 }
0x1c5c   :  { %v2098_v10 = vpop.permute.xlu1 %2097 }
0x1c5d   :  { %v4227_v31 = vadd.f32 %v2098_v10, %v2090_v46 }
0x1c5f   :  { %3058 = vtanh.f32 %v4227_v31 }
0x1c62   :  { %v2137_v54 = vpop.permute.xlu2 %2136 }
0x1c63   :  { %v4237_v58 = vadd.f32 %v2137_v54, %v2129_v63 }
0x1c65   :  { %v3059_v6 = vpop.eup %3058  ;;  %3060 = vtanh.f32 %v4237_v58 }
0x1c66   :  { %2103 = vrot.lane.b32.xlu0 %v3059_v6, %s3183_s0 }
0x1c6b   :  { %v3061_v13 = vpop.eup %3060 }
0x1c6c   :  { %2142 = vrot.lane.b32.xlu1 %v3061_v13, %s3183_s0 }
0x1cd8   :  { %v2104_v27 = vpop.permute.xlu0 %2103 }
0x1cd9   :  { %v2106_v33 = vmul.f32 %v2104_v27, %v2087_v48 }
0x1cdb   :  { %v4245_v5 = vsel %vm855_vm1, %v2106_v33, %v4183_v20  ;;  %v4259_v20 = vpop.f32.mrf.mxu1  ;;  %v4272_v33 = vsel %vm900_vm2, %v4237_v58, %v4234_v40 }
0x1cdc   :  { %2151 = vrot.lane.b32.xlu2 %v4245_v5, %s3184_s2 }
0x1cde   :  { %v2143_v30 = vpop.permute.xlu1 %2142 }
0x1cdf   :  { %v2145_v11 = vmul.f32 %v2143_v30, %v2126_v45 }
0x1ce1   :  { %v4252_v43 = vsel %vm900_vm2, %v2145_v11, %v4190_v8 }
0x1ce2   :  { %2155 = vrot.lane.b32.xlu0 %v4252_v43, %s3183_s0 }
0x1d36   :  { %v2152_v21 = vpop.permute.xlu2 %2151 }
0x1d54   :  { %v2156_v57 = vpop.permute.xlu0 %2155 }
0x1d55   :  { %v2158_v59 = vsel %vm182_vm9, %v2152_v21, %v2156_v57 }
0x1d56   :  { %2838 = vmatmul.msk.f32.vlgmr.msrb.gmra.mxu1 %vm100_vm0, %v2158_v59  ;;  %2839 = vmatmul.msk.f32.vlgmr.msra.gmra.mxu2 %vm100_vm0, %v2158_v59  ;;  %v4283_v59 = vsel %vm855_vm1, %v4227_v31, %v4224_v52 }
0x1dd3   :  { %v2179_v25 = vpop.f32.mrf.mxu1 }
0x1dd4   :  { %v2202_v41 = vadd.f32 %v2179_v25, %v1540_v38 }
0x1dd6   :  { %3062 = vtanh.f32 %v2202_v41  ;;  %v2840_v16 = vmul.f32 -1.442695, %v2202_v41 }
0x1dd9   :  { %v2199_v8 = vpop.f32.mrf.mxu2 }
0x1dda   :  { %v2203_v51 = vadd.f32 %v2199_v8, %v4033_v22 }
0x1ddc   :  { %v3063_v1 = vpop.eup %3062  ;;  %3064 = vtanh.f32 %v2203_v51  ;;  %v2841_v19 = vmul.f32 -1.442695, %v2203_v51 }
0x1ddd   :  { %2226 = vrot.lane.b32.xlu1 %v3063_v1, %s3183_s0 }
0x1dde   :  { %3066 = vpow2.f32 %v2841_v19 }
0x1de2   :  { %v3065_v3 = vpop.eup %3064 }
0x1de3   :  { %2265 = vrot.lane.b32.xlu2 %v3065_v3, %s3183_s0 }
0x1de4   :  { %v3067_v18 = vpop.eup %3066 }
0x1de5   :  { %v2246_v36 = vadd.f32 1.0, %v3067_v18 }
0x1de7   :  { %3068 = vrcp.f32 %v2246_v36  ;;  %v2258_v4 = vand.u32 2147483648, %v2246_v36  ;;  %vm2252_vm14 = vweird.f32 %v2246_v36  ;;  %v2256_v39 = vand.u32 2147483647, %v2246_v36 }
0x1de8   :  { %3070 = vpow2.f32 %v2840_v16 }
0x1de9   :  { %v2259_v15 = vor.u32 1.1754944e-38, %v2258_v4  ;;  %vm2257_vm5 = vcmp.eq.f32.partialorder %v2256_v39, 8.507059e+37 }
0x1ded   :  { %v3069_v42 = vpop.eup %3068 }
0x1dee   :  { %v2248_v47 = vmul.f32 %v3069_v42, %v2246_v36  ;;  %v3071_v62 = vpop.eup %3070  ;;  %vm2253_vm13 = vweird.f32 %v3069_v42 }
0x1def   :  { %v2207_v48 = vadd.f32 1.0, %v3071_v62  ;;  %vm2254_vm15 = vmor %vm2252_vm14, %vm2253_vm13 }
0x1df0   :  { %v2249_v49 = vsub.f32 1.0, %v2248_v47 }
0x1df1   :  { %3072 = vrcp.f32 %v2207_v48  ;;  %v2219_v46 = vand.u32 2147483648, %v2207_v48  ;;  %vm2213_vm4 = vweird.f32 %v2207_v48  ;;  %v2217_v10 = vand.u32 2147483647, %v2207_v48 }
0x1df2   :  { %v2250_v22 = vmul.f32 %v3069_v42, %v2249_v49 }
0x1df3   :  { %v2220_v54 = vor.u32 1.1754944e-38, %v2219_v46  ;;  %vm2218_vm7 = vcmp.eq.f32.partialorder %v2217_v10, 8.507059e+37 }
0x1df4   :  { %v2251_v17 = vadd.f32 %v3069_v42, %v2250_v22 }
0x1df6   :  { %v2255_v24 = vsel %vm2254_vm15, %v3069_v42, %v2251_v17 }
0x1df7   :  { %v3073_v60 = vpop.eup %3072  ;;  %v2260_v37 = vsel %vm2257_vm5, %v2259_v15, %v2255_v24 }
0x1df8   :  { %v2209_v2 = vmul.f32 %v3073_v60, %v2207_v48  ;;  %vm2214_vm6 = vweird.f32 %v3073_v60  ;;  %v2263_v30 = vmul.f32 %v2260_v37, %v4272_v33 }
0x1df9   :  { %vm2215_vm3 = vmor %vm2213_vm4, %vm2214_vm6 }
0x1dfa   :  { %v2210_v34 = vsub.f32 1.0, %v2209_v2 }
0x1dfc   :  { %v2211_v45 = vmul.f32 %v3073_v60, %v2210_v34 }
0x1dfe   :  { %v2212_v56 = vadd.f32 %v3073_v60, %v2211_v45 }
0x1e00   :  { %v2216_v63 = vsel %vm2215_vm3, %v3073_v60, %v2212_v56 }
0x1e01   :  { %v2221_v13 = vsel %vm2218_vm7, %v2220_v54, %v2216_v63 }
0x1e02   :  { %v2224_v38 = vmul.f32 %v2221_v13, %v4283_v59 }
0x1e3d   :  { %v2266_v28 = vpop.permute.xlu2 %2265 }
0x1e3e   :  { %v2268_v50 = vmul.f32 %v2266_v28, %v2260_v37 }
0x1e40   :  { %2270 = vrot.lane.b32.xlu1 %v2268_v50, %s3184_s2 }
0x1e4f   :  { %v2227_v6 = vpop.permute.xlu1 %2226 }
0x1e50   :  { %v2229_v27 = vmul.f32 %v2227_v6, %v2221_v13 }
0x1e52   :  { %2231 = vrot.lane.b32.xlu0 %v2229_v27, %s3184_s2 }
0x1eb2   :  { %v2271_v11 = vpop.permute.xlu1 %2270 }
0x1eb3   :  { %v4275_v21 = vadd.f32 %v2271_v11, %v2263_v30 }
0x1eb5   :  { %3074 = vtanh.f32 %v4275_v21 }
0x1ebb   :  { %v3075_v57 = vpop.eup %3074 }
0x1ebc   :  { %2276 = vrot.lane.b32.xlu0 %v3075_v57, %s3183_s0 }
0x1ec4   :  { %v2232_v40 = vpop.permute.xlu0 %2231 }
0x1ec5   :  { %v4286_v58 = vadd.f32 %v2232_v40, %v2224_v38 }
0x1ec7   :  { %3076 = vtanh.f32 %v4286_v58  ;;  %v4317_v40 = vsel %vm900_vm2, %v4286_v58, %v4283_v59 }
0x1ecd   :  { %v3077_v25 = vpop.eup %3076 }
0x1ece   :  { %2237 = vrot.lane.b32.xlu2 %v3077_v25, %s3183_s0 }
0x1f28   :  { %v2238_v41 = vpop.permute.xlu2 %2237 }
0x1f29   :  { %v2240_v8 = vmul.f32 %v2238_v41, %v2221_v13 }
0x1f2b   :  { %v4293_v51 = vsel %vm900_vm2, %v2240_v8, %v4245_v5 }
0x1f2c   :  { %2285 = vrot.lane.b32.xlu1 %v4293_v51, %s3184_s2 }
0x1f2e   :  { %v2277_v52 = vpop.permute.xlu0 %2276 }
0x1f2f   :  { %v2279_v31 = vmul.f32 %v2277_v52, %v2260_v37 }
0x1f31   :  { %v4300_v1 = vsel %vm855_vm1, %v2279_v31, %v4252_v43  ;;  %v4328_v31 = vsel %vm855_vm1, %v4275_v21, %v4272_v33 }
0x1f32   :  { %2289 = vrot.lane.b32.xlu2 %v4300_v1, %s3183_s0 }
0x1f8c   :  { %v2290_v3 = vpop.permute.xlu2 %2289 }
0x1f9e   :  { %v2286_v19 = vpop.permute.xlu1 %2285 }
0x1f9f   :  { %v2292_v18 = vsel %vm182_vm9, %v2286_v19, %v2290_v3 }
0x1fa0   :  { %2842 = vmatmul.msk.f32.vlgmr.msra.gmra.mxu0 %vm100_vm0, %v2292_v18  ;;  %2843 = vmatmul.msk.f32.vlgmr.msrb.gmra.mxu3 %vm100_vm0, %v2292_v18 }
0x201d   :  { %v2313_v5 = vpop.f32.mrf.mxu0 }
0x201e   :  { %v2336_v36 = vadd.f32 %v2313_v5, %v4040_v23 }
0x2020   :  { %3078 = vtanh.f32 %v2336_v36  ;;  %v2844_v62 = vmul.f32 -1.442695, %v2336_v36 }
0x2023   :  { %v2333_v16 = vpop.f32.mrf.mxu3 }
0x2024   :  { %v2337_v42 = vadd.f32 %v2333_v16, %v4029_v14 }
0x2026   :  { %v3079_v43 = vpop.eup %3078  ;;  %3080 = vtanh.f32 %v2337_v42  ;;  %v2845_v49 = vmul.f32 -1.442695, %v2337_v42 }
0x2027   :  { %2360 = vrot.lane.b32.xlu0 %v3079_v43, %s3183_s0  ;;  %3082 = vpow2.f32 %v2844_v62 }
0x2028   :  { %3084 = vpow2.f32 %v2845_v49 }
0x202c   :  { %v3081_v47 = vpop.eup %3080 }
0x202d   :  { %2399 = vrot.lane.b32.xlu1 %v3081_v47, %s3183_s0  ;;  %v3083_v48 = vpop.eup %3082 }
0x202e   :  { %v2341_v22 = vadd.f32 1.0, %v3083_v48  ;;  %v3085_v17 = vpop.eup %3084 }
0x202f   :  { %v2380_v23 = vadd.f32 1.0, %v3085_v17 }
0x2030   :  { %3086 = vrcp.f32 %v2341_v22  ;;  %v2353_v37 = vand.u32 2147483648, %v2341_v22  ;;  %vm2347_vm13 = vweird.f32 %v2341_v22  ;;  %v2351_v50 = vand.u32 2147483647, %v2341_v22 }
0x2031   :  { %3088 = vrcp.f32 %v2380_v23  ;;  %v2392_v54 = vand.u32 2147483648, %v2380_v23  ;;  %vm2386_vm6 = vweird.f32 %v2380_v23  ;;  %v2390_v13 = vand.u32 2147483647, %v2380_v23 }
0x2032   :  { %v2354_v56 = vor.u32 1.1754944e-38, %v2353_v37  ;;  %vm2352_vm15 = vcmp.eq.f32.partialorder %v2351_v50, 8.507059e+37 }
0x2033   :  { %v2393_v30 = vor.u32 1.1754944e-38, %v2392_v54  ;;  %vm2391_vm3 = vcmp.eq.f32.partialorder %v2390_v13, 8.507059e+37 }
0x2036   :  { %v3087_v4 = vpop.eup %3086 }
0x2037   :  { %v2343_v39 = vmul.f32 %v3087_v4, %v2341_v22  ;;  %v3089_v14 = vpop.eup %3088  ;;  %vm2348_vm10 = vweird.f32 %v3087_v4 }
0x2038   :  { %v2382_v24 = vmul.f32 %v3089_v14, %v2380_v23  ;;  %vm2349_vm14 = vmor %vm2347_vm13, %vm2348_vm10  ;;  %vm2387_vm5 = vweird.f32 %v3089_v14 }
0x2039   :  { %v2344_v60 = vsub.f32 1.0, %v2343_v39  ;;  %vm2388_vm4 = vmor %vm2386_vm6, %vm2387_vm5 }
0x203a   :  { %v2383_v2 = vsub.f32 1.0, %v2382_v24 }
0x203b   :  { %v2345_v15 = vmul.f32 %v3087_v4, %v2344_v60 }
0x203c   :  { %v2384_v34 = vmul.f32 %v3089_v14, %v2383_v2 }
0x203d   :  { %v2346_v28 = vadd.f32 %v3087_v4, %v2345_v15 }
0x203e   :  { %v2385_v46 = vadd.f32 %v3089_v14, %v2384_v34 }
0x203f   :  { %v2350_v45 = vsel %vm2349_vm14, %v3087_v4, %v2346_v28 }
0x2040   :  { %v2355_v63 = vsel %vm2352_vm15, %v2354_v56, %v2350_v45  ;;  %v2389_v27 = vsel %vm2388_vm4, %v3089_v14, %v2385_v46 }
0x2041   :  { %v2394_v57 = vsel %vm2391_vm3, %v2393_v30, %v2389_v27  ;;  %v2358_v25 = vmul.f32 %v2355_v63, %v4317_v40 }
0x2042   :  { %v2397_v0 = vmul.f32 %v2394_v57, %v4328_v31 }
0x2099   :  { %v2361_v10 = vpop.permute.xlu0 %2360 }
0x209a   :  { %v2363_v6 = vmul.f32 %v2361_v10, %v2355_v63 }
0x209c   :  { %2365 = vrot.lane.b32.xlu2 %v2363_v6, %s3184_s2 }
0x209f   :  { %v2400_v11 = vpop.permute.xlu1 %2399 }
0x20a0   :  { %v2402_v38 = vmul.f32 %v2400_v11, %v2394_v57 }
0x20a2   :  { %2404 = vrot.lane.b32.xlu0 %v2402_v38, %s3184_s2 }
0x20f6   :  { %v2366_v41 = vpop.permute.xlu2 %2365 }
0x20f7   :  { %v4320_v8 = vadd.f32 %v2366_v41, %v2358_v25 }
0x20f9   :  { %3090 = vtanh.f32 %v4320_v8  ;;  %v4362_v25 = vsel %vm752_vm12, %v4320_v8, %v4317_v40 }
0x20ff   :  { %v3091_v52 = vpop.eup %3090 }
0x2100   :  { %2371 = vrot.lane.b32.xlu1 %v3091_v52, %s3183_s0 }
0x2114   :  { %v2405_v59 = vpop.permute.xlu0 %2404 }
0x2115   :  { %v4331_v58 = vadd.f32 %v2405_v59, %v2397_v0 }
0x2117   :  { %3092 = vtanh.f32 %v4331_v58  ;;  %v4372_v59 = vsel %vm707_vm11, %v4331_v58, %v4328_v31 }
0x211d   :  { %v3093_v3 = vpop.eup %3092 }
0x211e   :  { %2410 = vrot.lane.b32.xlu2 %v3093_v3, %s3183_s0 }
0x2172   :  { %v2372_v19 = vpop.permute.xlu1 %2371 }
0x2173   :  { %v2374_v18 = vmul.f32 %v2372_v19, %v2355_v63 }
0x2175   :  { %v4338_v5 = vsel %vm752_vm12, %v2374_v18, %v4293_v51 }
0x2176   :  { %2419 = vrot.lane.b32.xlu0 %v4338_v5, %s3184_s2 }
0x2178   :  { %v2411_v55 = vpop.permute.xlu2 %2410 }
0x2179   :  { %v2413_v33 = vmul.f32 %v2411_v55, %v2394_v57 }
0x217b   :  { %v4345_v21 = vsel %vm707_vm11, %v2413_v33, %v4300_v1  ;;  %vm4443_vm11 = vcmp.eq.s32.totalorder %v3545_v9, 1 }
0x217c   :  { %2423 = vrot.lane.b32.xlu1 %v4345_v21, %s3183_s0 }
0x21e8   :  { %v2420_v36 = vpop.permute.xlu0 %2419 }
0x21ee   :  { %v2424_v16 = vpop.permute.xlu1 %2423 }
0x21ef   :  { %v2426_v42 = vsel %vm182_vm9, %v2420_v36, %v2424_v16 }
0x21f0   :  { %2846 = vmatmul.msk.f32.vlgmr.msra.gmra.mxu1 %vm100_vm0, %v2426_v42  ;;  %2847 = vmatmul.msk.f32.vlgmr.msrb.gmra.mxu2 %vm100_vm0, %v2426_v42 }
0x226d   :  { %v2447_v51 = vpop.f32.mrf.mxu1 }
0x226e   :  { %v2470_v43 = vadd.f32 %v2447_v51, %v4045_v35 }
0x2270   :  { %3094 = vtanh.f32 %v2470_v43  ;;  %v2848_v48 = vmul.f32 -1.442695, %v2470_v43 }
0x2273   :  { %v2467_v47 = vpop.f32.mrf.mxu2 }
0x2274   :  { %v2471_v62 = vadd.f32 %v2467_v47, %v4025_v29 }
0x2276   :  { %v3095_v1 = vpop.eup %3094  ;;  %3096 = vtanh.f32 %v2471_v62  ;;  %v2849_v39 = vmul.f32 -1.442695, %v2471_v62 }
0x2277   :  { %2494 = vrot.lane.b32.xlu2 %v3095_v1, %s3183_s0  ;;  %3098 = vpow2.f32 %v2848_v48 }
0x227c   :  { %v3097_v49 = vpop.eup %3096 }
0x227d   :  { %2533 = vrot.lane.b32.xlu0 %v3097_v49, %s3183_s0  ;;  %v3099_v22 = vpop.eup %3098 }
0x227e   :  { %v2475_v17 = vadd.f32 1.0, %v3099_v22 }
0x2280   :  { %3100 = vrcp.f32 %v2475_v17  ;;  %v2487_v29 = vand.u32 2147483648, %v2475_v17  ;;  %vm2481_vm2 = vweird.f32 %v2475_v17  ;;  %v2485_v15 = vand.u32 2147483647, %v2475_v17 }
0x2281   :  { %3102 = vpow2.f32 %v2849_v39 }
0x2282   :  { %v2488_v37 = vor.u32 1.1754944e-38, %v2487_v29  ;;  %vm2486_vm10 = vcmp.eq.f32.partialorder %v2485_v15, 8.507059e+37 }
0x2286   :  { %v3101_v23 = vpop.eup %3100 }
0x2287   :  { %v2477_v4 = vmul.f32 %v3101_v23, %v2475_v17  ;;  %vm2482_vm1 = vweird.f32 %v3101_v23  ;;  %v3103_v24 = vpop.eup %3102 }
0x2288   :  { %vm2483_vm7 = vmor %vm2481_vm2, %vm2482_vm1  ;;  %v2514_v28 = vadd.f32 1.0, %v3103_v24 }
0x2289   :  { %v2478_v35 = vsub.f32 1.0, %v2477_v4 }
0x228a   :  { %3104 = vrcp.f32 %v2514_v28  ;;  %v2526_v6 = vand.u32 2147483648, %v2514_v28  ;;  %vm2520_vm14 = vweird.f32 %v2514_v28  ;;  %v2524_v13 = vand.u32 2147483647, %v2514_v28 }
0x228b   :  { %v2479_v14 = vmul.f32 %v3101_v23, %v2478_v35 }
0x228c   :  { %v2527_v30 = vor.u32 1.1754944e-38, %v2526_v6  ;;  %vm2525_vm5 = vcmp.eq.f32.partialorder %v2524_v13, 8.507059e+37 }
0x228d   :  { %v2480_v60 = vadd.f32 %v3101_v23, %v2479_v14 }
0x228f   :  { %v2484_v2 = vsel %vm2483_vm7, %v3101_v23, %v2480_v60 }
0x2290   :  { %v2489_v34 = vsel %vm2486_vm10, %v2488_v37, %v2484_v2  ;;  %v3105_v56 = vpop.eup %3104 }
0x2291   :  { %v2516_v46 = vmul.f32 %v3105_v56, %v2514_v28  ;;  %vm2521_vm13 = vweird.f32 %v3105_v56  ;;  %v2492_v41 = vmul.f32 %v2489_v34, %v4362_v25 }
0x2292   :  { %vm2522_vm15 = vmor %vm2520_vm14, %vm2521_vm13  ;;  %vm4445_vm14 = vcmp.eq.s32.totalorder %v3484_v12, 1  ;;  %v2693_v12 = vld [vmem:[#allocation4 + $0x200] sm:$0xff] }
0x2293   :  { %v2517_v10 = vsub.f32 1.0, %v2516_v46  ;;  %vm4444_vm13 = vmmov %vm4443_vm11 }
0x2295   :  { %v2518_v63 = vmul.f32 %v3105_v56, %v2517_v10 }
0x2297   :  { %v2519_v54 = vadd.f32 %v3105_v56, %v2518_v63 }
0x2299   :  { %v2523_v27 = vsel %vm2522_vm15, %v3105_v56, %v2519_v54  ;;  %vm2727_vm15 = vcmask 25600  }
0x229a   :  { %v2528_v57 = vsel %vm2525_vm5, %v2527_v30, %v2523_v27 }
0x229b   :  { %v2531_v3 = vmul.f32 %v2528_v57, %v4372_v59 }
0x22d1   :  { %v2495_v50 = vpop.permute.xlu2 %2494 }
0x22d2   :  { %v2497_v45 = vmul.f32 %v2495_v50, %v2489_v34 }
0x22d4   :  { %2499 = vrot.lane.b32.xlu1 %v2497_v45, %s3184_s2 }
0x22ef   :  { %v2534_v11 = vpop.permute.xlu0 %2533 }
0x22f0   :  { %v2536_v38 = vmul.f32 %v2534_v11, %v2528_v57 }
0x22f2   :  { %2538 = vrot.lane.b32.xlu2 %v2536_v38, %s3184_s2 }
0x2346   :  { %v2500_v52 = vpop.permute.xlu1 %2499 }
0x2347   :  { %v4365_v0 = vadd.f32 %v2500_v52, %v2492_v41 }
0x2349   :  { %3106 = vtanh.f32 %v4365_v0  ;;  %v2509_v52 = vsel %vm604_vm8, %v4365_v0, %v4362_v25  ;;  %v2698_v25 = vld [vmem:[#allocation4 + $0x250] sm:$0xff]  ;;  %v2697_v0 = vld [vmem:[#allocation4 + $0x240] sm:$0xff] }
0x234a   :  { %2715 = vmatpush.msrb.mxu1 %v2698_v25 }
0x234c   :  { %v2539_v19 = vpop.permute.xlu2 %2538  ;;  %2716 = vmatpush.msrb.mxu1 %v2697_v0 }
0x234d   :  { %v4375_v18 = vadd.f32 %v2539_v19, %v2531_v3 }
0x234f   :  { %v3107_v44 = vpop.eup %3106  ;;  %3108 = vtanh.f32 %v4375_v18  ;;  %v2548_v30 = vsel %vm4444_vm13, %v4375_v18, %v4372_v59 }
0x2350   :  { %2505 = vrot.lane.b32.xlu0 %v3107_v44, %s3183_s0 }
0x2355   :  { %v3109_v40 = vpop.eup %3108 }
0x2356   :  { %2544 = vrot.lane.b32.xlu1 %v3109_v40, %s3183_s0 }
0x23c2   :  { %v2506_v8 = vpop.permute.xlu0 %2505 }
0x23c3   :  { %v2508_v55 = vmul.f32 %v2506_v8, %v2489_v34 }
0x23c5   :  { %v4383_v32 = vsel %vm604_vm8, %v2508_v55, %v4338_v5  ;;  %v1549_v5 = vadd.f32 %v4259_v20, %v4017_v61  ;;  %vm4446_vm8 = vcmp.eq.s32.totalorder %v3475_v7, 1 }
0x23c6   :  { %2553 = vrot.lane.b32.xlu2 %v4383_v32, %s3184_s2 }
0x23c8   :  { %v2545_v31 = vpop.permute.xlu1 %2544 }
0x23c9   :  { %v2547_v58 = vmul.f32 %v2545_v31, %v2528_v57  ;;  %v2696_v31 = vld [vmem:[#allocation4 + $0x230] sm:$0xff] }
0x23ca   :  { %2717 = vmatpush.msrb.mxu1 %v2696_v31 }
0x23cb   :  { %v4390_v33 = vsel %vm4443_vm11, %v2547_v58, %v4345_v21  ;;  %v2695_v58 = vld [vmem:[#allocation4 + $0x220] sm:$0xff] }
0x23cc   :  { %2557 = vrot.lane.b32.xlu0 %v4390_v33, %s3183_s0  ;;  %2718 = vmatpush.msrb.mxu1 %v2695_v58 }
0x2420   :  { %v2554_v36 = vpop.permute.xlu2 %2553 }
0x243e   :  { %v2558_v16 = vpop.permute.xlu0 %2557 }
0x243f   :  { %v2560_v42 = vsel %vm182_vm9, %v2554_v36, %v2558_v16  ;;  %v2694_v36 = vld [vmem:[#allocation4 + $0x210] sm:$0xff]  ;;  %v2691_v16 = vld [vmem:[#allocation4 + $0x1e0] sm:$0xff] }
0x2440   :  { %2850 = vmatmul.msk.f32.vlgmr.msrb.gmra.mxu0 %vm100_vm0, %v2560_v42  ;;  %2851 = vmatmul.msk.f32.vlgmr.msra.gmra.mxu3 %vm100_vm0, %v2560_v42 }
0x2441   :  { %2719 = vmatpush.msrb.mxu1 %v2694_v36 }
0x2443   :  { %2720 = vmatpush.msrb.mxu1 %v2693_v12 }
0x24bd   :  { %v2581_v51 = vpop.f32.mrf.mxu0 }
0x24be   :  { %v2604_v43 = vadd.f32 %v2581_v51, %v1549_v5  ;;  %v2700_v5 = vld [vmem:[#allocation4 + $0x260] ss:$8 sm:$0x3] }
0x24bf   :  { %v2702_v51 = vperm.slane %v2700_v5, 0 }
0x24c0   :  { %3110 = vtanh.f32 %v2604_v43  ;;  %v2852_v17 = vmul.f32 -1.442695, %v2604_v43 }
0x24c3   :  { %v2601_v47 = vpop.f32.mrf.mxu3 }
0x24c4   :  { %v2605_v21 = vadd.f32 %v2601_v47, %v4020_v26 }
0x24c6   :  { %v3111_v62 = vpop.eup %3110  ;;  %3112 = vtanh.f32 %v2605_v21  ;;  %v2853_v49 = vmul.f32 -1.442695, %v2605_v21 }
0x24c7   :  { %2628 = vrot.lane.b32.xlu1 %v3111_v62, %s3183_s0 }
0x24c8   :  { %3114 = vpow2.f32 %v2853_v49 }
0x24cc   :  { %v3113_v1 = vpop.eup %3112 }
0x24cd   :  { %2666 = vrot.lane.b32.xlu2 %v3113_v1, %s3183_s0 }
0x24ce   :  { %v3115_v48 = vpop.eup %3114 }
0x24cf   :  { %v2647_v22 = vadd.f32 1.0, %v3115_v48 }
0x24d1   :  { %3116 = vrcp.f32 %v2647_v22  ;;  %v2659_v14 = vand.u32 2147483648, %v2647_v22  ;;  %vm2653_vm6 = vweird.f32 %v2647_v22  ;;  %v2657_v60 = vand.u32 2147483647, %v2647_v22 }
0x24d2   :  { %3118 = vpow2.f32 %v2852_v17 }
0x24d3   :  { %v2660_v15 = vor.u32 1.1754944e-38, %v2659_v14  ;;  %vm2658_vm3 = vcmp.eq.f32.partialorder %v2657_v60, 8.507059e+37 }
0x24d7   :  { %v3117_v61 = vpop.eup %3116 }
0x24d8   :  { %v2649_v20 = vmul.f32 %v3117_v61, %v2647_v22  ;;  %v3119_v23 = vpop.eup %3118  ;;  %vm2654_vm12 = vweird.f32 %v3117_v61 }
0x24d9   :  { %v2609_v39 = vadd.f32 1.0, %v3119_v23  ;;  %vm2655_vm4 = vmor %vm2653_vm6, %vm2654_vm12 }
0x24da   :  { %v2650_v4 = vsub.f32 1.0, %v2649_v20 }
0x24db   :  { %3120 = vrcp.f32 %v2609_v39  ;;  %v2621_v46 = vand.u32 2147483648, %v2609_v39  ;;  %vm2615_vm2 = vweird.f32 %v2609_v39  ;;  %v2619_v10 = vand.u32 2147483647, %v2609_v39 }
0x24dc   :  { %v2651_v26 = vmul.f32 %v3117_v61, %v2650_v4 }
0x24dd   :  { %v2622_v54 = vor.u32 1.1754944e-38, %v2621_v46  ;;  %vm2620_vm10 = vcmp.eq.f32.partialorder %v2619_v10, 8.507059e+37 }
0x24de   :  { %v2652_v35 = vadd.f32 %v3117_v61, %v2651_v26 }
0x24e0   :  { %v2656_v24 = vsel %vm2655_vm4, %v3117_v61, %v2652_v35 }
0x24e1   :  { %v3121_v29 = vpop.eup %3120  ;;  %v2661_v37 = vsel %vm2658_vm3, %v2660_v15, %v2656_v24 }
0x24e2   :  { %v2611_v2 = vmul.f32 %v3121_v29, %v2609_v39  ;;  %vm2616_vm1 = vweird.f32 %v3121_v29  ;;  %v2664_v11 = vmul.f32 %v2661_v37, %v2548_v30 }
0x24e3   :  { %vm2617_vm7 = vmor %vm2615_vm2, %vm2616_vm1 }
0x24e4   :  { %v2612_v34 = vsub.f32 1.0, %v2611_v2 }
0x24e6   :  { %v2613_v45 = vmul.f32 %v3121_v29, %v2612_v34 }
0x24e8   :  { %v2614_v56 = vadd.f32 %v3121_v29, %v2613_v45 }
0x24ea   :  { %v2618_v63 = vsel %vm2617_vm7, %v3121_v29, %v2614_v56 }
0x24eb   :  { %v2623_v13 = vsel %vm2620_vm10, %v2622_v54, %v2618_v63 }
0x24ec   :  { %v2626_v3 = vmul.f32 %v2623_v13, %v2509_v52 }
0x2527   :  { %v2667_v28 = vpop.permute.xlu2 %2666 }
0x2528   :  { %v2669_v50 = vmul.f32 %v2667_v28, %v2661_v37 }
0x252a   :  { %2671 = vrot.lane.b32.xlu1 %v2669_v50, %s3184_s2 }
0x2539   :  { %v2629_v6 = vpop.permute.xlu1 %2628 }
0x253a   :  { %v2631_v27 = vmul.f32 %v2629_v6, %v2623_v13 }
0x253c   :  { %2633 = vrot.lane.b32.xlu0 %v2631_v27, %s3184_s2 }
0x259c   :  { %v2672_v57 = vpop.permute.xlu1 %2671 }
0x259d   :  { %v2674_v38 = vadd.f32 %v2672_v57, %v2664_v11 }
0x259f   :  { %3122 = vtanh.f32 %v2674_v38 }
0x25a5   :  { %v3123_v41 = vpop.eup %3122 }
0x25a6   :  { %2677 = vrot.lane.b32.xlu0 %v3123_v41, %s3183_s0 }
0x25ae   :  { %v2634_v19 = vpop.permute.xlu0 %2633 }
0x25af   :  { %v2636_v44 = vadd.f32 %v2634_v19, %v2626_v3 }
0x25b1   :  { %3124 = vtanh.f32 %v2636_v44 }
0x25b7   :  { %v3125_v40 = vpop.eup %3124 }
0x25b8   :  { %2639 = vrot.lane.b32.xlu2 %v3125_v40, %s3183_s0 }
0x2612   :  { %v2640_v9 = vpop.permute.xlu2 %2639 }
0x2613   :  { %v2642_v59 = vmul.f32 %v2640_v9, %v2623_v13 }
0x2615   :  { %v2643_v18 = vsel %vm4445_vm14, %v2642_v59, %v4383_v32  ;;  %v2692_v32 = vld [vmem:[#allocation4 + $0x1f0] sm:$0xff] }
0x2616   :  { %2683 = vrot.lane.b32.xlu1 %v2643_v18, %s3184_s2  ;;  %2721 = vmatpush.msrb.mxu1 %v2692_v32 }
0x2618   :  { %v2678_v8 = vpop.permute.xlu0 %2677  ;;  %2722 = vmatpush.msrb.mxu1 %v2691_v16 }
0x2619   :  { %v2680_v55 = vmul.f32 %v2678_v8, %v2661_v37 }
0x261b   :  { %v2681_v53 = vsel %vm4446_vm8, %v2680_v55, %v4390_v33 }
0x261c   :  { %2687 = vrot.lane.b32.xlu2 %v2681_v53, %s3183_s0 }
0x2676   :  { %v2688_v7 = vpop.permute.xlu2 %2687 }
0x2688   :  { %v2684_v33 = vpop.permute.xlu1 %2683 }
0x2689   :  { %v2690_v42 = vsel %vm182_vm9, %v2684_v33, %v2688_v7 }
0x268a   :  { %2854 = vmatmul.msk.f32.vlgmr.msrb.gmra.mxu1 %vm100_vm0, %v2690_v42 }
0x2707   :  { %v2724_v43 = vpop.f32.mrf.mxu1 }
0x2708   :  { %v2725_v47 = vadd.f32 %v2724_v43, %v2702_v51 }
0x270a   :  { %2728 = vst.msk [vmem:[#allocation7] sm:$0x3] %vm2727_vm15, %v2725_v47 }
0x270b   :  { %2739 = dma.vmem_to_hbm [thread:$0]  %s2735_s28, 32, %s2737_s5, [#allocation6]  }
0x270c   :  { %3176 = dma.done.wait [#allocation6], 32  }
0x270d   :  { %3177 = vsyncadd [#allocation6], 4294967264 }
0x270e   :  { %2744 = vsyncpa [#allocation5], 1 }
0x270f   :  { %2745 = vsyncpa [#allocation6], 1 }

</bundles_post_ra>
